<compile_context>
chip_gen: v7x
topology: tpu7x:2x2x1
jax: 0.10.0
libtpu: 0.0.40
codegen_flags: <defaults>
</compile_context>

<pallas_src>
import functools

import jax
import jax.numpy as jnp
from jax import lax
from jax.experimental import pallas as pl
from jax.experimental.pallas import tpu as pltpu


# ----------------------------------------------------------------------------
# Fused Pallas kernel (one grid step = one frame, fwd+bwd branches stacked)
# ----------------------------------------------------------------------------
def _mse_kernel(xt_ref, xn_ref, xp_ref,
                w1bd_ref, bn1b_ref,
                dmat_ref, r32_ref,
                n4_ref, ss4b_ref,
                ph_ref, pw_ref, n2_ref, r16_ref, ss2b_ref,
                uh_ref, uw_ref,
                w3bd_ref, bn3b_ref,
                o_ref, *, n_segment):
    t = pl.program_id(0)
    tc = t % n_segment
    vf = jnp.where(tc < n_segment - 1, 1.0, 0.0)   # forward diff valid?
    vb = jnp.where(tc > 0, 1.0, 0.0)               # backward diff valid?

    def dotf(a, b):
        return jnp.dot(a, b, preferred_element_type=jnp.float32)

    def conv3x3(src, col_ref, row_ref):  # banded-matmul 3x3 conv, zero padded
        acc = dotf(row_ref[0], dotf(src, col_ref[0]))
        for dy in range(1, 3):
            acc = acc + dotf(row_ref[dy], dotf(src, col_ref[dy]))
        return acc

    w1bd = w1bd_ref[...]          # (W*C, W*cr), bn1 scale already folded in
    bn1b = bn1b_ref[...]          # (1, W*cr)

    x_t = xt_ref[0]               # (H, W*C) lane-dense frame
    h = x_t.shape[0]

    # conv1 + bn1: current frame, and both (boundary-clamped) neighbour frames
    b_t = dotf(x_t, w1bd) + bn1b
    x_nb = jnp.concatenate([xn_ref[0], xp_ref[0]], axis=0)          # (2H, W*C)
    b_nb = dotf(x_nb, w1bd) + bn1b

    # depthwise conv2 of the neighbour bottlenecks (both branches in one pass)
    c_nb = conv3x3(b_nb, dmat_ref, r32_ref)

    # temporal differences (+ zero frame at clip boundaries), stacked [fwd; bwd]
    d2 = jnp.concatenate([(c_nb[:h, :] - b_t) * vf,
                          (c_nb[h:, :] - b_t) * vb], axis=0)        # (2H, W*cr)

    # smallscale4 branch: 3x3 dense conv + bn (scale folded) at full resolution
    ss4 = conv3x3(d2, n4_ref, r32_ref) + ss4b_ref[...]

    # smallscale2 branch: 2x2 avg-pool -> 3x3 conv + bn -> nearest 2x upsample
    pooled = dotf(dotf(ph_ref[...], d2), pw_ref[...])
    ss2 = conv3x3(pooled, n2_ref, r16_ref) + ss2b_ref[...]
    up2 = dotf(dotf(uh_ref[...], ss2), uw_ref[...])

    # conv3 (1x1 cr->C) + bn3 + sigmoid - 0.5; 1/3 mix + bn3 scale folded into w3bd
    y2 = dotf(d2 + up2 + ss4, w3bd_ref[...]) + bn3b_ref[...]        # (2H, W*C)
    sig = 1.0 / (1.0 + jnp.exp(-y2)) - 0.5
    y = 0.5 * (sig[:h, :] + sig[h:, :])

    o_ref[0] = x_t * (1.0 + y)


# ----------------------------------------------------------------------------
# Weight preparation: express every spatial op as a small matrix (host, once)
# ----------------------------------------------------------------------------
def prepare_kernel_params(prm, H, W):
    f32 = jnp.float32
    C, cr = prm["w1"].shape
    Hp, Wp = H // 2, W // 2
    eye2 = jnp.eye(2, dtype=f32)
    eyecr = jnp.eye(cr, dtype=f32)

    def tile_row(v, reps):
        return jnp.tile(jnp.asarray(v, f32).reshape(1, -1), (1, reps))

    bn1s = tile_row(prm["bn1_s"], W)
    bn1b = tile_row(prm["bn1_b"], W)
    ss4s = tile_row(prm["bn_ss4_s"], W)
    ss4b = tile_row(prm["bn_ss4_b"], W)
    ss2s = tile_row(prm["bn_ss2_s"], Wp)
    ss2b = tile_row(prm["bn_ss2_b"], Wp)
    bn3s = tile_row(prm["bn3_s"], W)
    bn3b = tile_row(prm["bn3_b"], W)

    # 1x1 convs as block-diagonal matrices on the (H, W*channels) layout.
    # BN scales (and the 1/3 mix factor for conv3) are folded into the columns.
    w1bd = jnp.kron(jnp.eye(W, dtype=f32), prm["w1"].astype(f32)) * bn1s      # (W*C, W*cr)
    w3bd = jnp.kron(jnp.eye(W, dtype=f32), prm["w3"].astype(f32)) * bn3s / 3.0  # (W*cr, W*C)

    # depthwise 3x3: per-dy banded "column" (lane-mixing) matrices
    w2 = prm["w2_taps"].astype(f32).reshape(3, 3, cr)
    dmat = jnp.stack([
        sum(jnp.kron(jnp.eye(W, W, k=1 - dx, dtype=f32), jnp.diag(w2[dy, dx]))
            for dx in range(3))
        for dy in range(3)])                                        # (3, W*cr, W*cr)

    # dense 3x3 convs (cr -> cr): per-dy banded matrices (bn scale folded in)
    def banded(w_hwio, width):
        w_hwio = w_hwio.astype(f32)
        return jnp.stack([
            sum(jnp.kron(jnp.eye(width, width, k=1 - dx, dtype=f32), w_hwio[dy, dx])
                for dx in range(3))
            for dy in range(3)])
    n4 = banded(prm["w_ss4"], W) * ss4s                             # (3, W*cr, W*cr)
    n2 = banded(prm["w_ss2"], Wp) * ss2s                            # (3, Wp*cr, Wp*cr)

    # per-dy row-shift matrices, block-diagonal over the two stacked branches
    r32 = jnp.stack([jnp.kron(eye2, jnp.eye(H, H, k=dy - 1, dtype=f32))
                     for dy in range(3)])                           # (3, 2H, 2H)
    r16 = jnp.stack([jnp.kron(eye2, jnp.eye(Hp, Hp, k=dy - 1, dtype=f32))
                     for dy in range(3)])                           # (3, 2Hp, 2Hp)

    # 2x2 avg-pool and nearest-2x upsample as left/right matrices
    rep_h = jnp.repeat(jnp.eye(Hp, dtype=f32), 2, axis=1)           # (Hp, H)
    rep_w = jnp.repeat(jnp.eye(Wp, dtype=f32), 2, axis=1)           # (Wp, W)
    ph = jnp.kron(eye2, 0.5 * rep_h)                                # (2Hp, 2H)
    pw = jnp.kron(0.5 * rep_w.T, eyecr)                             # (W*cr, Wp*cr)
    uh = jnp.kron(eye2, rep_h.T)                                    # (2H, 2Hp)
    uw = jnp.kron(rep_w, eyecr)                                     # (Wp*cr, W*cr)

    return dict(
        w1bd=w1bd, bn1b=bn1b,
        dmat=dmat, r32=r32,
        n4=n4, ss4b=ss4b,
        ph=ph, pw=pw, n2=n2, r16=r16, ss2b=ss2b,
        uh=uh, uw=uw,
        w3bd=w3bd, bn3b=bn3b,
    )


def _const_index_map(ndim):
    def imap(t):
        return (0,) * ndim
    return imap


# ----------------------------------------------------------------------------
# Forward wrapper: one fused pallas_call over frames
# ----------------------------------------------------------------------------
@functools.partial(jax.jit, static_argnames=("n_segment",))
def msemodule_forward(x_nchw, kp, n_segment):
    nt, c, h, w = x_nchw.shape
    wc = w * c
    x_rows = jnp.transpose(x_nchw, (0, 2, 3, 1)).astype(jnp.float32).reshape(nt, h, wc)

    def self_map(t):
        return (t, 0, 0)

    def next_map(t):
        at_end = (t % n_segment) == (n_segment - 1)
        return (jnp.where(at_end, t, t + 1), 0, 0)

    def prev_map(t):
        at_start = (t % n_segment) == 0
        return (jnp.where(at_start, t, t - 1), 0, 0)

    frame_spec = lambda imap: pl.BlockSpec((1, h, wc), imap)

    names = ["w1bd", "bn1b", "dmat", "r32", "n4", "ss4b",
             "ph", "pw", "n2", "r16", "ss2b", "uh", "uw", "w3bd", "bn3b"]
    weights = [kp[k] for k in names]
    weight_specs = [pl.BlockSpec(tuple(wt.shape), _const_index_map(wt.ndim))
                    for wt in weights]

    out = pl.pallas_call(
        functools.partial(_mse_kernel, n_segment=n_segment),
        out_shape=jax.ShapeDtypeStruct((nt, h, wc), jnp.float32),
        grid=(nt,),
        in_specs=[frame_spec(self_map), frame_spec(next_map), frame_spec(prev_map)]
                 + weight_specs,
        out_specs=pl.BlockSpec((1, h, wc), self_map),
        compiler_params=pltpu.CompilerParams(dimension_semantics=("parallel",)),
    )(x_rows, x_rows, x_rows, *weights)

    return jnp.transpose(out.reshape(nt, h, w, c), (0, 3, 1, 2))


# ----------------------------------------------------------------------------
# Pure-JAX reference (mirrors the PyTorch forward, NCHW in / NCHW out)
# ----------------------------------------------------------------------------
def ref_forward(x_nchw, prm, n_segment):
    nt, c, h, w = x_nchw.shape
    n = nt // n_segment
    cr = prm["w1"].shape[1]
    dn = ("NHWC", "HWIO", "NHWC")
    hp = lax.Precision.HIGHEST
    x = jnp.transpose(x_nchw, (0, 2, 3, 1)).astype(jnp.float32)

    b = lax.conv_general_dilated(x, prm["w1"].reshape(1, 1, c, cr), (1, 1),
                                 "VALID", dimension_numbers=dn, precision=hp)
    b = b * prm["bn1_s"] + prm["bn1_b"]
    w2 = prm["w2_taps"].reshape(3, 3, cr)[:, :, None, :]
    cc = lax.conv_general_dilated(b, w2, (1, 1), "SAME", dimension_numbers=dn,
                                  feature_group_count=cr, precision=hp)
    b5 = b.reshape(n, n_segment, h, w, cr)
    c5 = cc.reshape(n, n_segment, h, w, cr)
    zf = jnp.zeros((n, 1, h, w, cr), jnp.float32)
    df = jnp.concatenate([c5[:, 1:] - b5[:, :-1], zf], 1).reshape(nt, h, w, cr)
    db = jnp.concatenate([zf, c5[:, :-1] - b5[:, 1:]], 1).reshape(nt, h, w, cr)

    def branch(d):
        pooled = 0.25 * (d[:, 0::2, 0::2] + d[:, 0::2, 1::2]
                         + d[:, 1::2, 0::2] + d[:, 1::2, 1::2])
        ss2 = lax.conv_general_dilated(pooled, prm["w_ss2"], (1, 1), "SAME",
                                       dimension_numbers=dn, precision=hp)
        ss2 = ss2 * prm["bn_ss2_s"] + prm["bn_ss2_b"]
        ss2 = jnp.repeat(jnp.repeat(ss2, 2, 1), 2, 2)
        ss4 = lax.conv_general_dilated(d, prm["w_ss4"], (1, 1), "SAME",
                                       dimension_numbers=dn, precision=hp)
        ss4 = ss4 * prm["bn_ss4_s"] + prm["bn_ss4_b"]
        mix = (d + ss2 + ss4) / 3.0
        y = lax.conv_general_dilated(mix, prm["w3"].reshape(1, 1, cr, c), (1, 1),
                                     "VALID", dimension_numbers=dn, precision=hp)
        y = y * prm["bn3_s"] + prm["bn3_b"]
        return jax.nn.sigmoid(y) - 0.5

    y = 0.5 * branch(df) + 0.5 * branch(db)
    out = x + x * y
    return jnp.transpose(out, (0, 3, 1, 2))


# ----------------------------------------------------------------------------
# Deterministic parameter construction
# ----------------------------------------------------------------------------
def make_params(key, channel):
    cr = channel // 16
    ks = jax.random.split(key, 10)

    def bn_fold(k, nfeat):
        kg, kb, km, kv = jax.random.split(k, 4)
        gamma = 1.0 + 0.1 * jax.random.normal(kg, (nfeat,))
        beta = 0.1 * jax.random.normal(kb, (nfeat,))
        mean = 0.1 * jax.random.normal(km, (nfeat,))
        var = 1.0 + 0.5 * jax.random.uniform(kv, (nfeat,))
        scale = gamma / jnp.sqrt(var + 1e-5)
        bias = beta - mean * scale
        return (scale.reshape(1, nfeat).astype(jnp.float32),
                bias.reshape(1, nfeat).astype(jnp.float32))

    prm = {
        "w1": (0.1 * jax.random.normal(ks[0], (channel, cr))).astype(jnp.float32),
        "w2_taps": (0.1 * jax.random.normal(ks[1], (9, cr))).astype(jnp.float32),
        "w_ss2": (0.1 * jax.random.normal(ks[2], (3, 3, cr, cr))).astype(jnp.float32),
        "w_ss4": (0.1 * jax.random.normal(ks[3], (3, 3, cr, cr))).astype(jnp.float32),
        "w3": (0.1 * jax.random.normal(ks[4], (cr, channel))).astype(jnp.float32),
    }
    prm["bn1_s"], prm["bn1_b"] = bn_fold(ks[5], cr)
    prm["bn_ss2_s"], prm["bn_ss2_b"] = bn_fold(ks[6], cr)
    prm["bn_ss4_s"], prm["bn_ss4_b"] = bn_fold(ks[7], cr)
    prm["bn3_s"], prm["bn3_b"] = bn_fold(ks[8], channel)
    return prm, ks[9]


if __name__ == "__main__":
    channel = 64          # reduction=16 -> bottleneck channels cr = 4
    n_segment = 8
    batch = 1             # NT = batch * n_segment = 8
    H = W = 16

    key = jax.random.PRNGKey(0)
    prm, kx = make_params(key, channel)
    x = jax.random.normal(kx, (batch * n_segment, channel, H, W), jnp.float32)

    kp = prepare_kernel_params(prm, H, W)
    out = msemodule_forward(x, kp, n_segment)
    out = jax.block_until_ready(out)

    ref = ref_forward(x, prm, n_segment)
    err = float(jnp.max(jnp.abs(out - ref)))
    if not bool(jnp.allclose(out, ref, atol=2e-3, rtol=2e-3)):
        raise SystemExit(f"mismatch vs reference, max abs err = {err:e}")

    print("KERNEL_OK")
</pallas_src>

<mosaic_0001>
module attributes {stable_mosaic.version = 11 : i64} {
  func.func @_mse_kernel(%arg0: i32, %arg1: memref<1x16x1024xf32, #tpu.memory_space<vmem>>, %arg2: memref<1x16x1024xf32, #tpu.memory_space<vmem>>, %arg3: memref<1x16x1024xf32, #tpu.memory_space<vmem>>, %arg4: memref<1024x64xf32, #tpu.memory_space<vmem>>, %arg5: memref<1x64xf32, #tpu.memory_space<vmem>>, %arg6: memref<3x64x64xf32, #tpu.memory_space<vmem>>, %arg7: memref<3x32x32xf32, #tpu.memory_space<vmem>>, %arg8: memref<3x64x64xf32, #tpu.memory_space<vmem>>, %arg9: memref<1x64xf32, #tpu.memory_space<vmem>>, %arg10: memref<16x32xf32, #tpu.memory_space<vmem>>, %arg11: memref<64x32xf32, #tpu.memory_space<vmem>>, %arg12: memref<3x32x32xf32, #tpu.memory_space<vmem>>, %arg13: memref<3x16x16xf32, #tpu.memory_space<vmem>>, %arg14: memref<1x32xf32, #tpu.memory_space<vmem>>, %arg15: memref<32x16xf32, #tpu.memory_space<vmem>>, %arg16: memref<32x64xf32, #tpu.memory_space<vmem>>, %arg17: memref<64x1024xf32, #tpu.memory_space<vmem>>, %arg18: memref<1x1024xf32, #tpu.memory_space<vmem>>, %arg19: memref<1x16x1024xf32, #tpu.memory_space<vmem>>) attributes {dimension_semantics = [#tpu.dimension_semantics<parallel>], iteration_bounds = array<i64: 8>, scalar_prefetch = 0 : i64, scratch_operands = 0 : i64, tpu.core_type = #tpu.core_type<tc>, window_params = [{transform_indices = @transform_0, window_bounds = array<i64: 1, 16, 1024>}, {transform_indices = @transform_1, window_bounds = array<i64: 1, 16, 1024>}, {transform_indices = @transform_2, window_bounds = array<i64: 1, 16, 1024>}, {pipeline_mode = #tpu.pipeline_mode<synchronous>, transform_indices = @transform_3, window_bounds = array<i64: 1024, 64>}, {pipeline_mode = #tpu.pipeline_mode<synchronous>, transform_indices = @transform_4, window_bounds = array<i64: 1, 64>}, {pipeline_mode = #tpu.pipeline_mode<synchronous>, transform_indices = @transform_5, window_bounds = array<i64: 3, 64, 64>}, {pipeline_mode = #tpu.pipeline_mode<synchronous>, transform_indices = @transform_6, window_bounds = array<i64: 3, 32, 32>}, {pipeline_mode = #tpu.pipeline_mode<synchronous>, transform_indices = @transform_7, window_bounds = array<i64: 3, 64, 64>}, {pipeline_mode = #tpu.pipeline_mode<synchronous>, transform_indices = @transform_8, window_bounds = array<i64: 1, 64>}, {pipeline_mode = #tpu.pipeline_mode<synchronous>, transform_indices = @transform_9, window_bounds = array<i64: 16, 32>}, {pipeline_mode = #tpu.pipeline_mode<synchronous>, transform_indices = @transform_10, window_bounds = array<i64: 64, 32>}, {pipeline_mode = #tpu.pipeline_mode<synchronous>, transform_indices = @transform_11, window_bounds = array<i64: 3, 32, 32>}, {pipeline_mode = #tpu.pipeline_mode<synchronous>, transform_indices = @transform_12, window_bounds = array<i64: 3, 16, 16>}, {pipeline_mode = #tpu.pipeline_mode<synchronous>, transform_indices = @transform_13, window_bounds = array<i64: 1, 32>}, {pipeline_mode = #tpu.pipeline_mode<synchronous>, transform_indices = @transform_14, window_bounds = array<i64: 32, 16>}, {pipeline_mode = #tpu.pipeline_mode<synchronous>, transform_indices = @transform_15, window_bounds = array<i64: 32, 64>}, {pipeline_mode = #tpu.pipeline_mode<synchronous>, transform_indices = @transform_16, window_bounds = array<i64: 64, 1024>}, {pipeline_mode = #tpu.pipeline_mode<synchronous>, transform_indices = @transform_17, window_bounds = array<i64: 1, 1024>}, {transform_indices = @transform_18, window_bounds = array<i64: 1, 16, 1024>}]} {
    %c8_i32 = arith.constant 8 : i32
    %c0_i32 = arith.constant 0 : i32
    %0 = arith.cmpi eq, %c8_i32, %c0_i32 : i32
    %c1_i32 = arith.constant 1 : i32
    %1 = arith.select %0, %c1_i32, %c8_i32 : i32
    %2 = arith.remsi %arg0, %1 : i32
    %c0_i32_0 = arith.constant 0 : i32
    %3 = arith.cmpi ne, %2, %c0_i32_0 : i32
    %c0_i32_1 = arith.constant 0 : i32
    %4 = arith.cmpi slt, %2, %c0_i32_1 : i32
    %c0_i32_2 = arith.constant 0 : i32
    %5 = arith.cmpi slt, %1, %c0_i32_2 : i32
    %6 = arith.xori %4, %5 : i1
    %7 = arith.andi %6, %3 : i1
    %8 = arith.addi %2, %1 : i32
    %9 = arith.select %7, %8, %2 : i32
    %c7_i32 = arith.constant 7 : i32
    %10 = arith.cmpi slt, %9, %c7_i32 : i32
    %cst = arith.constant 1.000000e+00 : f32
    %cst_3 = arith.constant 0.000000e+00 : f32
    %11 = arith.select %10, %cst, %cst_3 : f32
    %c0_i32_4 = arith.constant 0 : i32
    %12 = arith.cmpi sgt, %9, %c0_i32_4 : i32
    %cst_5 = arith.constant 1.000000e+00 : f32
    %cst_6 = arith.constant 0.000000e+00 : f32
    %13 = arith.select %12, %cst_5, %cst_6 : f32
    %c0 = arith.constant 0 : index
    %c0_7 = arith.constant 0 : index
    %14 = vector.load %arg4[%c0, %c0_7] : memref<1024x64xf32, #tpu.memory_space<vmem>>, vector<1024x64xf32>
    %c0_8 = arith.constant 0 : index
    %c0_9 = arith.constant 0 : index
    %15 = vector.load %arg5[%c0_8, %c0_9] : memref<1x64xf32, #tpu.memory_space<vmem>>, vector<1x64xf32>
    %c0_10 = arith.constant 0 : index
    %c0_11 = arith.constant 0 : index
    %c0_12 = arith.constant 0 : index
    %16 = vector.load %arg1[%c0_10, %c0_11, %c0_12] : memref<1x16x1024xf32, #tpu.memory_space<vmem>>, vector<1x16x1024xf32>
    %17 = vector.shape_cast %16 : vector<1x16x1024xf32> to vector<16x1024xf32>
    %cst_13 = arith.constant dense<0.000000e+00> : vector<16x64xf32>
    %18 = tpu.matmul %17, %14, %cst_13 {dimension_numbers = #tpu.dot_dimension_numbers<[1], [0], [0], [1], [0, 0, 1, 1], [], []>} : vector<16x1024xf32>, vector<1024x64xf32>, vector<16x64xf32> -> vector<16x64xf32>
    %19 = vector.broadcast %15 : vector<1x64xf32> to vector<16x64xf32>
    %20 = arith.addf %18, %19 : vector<16x64xf32>
    %c0_14 = arith.constant 0 : index
    %c0_15 = arith.constant 0 : index
    %c0_16 = arith.constant 0 : index
    %21 = vector.load %arg2[%c0_14, %c0_15, %c0_16] : memref<1x16x1024xf32, #tpu.memory_space<vmem>>, vector<1x16x1024xf32>
    %22 = vector.shape_cast %21 : vector<1x16x1024xf32> to vector<16x1024xf32>
    %c0_17 = arith.constant 0 : index
    %c0_18 = arith.constant 0 : index
    %c0_19 = arith.constant 0 : index
    %23 = vector.load %arg3[%c0_17, %c0_18, %c0_19] : memref<1x16x1024xf32, #tpu.memory_space<vmem>>, vector<1x16x1024xf32>
    %24 = vector.shape_cast %23 : vector<1x16x1024xf32> to vector<16x1024xf32>
    %25 = tpu.concatenate %22, %24 in 0 : vector<16x1024xf32>, vector<16x1024xf32> -> vector<32x1024xf32>
    %cst_20 = arith.constant dense<0.000000e+00> : vector<32x64xf32>
    %26 = tpu.matmul %25, %14, %cst_20 {dimension_numbers = #tpu.dot_dimension_numbers<[1], [0], [0], [1], [0, 0, 1, 1], [], []>} : vector<32x1024xf32>, vector<1024x64xf32>, vector<32x64xf32> -> vector<32x64xf32>
    %27 = vector.broadcast %15 : vector<1x64xf32> to vector<32x64xf32>
    %28 = arith.addf %26, %27 : vector<32x64xf32>
    %c0_21 = arith.constant 0 : index
    %c0_22 = arith.constant 0 : index
    %c0_23 = arith.constant 0 : index
    %29 = vector.load %arg7[%c0_21, %c0_22, %c0_23] : memref<3x32x32xf32, #tpu.memory_space<vmem>>, vector<1x32x32xf32>
    %30 = vector.shape_cast %29 : vector<1x32x32xf32> to vector<32x32xf32>
    %c0_24 = arith.constant 0 : index
    %c0_25 = arith.constant 0 : index
    %c0_26 = arith.constant 0 : index
    %31 = vector.load %arg6[%c0_24, %c0_25, %c0_26] : memref<3x64x64xf32, #tpu.memory_space<vmem>>, vector<1x64x64xf32>
    %32 = vector.shape_cast %31 : vector<1x64x64xf32> to vector<64x64xf32>
    %cst_27 = arith.constant dense<0.000000e+00> : vector<32x64xf32>
    %33 = tpu.matmul %28, %32, %cst_27 {dimension_numbers = #tpu.dot_dimension_numbers<[1], [0], [0], [1], [0, 0, 1, 1], [], []>} : vector<32x64xf32>, vector<64x64xf32>, vector<32x64xf32> -> vector<32x64xf32>
    %cst_28 = arith.constant dense<0.000000e+00> : vector<32x64xf32>
    %34 = tpu.matmul %30, %33, %cst_28 {dimension_numbers = #tpu.dot_dimension_numbers<[1], [0], [0], [1], [0, 0, 1, 1], [], []>} : vector<32x32xf32>, vector<32x64xf32>, vector<32x64xf32> -> vector<32x64xf32>
    %c1 = arith.constant 1 : index
    %c0_29 = arith.constant 0 : index
    %c0_30 = arith.constant 0 : index
    %35 = vector.load %arg7[%c1, %c0_29, %c0_30] : memref<3x32x32xf32, #tpu.memory_space<vmem>>, vector<1x32x32xf32>
    %36 = vector.shape_cast %35 : vector<1x32x32xf32> to vector<32x32xf32>
    %c1_31 = arith.constant 1 : index
    %c0_32 = arith.constant 0 : index
    %c0_33 = arith.constant 0 : index
    %37 = vector.load %arg6[%c1_31, %c0_32, %c0_33] : memref<3x64x64xf32, #tpu.memory_space<vmem>>, vector<1x64x64xf32>
    %38 = vector.shape_cast %37 : vector<1x64x64xf32> to vector<64x64xf32>
    %cst_34 = arith.constant dense<0.000000e+00> : vector<32x64xf32>
    %39 = tpu.matmul %28, %38, %cst_34 {dimension_numbers = #tpu.dot_dimension_numbers<[1], [0], [0], [1], [0, 0, 1, 1], [], []>} : vector<32x64xf32>, vector<64x64xf32>, vector<32x64xf32> -> vector<32x64xf32>
    %cst_35 = arith.constant dense<0.000000e+00> : vector<32x64xf32>
    %40 = tpu.matmul %36, %39, %cst_35 {dimension_numbers = #tpu.dot_dimension_numbers<[1], [0], [0], [1], [0, 0, 1, 1], [], []>} : vector<32x32xf32>, vector<32x64xf32>, vector<32x64xf32> -> vector<32x64xf32>
    %41 = arith.addf %34, %40 : vector<32x64xf32>
    %c2 = arith.constant 2 : index
    %c0_36 = arith.constant 0 : index
    %c0_37 = arith.constant 0 : index
    %42 = vector.load %arg7[%c2, %c0_36, %c0_37] : memref<3x32x32xf32, #tpu.memory_space<vmem>>, vector<1x32x32xf32>
    %43 = vector.shape_cast %42 : vector<1x32x32xf32> to vector<32x32xf32>
    %c2_38 = arith.constant 2 : index
    %c0_39 = arith.constant 0 : index
    %c0_40 = arith.constant 0 : index
    %44 = vector.load %arg6[%c2_38, %c0_39, %c0_40] : memref<3x64x64xf32, #tpu.memory_space<vmem>>, vector<1x64x64xf32>
    %45 = vector.shape_cast %44 : vector<1x64x64xf32> to vector<64x64xf32>
    %cst_41 = arith.constant dense<0.000000e+00> : vector<32x64xf32>
    %46 = tpu.matmul %28, %45, %cst_41 {dimension_numbers = #tpu.dot_dimension_numbers<[1], [0], [0], [1], [0, 0, 1, 1], [], []>} : vector<32x64xf32>, vector<64x64xf32>, vector<32x64xf32> -> vector<32x64xf32>
    %cst_42 = arith.constant dense<0.000000e+00> : vector<32x64xf32>
    %47 = tpu.matmul %43, %46, %cst_42 {dimension_numbers = #tpu.dot_dimension_numbers<[1], [0], [0], [1], [0, 0, 1, 1], [], []>} : vector<32x32xf32>, vector<32x64xf32>, vector<32x64xf32> -> vector<32x64xf32>
    %48 = arith.addf %41, %47 : vector<32x64xf32>
    %49 = vector.extract_strided_slice %48 {offsets = [0, 0], sizes = [16, 64], strides = [1, 1]} : vector<32x64xf32> to vector<16x64xf32>
    %50 = arith.subf %49, %20 : vector<16x64xf32>
    %51 = vector.broadcast %11 : f32 to vector<16x64xf32>
    %52 = arith.mulf %50, %51 : vector<16x64xf32>
    %53 = vector.extract_strided_slice %48 {offsets = [16, 0], sizes = [16, 64], strides = [1, 1]} : vector<32x64xf32> to vector<16x64xf32>
    %54 = arith.subf %53, %20 : vector<16x64xf32>
    %55 = vector.broadcast %13 : f32 to vector<16x64xf32>
    %56 = arith.mulf %54, %55 : vector<16x64xf32>
    %57 = tpu.concatenate %52, %56 in 0 : vector<16x64xf32>, vector<16x64xf32> -> vector<32x64xf32>
    %c0_43 = arith.constant 0 : index
    %c0_44 = arith.constant 0 : index
    %c0_45 = arith.constant 0 : index
    %58 = vector.load %arg7[%c0_43, %c0_44, %c0_45] : memref<3x32x32xf32, #tpu.memory_space<vmem>>, vector<1x32x32xf32>
    %59 = vector.shape_cast %58 : vector<1x32x32xf32> to vector<32x32xf32>
    %c0_46 = arith.constant 0 : index
    %c0_47 = arith.constant 0 : index
    %c0_48 = arith.constant 0 : index
    %60 = vector.load %arg8[%c0_46, %c0_47, %c0_48] : memref<3x64x64xf32, #tpu.memory_space<vmem>>, vector<1x64x64xf32>
    %61 = vector.shape_cast %60 : vector<1x64x64xf32> to vector<64x64xf32>
    %cst_49 = arith.constant dense<0.000000e+00> : vector<32x64xf32>
    %62 = tpu.matmul %57, %61, %cst_49 {dimension_numbers = #tpu.dot_dimension_numbers<[1], [0], [0], [1], [0, 0, 1, 1], [], []>} : vector<32x64xf32>, vector<64x64xf32>, vector<32x64xf32> -> vector<32x64xf32>
    %cst_50 = arith.constant dense<0.000000e+00> : vector<32x64xf32>
    %63 = tpu.matmul %59, %62, %cst_50 {dimension_numbers = #tpu.dot_dimension_numbers<[1], [0], [0], [1], [0, 0, 1, 1], [], []>} : vector<32x32xf32>, vector<32x64xf32>, vector<32x64xf32> -> vector<32x64xf32>
    %c1_51 = arith.constant 1 : index
    %c0_52 = arith.constant 0 : index
    %c0_53 = arith.constant 0 : index
    %64 = vector.load %arg7[%c1_51, %c0_52, %c0_53] : memref<3x32x32xf32, #tpu.memory_space<vmem>>, vector<1x32x32xf32>
    %65 = vector.shape_cast %64 : vector<1x32x32xf32> to vector<32x32xf32>
    %c1_54 = arith.constant 1 : index
    %c0_55 = arith.constant 0 : index
    %c0_56 = arith.constant 0 : index
    %66 = vector.load %arg8[%c1_54, %c0_55, %c0_56] : memref<3x64x64xf32, #tpu.memory_space<vmem>>, vector<1x64x64xf32>
    %67 = vector.shape_cast %66 : vector<1x64x64xf32> to vector<64x64xf32>
    %cst_57 = arith.constant dense<0.000000e+00> : vector<32x64xf32>
    %68 = tpu.matmul %57, %67, %cst_57 {dimension_numbers = #tpu.dot_dimension_numbers<[1], [0], [0], [1], [0, 0, 1, 1], [], []>} : vector<32x64xf32>, vector<64x64xf32>, vector<32x64xf32> -> vector<32x64xf32>
    %cst_58 = arith.constant dense<0.000000e+00> : vector<32x64xf32>
    %69 = tpu.matmul %65, %68, %cst_58 {dimension_numbers = #tpu.dot_dimension_numbers<[1], [0], [0], [1], [0, 0, 1, 1], [], []>} : vector<32x32xf32>, vector<32x64xf32>, vector<32x64xf32> -> vector<32x64xf32>
    %70 = arith.addf %63, %69 : vector<32x64xf32>
    %c2_59 = arith.constant 2 : index
    %c0_60 = arith.constant 0 : index
    %c0_61 = arith.constant 0 : index
    %71 = vector.load %arg7[%c2_59, %c0_60, %c0_61] : memref<3x32x32xf32, #tpu.memory_space<vmem>>, vector<1x32x32xf32>
    %72 = vector.shape_cast %71 : vector<1x32x32xf32> to vector<32x32xf32>
    %c2_62 = arith.constant 2 : index
    %c0_63 = arith.constant 0 : index
    %c0_64 = arith.constant 0 : index
    %73 = vector.load %arg8[%c2_62, %c0_63, %c0_64] : memref<3x64x64xf32, #tpu.memory_space<vmem>>, vector<1x64x64xf32>
    %74 = vector.shape_cast %73 : vector<1x64x64xf32> to vector<64x64xf32>
    %cst_65 = arith.constant dense<0.000000e+00> : vector<32x64xf32>
    %75 = tpu.matmul %57, %74, %cst_65 {dimension_numbers = #tpu.dot_dimension_numbers<[1], [0], [0], [1], [0, 0, 1, 1], [], []>} : vector<32x64xf32>, vector<64x64xf32>, vector<32x64xf32> -> vector<32x64xf32>
    %cst_66 = arith.constant dense<0.000000e+00> : vector<32x64xf32>
    %76 = tpu.matmul %72, %75, %cst_66 {dimension_numbers = #tpu.dot_dimension_numbers<[1], [0], [0], [1], [0, 0, 1, 1], [], []>} : vector<32x32xf32>, vector<32x64xf32>, vector<32x64xf32> -> vector<32x64xf32>
    %77 = arith.addf %70, %76 : vector<32x64xf32>
    %c0_67 = arith.constant 0 : index
    %c0_68 = arith.constant 0 : index
    %78 = vector.load %arg9[%c0_67, %c0_68] : memref<1x64xf32, #tpu.memory_space<vmem>>, vector<1x64xf32>
    %79 = vector.broadcast %78 : vector<1x64xf32> to vector<32x64xf32>
    %80 = arith.addf %77, %79 : vector<32x64xf32>
    %c0_69 = arith.constant 0 : index
    %c0_70 = arith.constant 0 : index
    %81 = vector.load %arg10[%c0_69, %c0_70] : memref<16x32xf32, #tpu.memory_space<vmem>>, vector<16x32xf32>
    %cst_71 = arith.constant dense<0.000000e+00> : vector<16x64xf32>
    %82 = tpu.matmul %81, %57, %cst_71 {dimension_numbers = #tpu.dot_dimension_numbers<[1], [0], [0], [1], [0, 0, 1, 1], [], []>} : vector<16x32xf32>, vector<32x64xf32>, vector<16x64xf32> -> vector<16x64xf32>
    %c0_72 = arith.constant 0 : index
    %c0_73 = arith.constant 0 : index
    %83 = vector.load %arg11[%c0_72, %c0_73] : memref<64x32xf32, #tpu.memory_space<vmem>>, vector<64x32xf32>
    %cst_74 = arith.constant dense<0.000000e+00> : vector<16x32xf32>
    %84 = tpu.matmul %82, %83, %cst_74 {dimension_numbers = #tpu.dot_dimension_numbers<[1], [0], [0], [1], [0, 0, 1, 1], [], []>} : vector<16x64xf32>, vector<64x32xf32>, vector<16x32xf32> -> vector<16x32xf32>
    %c0_75 = arith.constant 0 : index
    %c0_76 = arith.constant 0 : index
    %c0_77 = arith.constant 0 : index
    %85 = vector.load %arg13[%c0_75, %c0_76, %c0_77] : memref<3x16x16xf32, #tpu.memory_space<vmem>>, vector<1x16x16xf32>
    %86 = vector.shape_cast %85 : vector<1x16x16xf32> to vector<16x16xf32>
    %c0_78 = arith.constant 0 : index
    %c0_79 = arith.constant 0 : index
    %c0_80 = arith.constant 0 : index
    %87 = vector.load %arg12[%c0_78, %c0_79, %c0_80] : memref<3x32x32xf32, #tpu.memory_space<vmem>>, vector<1x32x32xf32>
    %88 = vector.shape_cast %87 : vector<1x32x32xf32> to vector<32x32xf32>
    %cst_81 = arith.constant dense<0.000000e+00> : vector<16x32xf32>
    %89 = tpu.matmul %84, %88, %cst_81 {dimension_numbers = #tpu.dot_dimension_numbers<[1], [0], [0], [1], [0, 0, 1, 1], [], []>} : vector<16x32xf32>, vector<32x32xf32>, vector<16x32xf32> -> vector<16x32xf32>
    %cst_82 = arith.constant dense<0.000000e+00> : vector<16x32xf32>
    %90 = tpu.matmul %86, %89, %cst_82 {dimension_numbers = #tpu.dot_dimension_numbers<[1], [0], [0], [1], [0, 0, 1, 1], [], []>} : vector<16x16xf32>, vector<16x32xf32>, vector<16x32xf32> -> vector<16x32xf32>
    %c1_83 = arith.constant 1 : index
    %c0_84 = arith.constant 0 : index
    %c0_85 = arith.constant 0 : index
    %91 = vector.load %arg13[%c1_83, %c0_84, %c0_85] : memref<3x16x16xf32, #tpu.memory_space<vmem>>, vector<1x16x16xf32>
    %92 = vector.shape_cast %91 : vector<1x16x16xf32> to vector<16x16xf32>
    %c1_86 = arith.constant 1 : index
    %c0_87 = arith.constant 0 : index
    %c0_88 = arith.constant 0 : index
    %93 = vector.load %arg12[%c1_86, %c0_87, %c0_88] : memref<3x32x32xf32, #tpu.memory_space<vmem>>, vector<1x32x32xf32>
    %94 = vector.shape_cast %93 : vector<1x32x32xf32> to vector<32x32xf32>
    %cst_89 = arith.constant dense<0.000000e+00> : vector<16x32xf32>
    %95 = tpu.matmul %84, %94, %cst_89 {dimension_numbers = #tpu.dot_dimension_numbers<[1], [0], [0], [1], [0, 0, 1, 1], [], []>} : vector<16x32xf32>, vector<32x32xf32>, vector<16x32xf32> -> vector<16x32xf32>
    %cst_90 = arith.constant dense<0.000000e+00> : vector<16x32xf32>
    %96 = tpu.matmul %92, %95, %cst_90 {dimension_numbers = #tpu.dot_dimension_numbers<[1], [0], [0], [1], [0, 0, 1, 1], [], []>} : vector<16x16xf32>, vector<16x32xf32>, vector<16x32xf32> -> vector<16x32xf32>
    %97 = arith.addf %90, %96 : vector<16x32xf32>
    %c2_91 = arith.constant 2 : index
    %c0_92 = arith.constant 0 : index
    %c0_93 = arith.constant 0 : index
    %98 = vector.load %arg13[%c2_91, %c0_92, %c0_93] : memref<3x16x16xf32, #tpu.memory_space<vmem>>, vector<1x16x16xf32>
    %99 = vector.shape_cast %98 : vector<1x16x16xf32> to vector<16x16xf32>
    %c2_94 = arith.constant 2 : index
    %c0_95 = arith.constant 0 : index
    %c0_96 = arith.constant 0 : index
    %100 = vector.load %arg12[%c2_94, %c0_95, %c0_96] : memref<3x32x32xf32, #tpu.memory_space<vmem>>, vector<1x32x32xf32>
    %101 = vector.shape_cast %100 : vector<1x32x32xf32> to vector<32x32xf32>
    %cst_97 = arith.constant dense<0.000000e+00> : vector<16x32xf32>
    %102 = tpu.matmul %84, %101, %cst_97 {dimension_numbers = #tpu.dot_dimension_numbers<[1], [0], [0], [1], [0, 0, 1, 1], [], []>} : vector<16x32xf32>, vector<32x32xf32>, vector<16x32xf32> -> vector<16x32xf32>
    %cst_98 = arith.constant dense<0.000000e+00> : vector<16x32xf32>
    %103 = tpu.matmul %99, %102, %cst_98 {dimension_numbers = #tpu.dot_dimension_numbers<[1], [0], [0], [1], [0, 0, 1, 1], [], []>} : vector<16x16xf32>, vector<16x32xf32>, vector<16x32xf32> -> vector<16x32xf32>
    %104 = arith.addf %97, %103 : vector<16x32xf32>
    %c0_99 = arith.constant 0 : index
    %c0_100 = arith.constant 0 : index
    %105 = vector.load %arg14[%c0_99, %c0_100] : memref<1x32xf32, #tpu.memory_space<vmem>>, vector<1x32xf32>
    %106 = vector.broadcast %105 : vector<1x32xf32> to vector<16x32xf32>
    %107 = arith.addf %104, %106 : vector<16x32xf32>
    %c0_101 = arith.constant 0 : index
    %c0_102 = arith.constant 0 : index
    %108 = vector.load %arg15[%c0_101, %c0_102] : memref<32x16xf32, #tpu.memory_space<vmem>>, vector<32x16xf32>
    %cst_103 = arith.constant dense<0.000000e+00> : vector<32x32xf32>
    %109 = tpu.matmul %108, %107, %cst_103 {dimension_numbers = #tpu.dot_dimension_numbers<[1], [0], [0], [1], [0, 0, 1, 1], [], []>} : vector<32x16xf32>, vector<16x32xf32>, vector<32x32xf32> -> vector<32x32xf32>
    %c0_104 = arith.constant 0 : index
    %c0_105 = arith.constant 0 : index
    %110 = vector.load %arg16[%c0_104, %c0_105] : memref<32x64xf32, #tpu.memory_space<vmem>>, vector<32x64xf32>
    %cst_106 = arith.constant dense<0.000000e+00> : vector<32x64xf32>
    %111 = tpu.matmul %109, %110, %cst_106 {dimension_numbers = #tpu.dot_dimension_numbers<[1], [0], [0], [1], [0, 0, 1, 1], [], []>} : vector<32x32xf32>, vector<32x64xf32>, vector<32x64xf32> -> vector<32x64xf32>
    %112 = arith.addf %57, %111 : vector<32x64xf32>
    %113 = arith.addf %112, %80 : vector<32x64xf32>
    %c0_107 = arith.constant 0 : index
    %c0_108 = arith.constant 0 : index
    %114 = vector.load %arg17[%c0_107, %c0_108] : memref<64x1024xf32, #tpu.memory_space<vmem>>, vector<64x1024xf32>
    %cst_109 = arith.constant dense<0.000000e+00> : vector<32x1024xf32>
    %115 = tpu.matmul %113, %114, %cst_109 {dimension_numbers = #tpu.dot_dimension_numbers<[1], [0], [0], [1], [0, 0, 1, 1], [], []>} : vector<32x64xf32>, vector<64x1024xf32>, vector<32x1024xf32> -> vector<32x1024xf32>
    %c0_110 = arith.constant 0 : index
    %c0_111 = arith.constant 0 : index
    %116 = vector.load %arg18[%c0_110, %c0_111] : memref<1x1024xf32, #tpu.memory_space<vmem>>, vector<1x1024xf32>
    %117 = vector.broadcast %116 : vector<1x1024xf32> to vector<32x1024xf32>
    %118 = arith.addf %115, %117 : vector<32x1024xf32>
    %cst_112 = arith.constant 0.000000e+00 : f32
    %119 = vector.broadcast %cst_112 : f32 to vector<32x1024xf32>
    %120 = arith.subf %119, %118 : vector<32x1024xf32>
    %121 = math.exp %120 : vector<32x1024xf32>
    %cst_113 = arith.constant 1.000000e+00 : f32
    %122 = vector.broadcast %cst_113 : f32 to vector<32x1024xf32>
    %123 = arith.addf %122, %121 : vector<32x1024xf32>
    %cst_114 = arith.constant 1.000000e+00 : f32
    %124 = vector.broadcast %cst_114 : f32 to vector<32x1024xf32>
    %125 = arith.divf %124, %123 : vector<32x1024xf32>
    %cst_115 = arith.constant 5.000000e-01 : f32
    %126 = vector.broadcast %cst_115 : f32 to vector<32x1024xf32>
    %127 = arith.subf %125, %126 : vector<32x1024xf32>
    %128 = vector.extract_strided_slice %127 {offsets = [0, 0], sizes = [16, 1024], strides = [1, 1]} : vector<32x1024xf32> to vector<16x1024xf32>
    %129 = vector.extract_strided_slice %127 {offsets = [16, 0], sizes = [16, 1024], strides = [1, 1]} : vector<32x1024xf32> to vector<16x1024xf32>
    %130 = arith.addf %128, %129 : vector<16x1024xf32>
    %cst_116 = arith.constant 5.000000e-01 : f32
    %131 = vector.broadcast %cst_116 : f32 to vector<16x1024xf32>
    %132 = arith.mulf %131, %130 : vector<16x1024xf32>
    %cst_117 = arith.constant 1.000000e+00 : f32
    %133 = vector.broadcast %cst_117 : f32 to vector<16x1024xf32>
    %134 = arith.addf %133, %132 : vector<16x1024xf32>
    %135 = arith.mulf %17, %134 : vector<16x1024xf32>
    %c0_118 = arith.constant 0 : index
    %c0_119 = arith.constant 0 : index
    %c0_120 = arith.constant 0 : index
    %136 = vector.load %arg19[%c0_118, %c0_119, %c0_120] : memref<1x16x1024xf32, #tpu.memory_space<vmem>>, vector<1x16x1024xf32>
    %137 = vector.shape_cast %136 : vector<1x16x1024xf32> to vector<16x1024xf32>
    %138 = vector.shape_cast %135 : vector<16x1024xf32> to vector<1x16x1024xf32>
    tpu.vector_store %arg19[%c0_118, %c0_119, %c0_120], %138 {strides = array<i32>} : memref<1x16x1024xf32, #tpu.memory_space<vmem>>, vector<1x16x1024xf32>,
    return
  }
  func.func @transform_0(%arg0: i32) -> (i32, i32, i32) {
    %c0_i32 = arith.constant 0 : i32
    %c0_i32_0 = arith.constant 0 : i32
    %c0_i32_1 = arith.constant 0 : i32
    return %arg0, %c0_i32, %c0_i32_0 : i32, i32, i32
  }
  func.func @transform_1(%arg0: i32) -> (i32, i32, i32) {
    %c8_i32 = arith.constant 8 : i32
    %c0_i32 = arith.constant 0 : i32
    %0 = arith.cmpi eq, %c8_i32, %c0_i32 : i32
    %c1_i32 = arith.constant 1 : i32
    %1 = arith.select %0, %c1_i32, %c8_i32 : i32
    %2 = arith.remsi %arg0, %1 : i32
    %c0_i32_0 = arith.constant 0 : i32
    %3 = arith.cmpi ne, %2, %c0_i32_0 : i32
    %c0_i32_1 = arith.constant 0 : i32
    %4 = arith.cmpi slt, %2, %c0_i32_1 : i32
    %c0_i32_2 = arith.constant 0 : i32
    %5 = arith.cmpi slt, %1, %c0_i32_2 : i32
    %6 = arith.xori %4, %5 : i1
    %7 = arith.andi %6, %3 : i1
    %8 = arith.addi %2, %1 : i32
    %9 = arith.select %7, %8, %2 : i32
    %c7_i32 = arith.constant 7 : i32
    %10 = arith.cmpi eq, %9, %c7_i32 : i32
    %c1_i32_3 = arith.constant 1 : i32
    %11 = arith.addi %arg0, %c1_i32_3 : i32
    %12 = arith.select %10, %arg0, %11 : i32
    %c0_i32_4 = arith.constant 0 : i32
    %c0_i32_5 = arith.constant 0 : i32
    %c0_i32_6 = arith.constant 0 : i32
    return %12, %c0_i32_4, %c0_i32_5 : i32, i32, i32
  }
  func.func @transform_2(%arg0: i32) -> (i32, i32, i32) {
    %c8_i32 = arith.constant 8 : i32
    %c0_i32 = arith.constant 0 : i32
    %0 = arith.cmpi eq, %c8_i32, %c0_i32 : i32
    %c1_i32 = arith.constant 1 : i32
    %1 = arith.select %0, %c1_i32, %c8_i32 : i32
    %2 = arith.remsi %arg0, %1 : i32
    %c0_i32_0 = arith.constant 0 : i32
    %3 = arith.cmpi ne, %2, %c0_i32_0 : i32
    %c0_i32_1 = arith.constant 0 : i32
    %4 = arith.cmpi slt, %2, %c0_i32_1 : i32
    %c0_i32_2 = arith.constant 0 : i32
    %5 = arith.cmpi slt, %1, %c0_i32_2 : i32
    %6 = arith.xori %4, %5 : i1
    %7 = arith.andi %6, %3 : i1
    %8 = arith.addi %2, %1 : i32
    %9 = arith.select %7, %8, %2 : i32
    %c0_i32_3 = arith.constant 0 : i32
    %10 = arith.cmpi eq, %9, %c0_i32_3 : i32
    %c1_i32_4 = arith.constant 1 : i32
    %11 = arith.subi %arg0, %c1_i32_4 : i32
    %12 = arith.select %10, %arg0, %11 : i32
    %c0_i32_5 = arith.constant 0 : i32
    %c0_i32_6 = arith.constant 0 : i32
    %c0_i32_7 = arith.constant 0 : i32
    return %12, %c0_i32_5, %c0_i32_6 : i32, i32, i32
  }
  func.func @transform_3(%arg0: i32) -> (i32, i32) {
    %c0_i32 = arith.constant 0 : i32
    %c0_i32_0 = arith.constant 0 : i32
    %c0_i32_1 = arith.constant 0 : i32
    return %c0_i32, %c0_i32_0 : i32, i32
  }
  func.func @transform_4(%arg0: i32) -> (i32, i32) {
    %c0_i32 = arith.constant 0 : i32
    %c0_i32_0 = arith.constant 0 : i32
    %c0_i32_1 = arith.constant 0 : i32
    return %c0_i32, %c0_i32_0 : i32, i32
  }
  func.func @transform_5(%arg0: i32) -> (i32, i32, i32) {
    %c0_i32 = arith.constant 0 : i32
    %c0_i32_0 = arith.constant 0 : i32
    %c0_i32_1 = arith.constant 0 : i32
    %c0_i32_2 = arith.constant 0 : i32
    return %c0_i32, %c0_i32_0, %c0_i32_1 : i32, i32, i32
  }
  func.func @transform_6(%arg0: i32) -> (i32, i32, i32) {
    %c0_i32 = arith.constant 0 : i32
    %c0_i32_0 = arith.constant 0 : i32
    %c0_i32_1 = arith.constant 0 : i32
    %c0_i32_2 = arith.constant 0 : i32
    return %c0_i32, %c0_i32_0, %c0_i32_1 : i32, i32, i32
  }
  func.func @transform_7(%arg0: i32) -> (i32, i32, i32) {
    %c0_i32 = arith.constant 0 : i32
    %c0_i32_0 = arith.constant 0 : i32
    %c0_i32_1 = arith.constant 0 : i32
    %c0_i32_2 = arith.constant 0 : i32
    return %c0_i32, %c0_i32_0, %c0_i32_1 : i32, i32, i32
  }
  func.func @transform_8(%arg0: i32) -> (i32, i32) {
    %c0_i32 = arith.constant 0 : i32
    %c0_i32_0 = arith.constant 0 : i32
    %c0_i32_1 = arith.constant 0 : i32
    return %c0_i32, %c0_i32_0 : i32, i32
  }
  func.func @transform_9(%arg0: i32) -> (i32, i32) {
    %c0_i32 = arith.constant 0 : i32
    %c0_i32_0 = arith.constant 0 : i32
    %c0_i32_1 = arith.constant 0 : i32
    return %c0_i32, %c0_i32_0 : i32, i32
  }
  func.func @transform_10(%arg0: i32) -> (i32, i32) {
    %c0_i32 = arith.constant 0 : i32
    %c0_i32_0 = arith.constant 0 : i32
    %c0_i32_1 = arith.constant 0 : i32
    return %c0_i32, %c0_i32_0 : i32, i32
  }
  func.func @transform_11(%arg0: i32) -> (i32, i32, i32) {
    %c0_i32 = arith.constant 0 : i32
    %c0_i32_0 = arith.constant 0 : i32
    %c0_i32_1 = arith.constant 0 : i32
    %c0_i32_2 = arith.constant 0 : i32
    return %c0_i32, %c0_i32_0, %c0_i32_1 : i32, i32, i32
  }
  func.func @transform_12(%arg0: i32) -> (i32, i32, i32) {
    %c0_i32 = arith.constant 0 : i32
    %c0_i32_0 = arith.constant 0 : i32
    %c0_i32_1 = arith.constant 0 : i32
    %c0_i32_2 = arith.constant 0 : i32
    return %c0_i32, %c0_i32_0, %c0_i32_1 : i32, i32, i32
  }
  func.func @transform_13(%arg0: i32) -> (i32, i32) {
    %c0_i32 = arith.constant 0 : i32
    %c0_i32_0 = arith.constant 0 : i32
    %c0_i32_1 = arith.constant 0 : i32
    return %c0_i32, %c0_i32_0 : i32, i32
  }
  func.func @transform_14(%arg0: i32) -> (i32, i32) {
    %c0_i32 = arith.constant 0 : i32
    %c0_i32_0 = arith.constant 0 : i32
    %c0_i32_1 = arith.constant 0 : i32
    return %c0_i32, %c0_i32_0 : i32, i32
  }
  func.func @transform_15(%arg0: i32) -> (i32, i32) {
    %c0_i32 = arith.constant 0 : i32
    %c0_i32_0 = arith.constant 0 : i32
    %c0_i32_1 = arith.constant 0 : i32
    return %c0_i32, %c0_i32_0 : i32, i32
  }
  func.func @transform_16(%arg0: i32) -> (i32, i32) {
    %c0_i32 = arith.constant 0 : i32
    %c0_i32_0 = arith.constant 0 : i32
    %c0_i32_1 = arith.constant 0 : i32
    return %c0_i32, %c0_i32_0 : i32, i32
  }
  func.func @transform_17(%arg0: i32) -> (i32, i32) {
    %c0_i32 = arith.constant 0 : i32
    %c0_i32_0 = arith.constant 0 : i32
    %c0_i32_1 = arith.constant 0 : i32
    return %c0_i32, %c0_i32_0 : i32, i32
  }
  func.func @transform_18(%arg0: i32) -> (i32, i32, i32) {
    %c0_i32 = arith.constant 0 : i32
    %c0_i32_0 = arith.constant 0 : i32
    %c0_i32_1 = arith.constant 0 : i32
    return %arg0, %c0_i32, %c0_i32_0 : i32, i32, i32
  }
}

</mosaic_0001>

<bundles_post_ra>
// kernel: msemodule_forward.1
= control target key start
LH: loop header
LB: loop body
LE: loop exit
PB: predicated region body
PF: predicated region fallthrough
CT: control target
= control target key end

     0   :  { %s6464_s27 = smov 0   ;;  %s8083_s0 = inlined_call_operand.vmem [shape: f32[8,16,1024], index: 0, kind: input, shape index: {}, may-alias: {0,1,2}]   ;;  %s8084_s1 = inlined_call_operand.vmem [shape: f32[8,16,1024], index: 1, kind: input, shape index: {}, may-alias: {0,1,2}]   ;;  %s8085_s2 = inlined_call_operand.vmem [shape: f32[8,16,1024], index: 2, kind: input, shape index: {}, may-alias: {0,1,2}]   ;;  %s8086_s3 = inlined_call_operand.vmem [shape: f32[1024,64], index: 3, kind: input, shape index: {}]   ;;  %s8087_s4 = inlined_call_operand.vmem [shape: f32[1,64], index: 4, kind: input, shape index: {}]   ;;  %s8088_s5 = inlined_call_operand.vmem [shape: f32[3,64,64], index: 5, kind: input, shape index: {}]   ;;  %s8089_s6 = inlined_call_operand.vmem [shape: f32[3,32,32], index: 6, kind: input, shape index: {}]   ;;  %s8090_s7 = inlined_call_operand.vmem [shape: f32[3,64,64], index: 7, kind: input, shape index: {}]   ;;  %s8091_s8 = inlined_call_operand.vmem [shape: f32[1,64], index: 8, kind: input, shape index: {}]   ;;  %s8092_s9 = inlined_call_operand.vmem [shape: f32[16,32], index: 9, kind: input, shape index: {}]   ;;  %s8093_s10 = inlined_call_operand.vmem [shape: f32[64,32], index: 10, kind: input, shape index: {}]   ;;  %s8094_s11 = inlined_call_operand.vmem [shape: f32[3,32,32], index: 11, kind: input, shape index: {}]   ;;  %s8095_s12 = inlined_call_operand.vmem [shape: f32[3,16,16], index: 12, kind: input, shape index: {}]   ;;  %s8096_s13 = inlined_call_operand.vmem [shape: f32[1,32], index: 13, kind: input, shape index: {}]   ;;  %s8097_s14 = inlined_call_operand.vmem [shape: f32[32,16], index: 14, kind: input, shape index: {}]   ;;  %s8098_s15 = inlined_call_operand.vmem [shape: f32[32,64], index: 15, kind: input, shape index: {}]   ;;  %s8099_s16 = inlined_call_operand.vmem [shape: f32[64,1024], index: 16, kind: input, shape index: {}]   ;;  %s8100_s17 = inlined_call_operand.vmem [shape: f32[1,1024], index: 17, kind: input, shape index: {}]   ;;  %s8101_s18 = inlined_call_operand.vmem [shape: f32[8,16,1024], index: 18, kind: output, shape index: {}]  }
   0x1   :  { %8111 = sst [smem:[#allocation10_spill]] %s8083_s0 }
   0x2   :  { %8112 = sst [smem:[#allocation11_spill]] %s8084_s1 }
   0x3   :  { %8113 = sst [smem:[#allocation12_spill]] %s8085_s2 }
   0x4 LB: > { %8114 = sst [smem:[#allocation2_spill]] %s6366_s27  ;;  %s6470_s28 = sadd.s32 4294967295, %s6366_s27   ;;  %s6366_s27 = sphi %s6464_s27, %s28_s27  }
   0x5   : > { %p4607_p0 = scmp.ge.s32.totalorder %s6366_s27, 1  ;;  %p652_p1 = scmp.lt.s32.totalorder %s6366_s27, 9 }
   0x7   : > { %p653_p2 = pnand %p4607_p0, %p652_p1 }
   0x9   : > { %656 = sbr.rel (%p653_p2) target bundleno = 2715 (0xa9b), region = 92 }
  0x10   : > { %v858_v0 = vld [vmem:[%s8086_s3 + $0x80] sm:$0xff]  ;;  %v859_v1 = vld [vmem:[%s8086_s3 + $0x88] sm:$0xff]  ;;  %v860_v11 = vld [vmem:[%s8086_s3 + $0x90] sm:$0xff]  ;;  %p746_p3 = scmp.lt.s32.totalorder %s6470_s28, 7  ;;  %s8115_s1 = sld [smem:[#allocation10_spill]]  ;;  %vm1677_vm0 = vcmask 523264  }
  0x11   : > { %v842_v2 = vld [vmem:[%s8086_s3] sm:$0xff]  ;;  %v6483_v3 = vpack.c.bf16 %v859_v1, %v858_v0  ;;  %v843_v4 = vld [vmem:[%s8086_s3 + $0x8] sm:$0xff]  ;;  %v861_v13 = vld [vmem:[%s8086_s3 + $0x98] sm:$0xff]  ;;  %s752_s23 = ssub.s32 0, %s6470_s28  ;;  %p751_p4 = scmp.lt.s32.totalorder %s6470_s28, 0  ;;  %vm1874_vm1 = vcmask 261120  }
  0x12   : > { %v890_v5 = vld [vmem:[%s8086_s3 + $0x180] sm:$0xff]  ;;  %v891_v6 = vld [vmem:[%s8086_s3 + $0x188] sm:$0xff]  ;;  %v6494_v7 = vpack.c.bf16 %v843_v4, %v842_v2  ;;  %v844_v14 = vld [vmem:[%s8086_s3 + $0x10] sm:$0xff]  ;;  %v6521_v16 = vpack.c.bf16 %v861_v13, %v860_v11  ;;  %s6618_s19 = scalar_select %p746_p3, %s6470_s28, 7  ;;  %vm3184_vm2 = vcmask 130048  }
  0x13   : > { %v6496_v8 = vpack.c.bf16 %v891_v6, %v890_v5  ;;  %v874_v9 = vld [vmem:[%s8086_s3 + $0x100] sm:$0xff]  ;;  %v875_v10 = vld [vmem:[%s8086_s3 + $0x108] sm:$0xff]  ;;  %5640 = vmatprep.subr.bf16.mxu0 %v6483_v3  ;;  %v845_v15 = vld [vmem:[%s8086_s3 + $0x18] sm:$0xff]  ;;  %s6785_s24 = smin.u32 %s6470_s28, %s752_s23  ;;  %s764_s29 = sadd.s32 1, %s6470_s28 }
  0x14   : > { %v6508_v12 = vpack.c.bf16 %v875_v10, %v874_v9  ;;  %5642 = vmatpush3.bf16.msra.mxu0 %v6494_v7  ;;  %v6523_v17 = vpack.c.bf16 %v845_v15, %v844_v14  ;;  %v892_v18 = vld [vmem:[%s8086_s3 + $0x190] sm:$0xff]  ;;  %v893_v19 = vld [vmem:[%s8086_s3 + $0x198] sm:$0xff]  ;;  %v862_v23 = vld [vmem:[%s8086_s3 + $0xa0] sm:$0xff]  ;;  %s8103_s26 = sshll.u32 %s6618_s19, 7  ;;  %s8123_s23 = sld [smem:[#allocation11_spill]] }
  0x15   : > { %5672 = vmatprep.subr.bf16.mxu1 %v6496_v8  ;;  %v876_v20 = vld [vmem:[%s8086_s3 + $0x110] sm:$0xff]  ;;  %v6535_v21 = vpack.c.bf16 %v893_v19, %v892_v18  ;;  %v877_v22 = vld [vmem:[%s8086_s3 + $0x118] sm:$0xff]  ;;  %v863_v24 = vld [vmem:[%s8086_s3 + $0xa8] sm:$0xff]  ;;  %5644 = vmatprep.subr.bf16.mxu0 %v6521_v16 }
  0x16   : > { %5674 = vmatpush3.bf16.msra.mxu1 %v6508_v12  ;;  %v6547_v25 = vpack.c.bf16 %v877_v22, %v876_v20  ;;  %v6549_v26 = vpack.c.bf16 %v863_v24, %v862_v23  ;;  %v846_v27 = vld [vmem:[%s8086_s3 + $0x20] sm:$0xff]  ;;  %v847_v28 = vld [vmem:[%s8086_s3 + $0x28] sm:$0xff]  ;;  %v864_v35 = vld [vmem:[%s8086_s3 + $0xb0] sm:$0xff]  ;;  %s6698_s20 = scalar_lea.vmem %s8115_s1, %s8103_s26  ;;  %s754_s26 = sand.u32 7, %s6785_s24  }
  0x17   : > { %v894_v29 = vld [vmem:[%s8086_s3 + $0x1a0] sm:$0xff]  ;;  %5676 = vmatprep.subr.bf16.mxu1 %v6535_v21  ;;  %v895_v30 = vld [vmem:[%s8086_s3 + $0x1a8] sm:$0xff]  ;;  %v6572_v33 = vpack.c.bf16 %v847_v28, %v846_v27  ;;  %v865_v36 = vld [vmem:[%s8086_s3 + $0xb8] sm:$0xff]  ;;  %s755_s22 = ssub.s32 0, %s754_s26 }
  0x18   : > { %v878_v31 = vld [vmem:[%s8086_s3 + $0x120] sm:$0xff]  ;;  %v879_v32 = vld [vmem:[%s8086_s3 + $0x128] sm:$0xff]  ;;  %5646 = vmatpush3.bf16.msra.mxu0 %v6523_v17  ;;  %v6574_v34 = vpack.c.bf16 %v895_v30, %v894_v29  ;;  %v848_v37 = vld [vmem:[%s8086_s3 + $0x30] sm:$0xff]  ;;  %v6589_v39 = vpack.c.bf16 %v865_v36, %v864_v35  ;;  %s8135_s22 = smov (!%p751_p4, %s755_s22), %s754_s26 }
  0x19   : > { %5648 = vmatprep.subr.bf16.mxu0 %v6549_v26  ;;  %v6587_v38 = vpack.c.bf16 %v879_v32, %v878_v31  ;;  %v849_v40 = vld [vmem:[%s8086_s3 + $0x38] sm:$0xff]  ;;  %v896_v41 = vld [vmem:[%s8086_s3 + $0x1b0] sm:$0xff]  ;;  %v866_v46 = vld [vmem:[%s8086_s3 + $0xc0] sm:$0xff]  ;;  %p4612_p5 = scmp.lt.s32.totalorder %s8135_s22, 0  ;;  %s761_s25 = sadd.s32 8, %s8135_s22 }
  0x1a   : > { %5678 = vmatpush3.bf16.msra.mxu1 %v6547_v25  ;;  %v897_v42 = vld [vmem:[%s8086_s3 + $0x1b8] sm:$0xff]  ;;  %v880_v44 = vld [vmem:[%s8086_s3 + $0x130] sm:$0xff]  ;;  %v867_v47 = vld [vmem:[%s8086_s3 + $0xc8] sm:$0xff]  ;;  %v6621_v48 = vpack.c.bf16 %v849_v40, %v848_v37 }
  0x1b   : > { %5680 = vmatprep.subr.bf16.mxu1 %v6574_v34  ;;  %v6601_v43 = vpack.c.bf16 %v897_v42, %v896_v41  ;;  %v881_v45 = vld [vmem:[%s8086_s3 + $0x138] sm:$0xff]  ;;  %v898_v49 = vld [vmem:[%s8086_s3 + $0x1c0] sm:$0xff]  ;;  %v899_v50 = vld [vmem:[%s8086_s3 + $0x1c8] sm:$0xff]  ;;  %v6633_v52 = vpack.c.bf16 %v867_v47, %v866_v46  ;;  %s8137_s25 = smov (!%p4612_p5, %s761_s25), %s8135_s22  ;;  %s8124_s22 = sld [smem:[#allocation12_spill]] }
  0x1c   : > { %5650 = vmatpush3.bf16.msra.mxu0 %v6572_v33  ;;  %v6631_v51 = vpack.c.bf16 %v881_v45, %v880_v44  ;;  %v850_v53 = vld [vmem:[%s8086_s3 + $0x40] sm:$0xff]  ;;  %v851_v54 = vld [vmem:[%s8086_s3 + $0x48] sm:$0xff]  ;;  %v6645_v56 = vpack.c.bf16 %v899_v50, %v898_v49  ;;  %v868_v58 = vld [vmem:[%s8086_s3 + $0xd0] sm:$0xff]  ;;  %p763_p6 = scmp.eq.s32.totalorder %s8137_s25, 7  ;;  %p798_p8 = scmp.eq.s32.totalorder %s8137_s25, 0 }
  0x1d   : > { %5652 = vmatprep.subr.bf16.mxu0 %v6589_v39  ;;  %v882_v55 = vld [vmem:[%s8086_s3 + $0x140] sm:$0xff]  ;;  %v883_v57 = vld [vmem:[%s8086_s3 + $0x148] sm:$0xff]  ;;  %v869_v59 = vld [vmem:[%s8086_s3 + $0xd8] sm:$0xff]  ;;  %v6664_v62 = vpack.c.bf16 %v851_v54, %v850_v53  ;;  %p838_p10 = scmp.lt.s32.totalorder %s8137_s25, 7  ;;  %p840_p11 = scmp.gt.s32.totalorder %s8137_s25, 0 }
  0x1e   : > { %5682 = vmatpush3.bf16.msra.mxu1 %v6587_v38  ;;  %v900_v60 = vld [vmem:[%s8086_s3 + $0x1d0] sm:$0xff]  ;;  %v901_v61 = vld [vmem:[%s8086_s3 + $0x1d8] sm:$0xff]  ;;  %v6668_v63 = vpack.c.bf16 %v883_v57, %v882_v55  ;;  %v6670_v0 = vpack.c.bf16 %v869_v59, %v868_v58  ;;  %v870_v9 = vld [vmem:[%s8086_s3 + $0xe0] sm:$0xff]  ;;  %s765_s27 = scalar_select %p763_p6, %s6470_s28, %s764_s29 }
  0x1f   : > { %5684 = vmatprep.subr.bf16.mxu1 %v6601_v43  ;;  %v852_v1 = vld [vmem:[%s8086_s3 + $0x50] sm:$0xff]  ;;  %v853_v2 = vld [vmem:[%s8086_s3 + $0x58] sm:$0xff]  ;;  %v6682_v5 = vpack.c.bf16 %v901_v61, %v900_v60  ;;  %v871_v10 = vld [vmem:[%s8086_s3 + $0xe8] sm:$0xff]  ;;  %s839_s2 = scalar_select %p838_p10, 1.0, 0.0 }
  0x20   : > { %5654 = vmatpush3.bf16.msra.mxu0 %v6621_v48  ;;  %v884_v4 = vld [vmem:[%s8086_s3 + $0x150] sm:$0xff]  ;;  %v885_v6 = vld [vmem:[%s8086_s3 + $0x158] sm:$0xff]  ;;  %v902_v11 = vld [vmem:[%s8086_s3 + $0x1e0] sm:$0xff]  ;;  %v6707_v14 = vpack.c.bf16 %v853_v2, %v852_v1  ;;  %v6719_v20 = vpack.c.bf16 %v871_v10, %v870_v9  ;;  %p766_p7 = scmp.lt.s32.totalorder %s765_s27, 7 }
  0x21   : > { %5656 = vmatprep.subr.bf16.mxu0 %v6633_v52  ;;  %v903_v13 = vld [vmem:[%s8086_s3 + $0x1e8] sm:$0xff]  ;;  %v854_v15 = vld [vmem:[%s8086_s3 + $0x60] sm:$0xff]  ;;  %v6717_v19 = vpack.c.bf16 %v885_v6, %v884_v4  ;;  %v872_v28 = vld [vmem:[%s8086_s3 + $0xf0] sm:$0xff]  ;;  %s841_s30 = scalar_select %p840_p11, 1.0, 0.0 }
  0x22   : > { %5686 = vmatpush3.bf16.msra.mxu1 %v6631_v51  ;;  %v855_v18 = vld [vmem:[%s8086_s3 + $0x68] sm:$0xff]  ;;  %v886_v22 = vld [vmem:[%s8086_s3 + $0x160] sm:$0xff]  ;;  %v6729_v27 = vpack.c.bf16 %v903_v13, %v902_v11  ;;  %v873_v29 = vld [vmem:[%s8086_s3 + $0xf8] sm:$0xff]  ;;  %s8139_s27 = smov (!%p766_p7, %s765_s27), 7 }
  0x23   : > { %5688 = vmatprep.subr.bf16.mxu1 %v6645_v56  ;;  %v887_v23 = vld [vmem:[%s8086_s3 + $0x168] sm:$0xff]  ;;  %v974_v30 = vld [vmem:[%s6698_s20 + $0x18] sm:$0xff]  ;;  %v904_v31 = vld [vmem:[%s8086_s3 + $0x1f0] sm:$0xff]  ;;  %v6745_v35 = vpack.c.bf16 %v855_v18, %v854_v15  ;;  %v6751_v37 = vpack.c.bf16 %v873_v29, %v872_v28  ;;  %s4804_s29 = sshll.u32 %s8139_s27, 7  ;;  %s4618_s27 = sadd.s32 4294967295, %s6470_s28 }
  0x24   : > { %5658 = vmatpush3.bf16.msra.mxu0 %v6664_v62  ;;  %v972_v24 = vld [vmem:[%s6698_s20 + $0x8] sm:$0xff]  ;;  %v905_v32 = vld [vmem:[%s8086_s3 + $0x1f8] sm:$0xff]  ;;  %1132 = vmatprep.mubr.f32.mxu1 %v974_v30  ;;  %v6749_v36 = vpack.c.bf16 %v887_v23, %v886_v22  ;;  %v856_v40 = vld [vmem:[%s8086_s3 + $0x70] sm:$0xff]  ;;  %s7111_s0 = scalar_lea.vmem %s8123_s23, %s4804_s29  ;;  %s8141_s28 = smov (!%p798_p8, %s6470_s28), %s4618_s27 }
  0x25   : > { %5660 = vmatprep.subr.bf16.mxu0 %v6670_v0  ;;  %1057 = vmatprep.mubr.f32.mxu0 %v972_v24  ;;  %v857_v41 = vld [vmem:[%s8086_s3 + $0x78] sm:$0xff]  ;;  %v888_v42 = vld [vmem:[%s8086_s3 + $0x170] sm:$0xff]  ;;  %v6764_v44 = vpack.c.bf16 %v905_v32, %v904_v31  ;;  %v922_v46 = vld [vmem:[%s8086_s3 + $0x280] sm:$0xff]  ;;  %p801_p9 = scmp.lt.s32.totalorder %s8141_s28, 7  ;;  %s8132_s29 = sshll.u32 %s6618_s19, 7 }
  0x26   : > { %5690 = vmatpush3.bf16.msra.mxu1 %v6668_v63  ;;  %v889_v45 = vld [vmem:[%s8086_s3 + $0x178] sm:$0xff]  ;;  %v923_v47 = vld [vmem:[%s8086_s3 + $0x288] sm:$0xff]  ;;  %v954_v49 = vld [vmem:[%s8086_s3 + $0x380] sm:$0xff]  ;;  %v6782_v53 = vpack.c.bf16 %v857_v41, %v856_v40  ;;  %s8028_s23 = scalar_lea.vmem %s8101_s18, %s8132_s29 }
  0x27   : > { %5692 = vmatprep.subr.bf16.mxu1 %v6682_v5  ;;  %v955_v50 = vld [vmem:[%s8086_s3 + $0x388] sm:$0xff]  ;;  %v6789_v54 = vpack.c.bf16 %v889_v45, %v888_v42  ;;  %v6791_v55 = vpack.c.bf16 %v923_v47, %v922_v46  ;;  %v906_v57 = vld [vmem:[%s8086_s3 + $0x200] sm:$0xff]  ;;  %v924_v1 = vld [vmem:[%s8086_s3 + $0x290] sm:$0xff]  ;;  %s8143_s28 = smov (!%p801_p9, %s8141_s28), 7 }
  0x28   : > { %5662 = vmatpush3.bf16.msra.mxu0 %v6707_v14  ;;  %v907_v58 = vld [vmem:[%s8086_s3 + $0x208] sm:$0xff]  ;;  %v938_v59 = vld [vmem:[%s8086_s3 + $0x300] sm:$0xff]  ;;  %v6803_v60 = vpack.c.bf16 %v955_v50, %v954_v49  ;;  %v925_v2 = vld [vmem:[%s8086_s3 + $0x298] sm:$0xff]  ;;  %s4805_s26 = sshll.u32 %s8143_s28, 7 }
  0x29   : > { %5664 = vmatprep.subr.bf16.mxu0 %v6719_v20  ;;  %v939_v61 = vld [vmem:[%s8086_s3 + $0x308] sm:$0xff]  ;;  %v956_v4 = vld [vmem:[%s8086_s3 + $0x390] sm:$0xff]  ;;  %v957_v6 = vld [vmem:[%s8086_s3 + $0x398] sm:$0xff]  ;;  %v6823_v10 = vpack.c.bf16 %v907_v58, %v906_v57  ;;  %v6830_v15 = vpack.c.bf16 %v925_v2, %v924_v1  ;;  %s7159_s21 = scalar_lea.vmem %s8124_s22, %s4805_s26 }
  0x2a   : > { %5694 = vmatpush3.bf16.msra.mxu1 %v6717_v19  ;;  %v971_v9 = vld [vmem:[%s6698_s20] sm:$0xff]  ;;  %v973_v11 = vld [vmem:[%s6698_s20 + $0x10] sm:$0xff]  ;;  %v6828_v13 = vpack.c.bf16 %v939_v61, %v938_v59  ;;  %v909_v22 = vld [vmem:[%s8086_s3 + $0x218] sm:$0xff]  ;;  %v6843_v24 = vpack.c.bf16 %v957_v6, %v956_v4 }
  0x2b   : > { %5696 = vmatprep.subr.bf16.mxu1 %v6729_v27  ;;  %v908_v18 = vld [vmem:[%s8086_s3 + $0x210] sm:$0xff]  ;;  %v941_v28 = vld [vmem:[%s8086_s3 + $0x318] sm:$0xff]  ;;  %v926_v29 = vld [vmem:[%s8086_s3 + $0x2a0] sm:$0xff] }
  0x2c   : > { %5666 = vmatpush3.bf16.msra.mxu0 %v6745_v35  ;;  %v940_v23 = vld [vmem:[%s8086_s3 + $0x310] sm:$0xff]  ;;  %v927_v30 = vld [vmem:[%s8086_s3 + $0x2a8] sm:$0xff]  ;;  %v958_v31 = vld [vmem:[%s8086_s3 + $0x3a0] sm:$0xff]  ;;  %v6863_v40 = vpack.c.bf16 %v909_v22, %v908_v18 }
  0x2d   : > { %5668 = vmatprep.subr.bf16.mxu0 %v6751_v37  ;;  %v959_v32 = vld [vmem:[%s8086_s3 + $0x3a8] sm:$0xff]  ;;  %v6867_v41 = vpack.c.bf16 %v941_v28, %v940_v23  ;;  %v6869_v42 = vpack.c.bf16 %v927_v30, %v926_v29  ;;  %v910_v45 = vld [vmem:[%s8086_s3 + $0x220] sm:$0xff]  ;;  %v928_v57 = vld [vmem:[%s8086_s3 + $0x2b0] sm:$0xff] }
  0x2e   : > { %5698 = vmatpush3.bf16.msra.mxu1 %v6749_v36  ;;  %v911_v46 = vld [vmem:[%s8086_s3 + $0x228] sm:$0xff]  ;;  %v942_v47 = vld [vmem:[%s8086_s3 + $0x320] sm:$0xff]  ;;  %v6887_v49 = vpack.c.bf16 %v959_v32, %v958_v31  ;;  %v929_v58 = vld [vmem:[%s8086_s3 + $0x2b8] sm:$0xff] }
  0x2f   : > { %5700 = vmatprep.subr.bf16.mxu1 %v6764_v44  ;;  %v943_v50 = vld [vmem:[%s8086_s3 + $0x328] sm:$0xff]  ;;  %v960_v59 = vld [vmem:[%s8086_s3 + $0x3b0] sm:$0xff]  ;;  %v961_v61 = vld [vmem:[%s8086_s3 + $0x3b8] sm:$0xff]  ;;  %v6905_v1 = vpack.c.bf16 %v911_v46, %v910_v45 }
  0x30   : > { %5670 = vmatpush3.bf16.msra.mxu0 %v6782_v53  ;;  %v912_v2 = vld [vmem:[%s8086_s3 + $0x230] sm:$0xff]  ;;  %v913_v4 = vld [vmem:[%s8086_s3 + $0x238] sm:$0xff]  ;;  %v980_v22 = vld [vmem:[%s6698_s20 + $0x48] sm:$0xff]  ;;  %v6929_v28 = vpack.c.bf16 %v961_v61, %v960_v59 }
  0x31   : > { %5704 = vmatprep.subr.bf16.mxu0 %v6791_v55  ;;  %v944_v6 = vld [vmem:[%s8086_s3 + $0x330] sm:$0xff]  ;;  %v945_v18 = vld [vmem:[%s8086_s3 + $0x338] sm:$0xff]  ;;  %v979_v23 = vld [vmem:[%s6698_s20 + $0x40] sm:$0xff]  ;;  %v6946_v46 = vpack.c.bf16 %v913_v4, %v912_v2 }
  0x32   : > { %5702 = vmatpush3.bf16.msra.mxu1 %v6789_v54  ;;  %v930_v29 = vld [vmem:[%s8086_s3 + $0x2c0] sm:$0xff]  ;;  %v931_v30 = vld [vmem:[%s8086_s3 + $0x2c8] sm:$0xff]  ;;  %v982_v31 = vld [vmem:[%s6698_s20 + $0x58] sm:$0xff] }
  0x33   : > { %5736 = vmatprep.subr.bf16.mxu1 %v6803_v60  ;;  %1058 = vmatmul.mubr.f32.vlgmr.msra.gmra.mrb[0].mxu0 %v971_v9  ;;  %v6918_v9 = vpack.c.bf16 %v943_v50, %v942_v47  ;;  %v962_v32 = vld [vmem:[%s8086_s3 + $0x3c0] sm:$0xff]  ;;  %v963_v45 = vld [vmem:[%s8086_s3 + $0x3c8] sm:$0xff]  ;;  %v6959_v59 = vpack.c.bf16 %v931_v30, %v930_v29  ;;  %v964_v29 = vld [vmem:[%s8086_s3 + $0x3d0] sm:$0xff] }
  0x34   : > { %5706 = vmatpush3.bf16.msra.mxu0 %v6823_v10  ;;  %1062 = vmatprep.mubr.f32.mxu0 %v980_v22  ;;  %v914_v47 = vld [vmem:[%s8086_s3 + $0x240] sm:$0xff]  ;;  %v915_v50 = vld [vmem:[%s8086_s3 + $0x248] sm:$0xff]  ;;  %v6974_v22 = vpack.c.bf16 %v963_v45, %v962_v32  ;;  %v965_v30 = vld [vmem:[%s8086_s3 + $0x3d8] sm:$0xff] }
  0x35   : > { %1133 = vmatmul.mubr.f32.vlgmr.msra.gmra.mrb[0].mxu1 %v973_v11  ;;  %5708 = vmatprep.subr.bf16.mxu0 %v6830_v15  ;;  %v6920_v11 = vpack.c.bf16 %v929_v58, %v928_v57  ;;  %v981_v57 = vld [vmem:[%s6698_s20 + $0x50] sm:$0xff]  ;;  %v6957_v58 = vpack.c.bf16 %v945_v18, %v944_v6  ;;  %8117 = vst [vmem:[#allocation4_spill] sm:$0xff] %v6959_v59  ;;  %v946_v61 = vld [vmem:[%s8086_s3 + $0x340] sm:$0xff]  ;;  %v947_v2 = vld [vmem:[%s8086_s3 + $0x348] sm:$0xff] }
  0x36   : > { %5738 = vmatpush3.bf16.msra.mxu1 %v6828_v13  ;;  %1137 = vmatprep.mubr.f32.mxu1 %v982_v31  ;;  %v976_v4 = vld [vmem:[%s6698_s20 + $0x28] sm:$0xff]  ;;  %8118 = vst [vmem:[#allocation5_spill] sm:$0xff] %v6974_v22  ;;  %v932_v6 = vld [vmem:[%s8086_s3 + $0x2d0] sm:$0xff]  ;;  %v933_v18 = vld [vmem:[%s8086_s3 + $0x2d8] sm:$0xff]  ;;  %v6990_v31 = vpack.c.bf16 %v915_v50, %v914_v47  ;;  %v6994_v32 = vpack.c.bf16 %v947_v2, %v946_v61 }
  0x37   : > { %5740 = vmatprep.subr.bf16.mxu1 %v6843_v24  ;;  %1063 = vmatmul.mubr.f32.gmra.mrb[2].mxu0 %v979_v23  ;;  %8116 = vst [vmem:[#allocation3_spill] sm:$0xff] %v6957_v58  ;;  %v978_v23 = vld [vmem:[%s6698_s20 + $0x38] sm:$0xff]  ;;  %v6996_v45 = vpack.c.bf16 %v933_v18, %v932_v6  ;;  %v948_v47 = vld [vmem:[%s8086_s3 + $0x350] sm:$0xff]  ;;  %v7009_v50 = vpack.c.bf16 %v965_v30, %v964_v29  ;;  %v934_v2 = vld [vmem:[%s8086_s3 + $0x2e0] sm:$0xff] }
  0x38   : > { %5710 = vmatpush3.bf16.msra.mxu0 %v6863_v40  ;;  %1207 = vmatprep.mubr.f32.mxu0 %v976_v4  ;;  %8119 = vst [vmem:[#allocation6_spill] sm:$0xff] %v6990_v31  ;;  %8120 = vst [vmem:[#allocation7_spill] sm:$0xff] %v6994_v32  ;;  %v917_v4 = vld [vmem:[%s8086_s3 + $0x258] sm:$0xff]  ;;  %v935_v6 = vld [vmem:[%s8086_s3 + $0x2e8] sm:$0xff] }
  0x39   : > { %5712 = vmatprep.subr.bf16.mxu0 %v6869_v42  ;;  %1138 = vmatmul.mubr.f32.gmra.mrb[2].mxu1 %v981_v57  ;;  %8121 = vst [vmem:[#allocation8_spill] sm:$0xff] %v6996_v45  ;;  %v916_v57 = vld [vmem:[%s8086_s3 + $0x250] sm:$0xff]  ;;  %8122 = vst [vmem:[#allocation9_spill] sm:$0xff] %v7009_v50  ;;  %v949_v61 = vld [vmem:[%s8086_s3 + $0x358] sm:$0xff] }
  0x3a   : > { %5742 = vmatpush3.bf16.msra.mxu1 %v6867_v41  ;;  %1282 = vmatprep.mubr.f32.mxu1 %v978_v23  ;;  %v966_v18 = vld [vmem:[%s8086_s3 + $0x3e0] sm:$0xff]  ;;  %v967_v23 = vld [vmem:[%s8086_s3 + $0x3e8] sm:$0xff]  ;;  %v7028_v29 = vpack.c.bf16 %v917_v4, %v916_v57  ;;  %v7032_v30 = vpack.c.bf16 %v949_v61, %v948_v47  ;;  %v936_v61 = vld [vmem:[%s8086_s3 + $0x2f0] sm:$0xff] }
  0x3b   : > { %5744 = vmatprep.subr.bf16.mxu1 %v6887_v49  ;;  %v950_v57 = vld [vmem:[%s8086_s3 + $0x360] sm:$0xff]  ;;  %v7049_v4 = vpack.c.bf16 %v967_v23, %v966_v18  ;;  %v951_v47 = vld [vmem:[%s8086_s3 + $0x368] sm:$0xff]  ;;  %v969_v18 = vld [vmem:[%s8086_s3 + $0x3f8] sm:$0xff] }
  0x3c   : > { %5714 = vmatpush3.bf16.msra.mxu0 %v6905_v1 }
  0x3d   : > { %5716 = vmatprep.subr.bf16.mxu0 %v6920_v11 }
  0x3e   : > { %5746 = vmatpush3.bf16.msra.mxu1 %v6918_v9 }
  0x3f   : > { %5748 = vmatprep.subr.bf16.mxu1 %v6929_v28 }
  0x40   : > { %5718 = vmatpush3.bf16.msra.mxu0 %v6946_v46 }
  0x41   : > { %5720 = vmatprep.subr.bf16.mxu0 %v6959_v59  ;;  %v918_v59 = vld [vmem:[%s8086_s3 + $0x260] sm:$0xff] }
  0x42   : > { %5750 = vmatpush3.bf16.msra.mxu1 %v6957_v58  ;;  %v919_v58 = vld [vmem:[%s8086_s3 + $0x268] sm:$0xff] }
  0x43   : > { %5752 = vmatprep.subr.bf16.mxu1 %v6974_v22  ;;  %v7034_v22 = vpack.c.bf16 %v935_v6, %v934_v2  ;;  %v937_v2 = vld [vmem:[%s8086_s3 + $0x2f8] sm:$0xff]  ;;  %v968_v6 = vld [vmem:[%s8086_s3 + $0x3f0] sm:$0xff]  ;;  %v7067_v23 = vpack.c.bf16 %v919_v58, %v918_v59 }
  0x44   : > { %5722 = vmatpush3.bf16.msra.mxu0 %v6990_v31  ;;  %v921_v31 = vld [vmem:[%s8086_s3 + $0x278] sm:$0xff]  ;;  %v7082_v58 = vpack.c.bf16 %v969_v18, %v968_v6  ;;  %v952_v59 = vld [vmem:[%s8086_s3 + $0x370] sm:$0xff]  ;;  %v983_v18 = vld [vmem:[%s6698_s20 + $0x60] sm:$0xff] }
  0x45   : > { %5724 = vmatprep.subr.bf16.mxu0 %v6996_v45  ;;  %v7073_v45 = vpack.c.bf16 %v937_v2, %v936_v61  ;;  %v975_v2 = vld [vmem:[%s6698_s20 + $0x20] sm:$0xff]  ;;  %v986_v6 = vld [vmem:[%s6698_s20 + $0x78] sm:$0xff] }
  0x46   : > { %5754 = vmatpush3.bf16.msra.mxu1 %v6994_v32  ;;  %v920_v32 = vld [vmem:[%s8086_s3 + $0x270] sm:$0xff] }
  0x47   : > { %5756 = vmatprep.subr.bf16.mxu1 %v7009_v50  ;;  %v7071_v50 = vpack.c.bf16 %v951_v47, %v950_v57  ;;  %v953_v57 = vld [vmem:[%s8086_s3 + $0x378] sm:$0xff]  ;;  %v7091_v47 = vpack.c.bf16 %v921_v31, %v920_v32  ;;  %v977_v31 = vld [vmem:[%s6698_s20 + $0x30] sm:$0xff]  ;;  %v984_v32 = vld [vmem:[%s6698_s20 + $0x68] sm:$0xff] }
  0x48   : > { %5726 = vmatpush3.bf16.msra.mxu0 %v7028_v29  ;;  %v7095_v61 = vpack.c.bf16 %v953_v57, %v952_v59  ;;  %v1673_v59 = vld [vmem:[%s8088_s5 + $0x20] sm:$0xff]  ;;  %v1674_v57 = vld [vmem:[%s8088_s5 + $0x28] sm:$0xff] }
  0x49   : > { %5728 = vmatprep.subr.bf16.mxu0 %v7034_v22 }
  0x4a   : > { %5758 = vmatpush3.bf16.msra.mxu1 %v7032_v30 }
  0x4b   : > { %5760 = vmatprep.subr.bf16.mxu1 %v7049_v4 }
  0x4c   : > { %5730 = vmatpush3.bf16.msra.mxu0 %v7067_v23 }
  0x4d   : > { %5732 = vmatprep.subr.bf16.mxu0 %v7073_v45 }
  0x4e   : > { %5762 = vmatpush3.bf16.msra.mxu1 %v7071_v50 }
  0x4f   : > { %5764 = vmatprep.subr.bf16.mxu1 %v7082_v58 }
  0x50   : > { %5734 = vmatpush3.bf16.msra.mxu0 %v7091_v47 }
  0x51   : > { %5768 = vmatprep.subr.bf16.mxu0 %v6483_v3  ;;  %v985_v3 = vld [vmem:[%s6698_s20 + $0x70] sm:$0xff] }
  0x52   : > { %5766 = vmatpush3.bf16.msra.mxu1 %v7095_v61 }
  0x53   : > { %5800 = vmatprep.subr.bf16.mxu1 %v6496_v8  ;;  %1208 = vmatmul.mubr.f32.vlgmr.msra.gmra.mrb[4].mxu0 %v975_v2  ;;  %v1296_v8 = vld [vmem:[%s7111_s0 + $0x18] sm:$0xff] }
  0x54   : > { %5770 = vmatpush3.bf16.msra.mxu0 %v6494_v7  ;;  %1212 = vmatprep.mubr.f32.mxu0 %v984_v32  ;;  %v1294_v7 = vld [vmem:[%s7111_s0 + $0x8] sm:$0xff]  ;;  %v4642_v2 = vld [vmem:[%s8088_s5 + $0x78] sm:$0xff]  ;;  %v1675_v32 = vld [vmem:[%s8088_s5 + $0x30] sm:$0xff] }
  0x55   : > { %1283 = vmatmul.mubr.f32.vlgmr.msra.gmra.mrb[4].mxu1 %v977_v31  ;;  %5772 = vmatprep.subr.bf16.mxu0 %v6521_v16  ;;  %v1295_v16 = vld [vmem:[%s7111_s0 + $0x10] sm:$0xff] }
  0x56   : > { %5802 = vmatpush3.bf16.msra.mxu1 %v6508_v12  ;;  %1287 = vmatprep.mubr.f32.mxu1 %v986_v6  ;;  %v1293_v12 = vld [vmem:[%s7111_s0] sm:$0xff]  ;;  %v1676_v6 = vld [vmem:[%s8088_s5 + $0x38] sm:$0xff] }
  0x57   : > { %1213 = vmatmul.mubr.f32.gmra.mrb[6].mxu0 %v983_v18  ;;  %5804 = vmatprep.subr.bf16.mxu1 %v6535_v21  ;;  %v1301_v21 = vld [vmem:[%s7111_s0 + $0x40] sm:$0xff]  ;;  %v5907_v18 = vpack.c.bf16 %v1676_v6, %v1675_v32 }
  0x58   : > { %5774 = vmatpush3.bf16.msra.mxu0 %v6523_v17  ;;  %1389 = vmatprep.mubr.f32.mxu0 %v1294_v7  ;;  %v1302_v17 = vld [vmem:[%s7111_s0 + $0x48] sm:$0xff] }
  0x59   : > { %1288 = vmatmul.mubr.f32.gmra.mrb[6].mxu1 %v985_v3  ;;  %5776 = vmatprep.subr.bf16.mxu0 %v6549_v26  ;;  %v1303_v26 = vld [vmem:[%s7111_s0 + $0x50] sm:$0xff]  ;;  %v4659_v3 = vld [vmem:[%s8088_s5 + $0x80] sm:$0xff]  ;;  %v4660_v7 = vld [vmem:[%s8088_s5 + $0x88] sm:$0xff] }
  0x5a   : > { %5806 = vmatpush3.bf16.msra.mxu1 %v6547_v25  ;;  %1474 = vmatprep.mubr.f32.mxu1 %v1296_v8  ;;  %v1304_v25 = vld [vmem:[%s7111_s0 + $0x58] sm:$0xff]  ;;  %v7269_v8 = vpack.c.bf16 %v4660_v7, %v4659_v3 }
  0x5b   : > { %5808 = vmatprep.subr.bf16.mxu1 %v6574_v34  ;;  %v1309_v34 = vld [vmem:[%s7159_s21] sm:$0xff] }
  0x5c   : > { %5778 = vmatpush3.bf16.msra.mxu0 %v6572_v33  ;;  %v1310_v33 = vld [vmem:[%s7159_s21 + $0x8] sm:$0xff] }
  0x5d   : > { %5780 = vmatprep.subr.bf16.mxu0 %v6589_v39  ;;  %v1311_v39 = vld [vmem:[%s7159_s21 + $0x10] sm:$0xff] }
  0x5e   : > { %5810 = vmatpush3.bf16.msra.mxu1 %v6587_v38  ;;  %v1312_v38 = vld [vmem:[%s7159_s21 + $0x18] sm:$0xff] }
  0x5f   : > { %5812 = vmatprep.subr.bf16.mxu1 %v6601_v43  ;;  %v1318_v43 = vld [vmem:[%s7159_s21 + $0x48] sm:$0xff] }
  0x60   : > { %5782 = vmatpush3.bf16.msra.mxu0 %v6621_v48  ;;  %v1317_v48 = vld [vmem:[%s7159_s21 + $0x40] sm:$0xff] }
  0x61   : > { %5784 = vmatprep.subr.bf16.mxu0 %v6633_v52  ;;  %v1319_v52 = vld [vmem:[%s7159_s21 + $0x50] sm:$0xff] }
  0x62   : > { %5814 = vmatpush3.bf16.msra.mxu1 %v6631_v51  ;;  %v1320_v51 = vld [vmem:[%s7159_s21 + $0x58] sm:$0xff] }
  0x63   : > { %5816 = vmatprep.subr.bf16.mxu1 %v6645_v56  ;;  %v1298_v56 = vld [vmem:[%s7111_s0 + $0x28] sm:$0xff] }
  0x64   : > { %5786 = vmatpush3.bf16.msra.mxu0 %v6664_v62  ;;  %v1300_v62 = vld [vmem:[%s7111_s0 + $0x38] sm:$0xff] }
  0x65   : > { %5788 = vmatprep.subr.bf16.mxu0 %v6670_v0  ;;  %v8126_v0 = vld [vmem:[#allocation4_spill] sm:$0xff] }
  0x66   : > { %5818 = vmatpush3.bf16.msra.mxu1 %v6668_v63  ;;  %v8125_v63 = vld [vmem:[#allocation3_spill] sm:$0xff] }
  0x67   : > { %5820 = vmatprep.subr.bf16.mxu1 %v6682_v5  ;;  %v8127_v5 = vld [vmem:[#allocation5_spill] sm:$0xff] }
  0x68   : > { %5790 = vmatpush3.bf16.msra.mxu0 %v6707_v14  ;;  %v8128_v14 = vld [vmem:[#allocation6_spill] sm:$0xff] }
  0x69   : > { %5792 = vmatprep.subr.bf16.mxu0 %v6719_v20  ;;  %v8130_v20 = vld [vmem:[#allocation8_spill] sm:$0xff] }
  0x6a   : > { %5822 = vmatpush3.bf16.msra.mxu1 %v6717_v19  ;;  %v8129_v19 = vld [vmem:[#allocation7_spill] sm:$0xff] }
  0x6b   : > { %5824 = vmatprep.subr.bf16.mxu1 %v6729_v27  ;;  %v8131_v27 = vld [vmem:[#allocation9_spill] sm:$0xff] }
  0x6c   : > { %5794 = vmatpush3.bf16.msra.mxu0 %v6745_v35  ;;  %v1297_v35 = vld [vmem:[%s7111_s0 + $0x20] sm:$0xff] }
  0x6d   : > { %5796 = vmatprep.subr.bf16.mxu0 %v6751_v37  ;;  %v1306_v37 = vld [vmem:[%s7111_s0 + $0x68] sm:$0xff] }
  0x6e   : > { %5826 = vmatpush3.bf16.msra.mxu1 %v6749_v36  ;;  %v1299_v36 = vld [vmem:[%s7111_s0 + $0x30] sm:$0xff] }
  0x6f   : > { %5828 = vmatprep.subr.bf16.mxu1 %v6764_v44  ;;  %v1308_v44 = vld [vmem:[%s7111_s0 + $0x78] sm:$0xff] }
  0x70   : > { %5798 = vmatpush3.bf16.msra.mxu0 %v6782_v53  ;;  %v1305_v53 = vld [vmem:[%s7111_s0 + $0x60] sm:$0xff] }
  0x71   : > { %5832 = vmatprep.subr.bf16.mxu0 %v6791_v55  ;;  %v1314_v55 = vld [vmem:[%s7159_s21 + $0x28] sm:$0xff] }
  0x72   : > { %5830 = vmatpush3.bf16.msra.mxu1 %v6789_v54  ;;  %v1307_v54 = vld [vmem:[%s7111_s0 + $0x70] sm:$0xff] }
  0x73   : > { %5864 = vmatprep.subr.bf16.mxu1 %v6803_v60  ;;  %1390 = vmatmul.mubr.f32.vlgmr.msra.gmra.mrb[8].mxu0 %v1293_v12  ;;  %v1316_v60 = vld [vmem:[%s7159_s21 + $0x38] sm:$0xff] }
  0x74   : > { %5834 = vmatpush3.bf16.msra.mxu0 %v6823_v10  ;;  %1394 = vmatprep.mubr.f32.mxu0 %v1302_v17  ;;  %v1313_v10 = vld [vmem:[%s7159_s21 + $0x20] sm:$0xff] }
  0x75   : > { %1475 = vmatmul.mubr.f32.vlgmr.msra.gmra.mrb[8].mxu1 %v1295_v16  ;;  %5836 = vmatprep.subr.bf16.mxu0 %v6830_v15  ;;  %v1322_v15 = vld [vmem:[%s7159_s21 + $0x68] sm:$0xff]  ;;  %v4626_v16 = vld [vmem:[%s8087_s4] ss:$0 sm:$0xff] }
  0x76   : > { %5866 = vmatpush3.bf16.msra.mxu1 %v6828_v13  ;;  %1479 = vmatprep.mubr.f32.mxu1 %v1304_v25  ;;  %v1315_v13 = vld [vmem:[%s7159_s21 + $0x30] sm:$0xff] }
  0x77   : > { %5868 = vmatprep.subr.bf16.mxu1 %v6843_v24  ;;  %1395 = vmatmul.mubr.f32.gmra.mrb[10].mxu0 %v1301_v21  ;;  %v1324_v24 = vld [vmem:[%s7159_s21 + $0x78] sm:$0xff] }
  0x78   : > { %5838 = vmatpush3.bf16.msra.mxu0 %v6863_v40  ;;  %1399 = vmatprep.mubr.f32.mxu0 %v1310_v33  ;;  %v1321_v40 = vld [vmem:[%s7159_s21 + $0x60] sm:$0xff] }
  0x79   : > { %1480 = vmatmul.mubr.f32.gmra.mrb[10].mxu1 %v1303_v26  ;;  %5840 = vmatprep.subr.bf16.mxu0 %v6869_v42  ;;  %v4635_v42 = vld [vmem:[%s8088_s5 + $0x40] sm:$0xff] }
  0x7a   : > { %5870 = vmatpush3.bf16.msra.mxu1 %v6867_v41  ;;  %1484 = vmatprep.mubr.f32.mxu1 %v1312_v38  ;;  %v1323_v41 = vld [vmem:[%s7159_s21 + $0x70] sm:$0xff] }
  0x7b   : > { %5872 = vmatprep.subr.bf16.mxu1 %v6887_v49  ;;  %1400 = vmatmul.mubr.f32.gmra.mrb[12].mxu0 %v1309_v34  ;;  %v4636_v49 = vld [vmem:[%s8088_s5 + $0x48] sm:$0xff] }
  0x7c   : > { %5842 = vmatpush3.bf16.msra.mxu0 %v6905_v1  ;;  %1404 = vmatprep.mubr.f32.mxu0 %v1318_v43  ;;  %v5911_v1 = vpack.c.bf16 %v4636_v49, %v4635_v42 }
  0x7d   : > { %1485 = vmatmul.mubr.f32.gmra.mrb[12].mxu1 %v1311_v39  ;;  %5844 = vmatprep.subr.bf16.mxu0 %v6920_v11  ;;  %v1670_v11 = vld [vmem:[%s8088_s5 + $0x8] sm:$0xff] }
  0x7e   : > { %5874 = vmatpush3.bf16.msra.mxu1 %v6918_v9  ;;  %1489 = vmatprep.mubr.f32.mxu1 %v1320_v51  ;;  %v1669_v9 = vld [vmem:[%s8088_s5] sm:$0xff] }
  0x7f   : > { %5876 = vmatprep.subr.bf16.mxu1 %v6929_v28  ;;  %1405 = vmatmul.mubr.f32.gmra.mrb[14].mxu0 %v1317_v48  ;;  %v5895_v28 = vpack.c.bf16 %v1670_v11, %v1669_v9 }
  0x80   : > { %5846 = vmatpush3.bf16.msra.mxu0 %v6946_v46  ;;  %1559 = vmatprep.mubr.f32.mxu0 %v1298_v56  ;;  %v4637_v46 = vld [vmem:[%s8088_s5 + $0x50] sm:$0xff] }
  0x81   : > { %1490 = vmatmul.mubr.f32.gmra.mrb[14].mxu1 %v1319_v52  ;;  %5848 = vmatprep.subr.bf16.mxu0 %v8126_v0 }
  0x82   : > { %5878 = vmatpush3.bf16.msra.mxu1 %v8125_v63  ;;  %1644 = vmatprep.mubr.f32.mxu1 %v1300_v62 }
  0x83   : > { %5880 = vmatprep.subr.bf16.mxu1 %v8127_v5 }
  0x84   : > { %5850 = vmatpush3.bf16.msra.mxu0 %v8128_v14 }
  0x85   : > { %5852 = vmatprep.subr.bf16.mxu0 %v8130_v20 }
  0x86   : > { %5882 = vmatpush3.bf16.msra.mxu1 %v8129_v19 }
  0x87   : > { %5884 = vmatprep.subr.bf16.mxu1 %v8131_v27 }
  0x88   : > { %5854 = vmatpush3.bf16.msra.mxu0 %v7028_v29  ;;  %v1672_v29 = vld [vmem:[%s8088_s5 + $0x18] sm:$0xff] }
  0x89   : > { %5856 = vmatprep.subr.bf16.mxu0 %v7034_v22  ;;  %v4638_v22 = vld [vmem:[%s8088_s5 + $0x58] sm:$0xff] }
  0x8a   : > { %5886 = vmatpush3.bf16.msra.mxu1 %v7032_v30 }
  0x8b   : > { %5888 = vmatprep.subr.bf16.mxu1 %v7049_v4  ;;  %v4639_v4 = vld [vmem:[%s8088_s5 + $0x60] sm:$0xff] }
  0x8c   : > { %5858 = vmatpush3.bf16.msra.mxu0 %v7067_v23  ;;  %v4640_v23 = vld [vmem:[%s8088_s5 + $0x68] sm:$0xff] }
  0x8d   : > { %5860 = vmatprep.subr.bf16.mxu0 %v7073_v45  ;;  %v5915_v45 = vpack.c.bf16 %v4638_v22, %v4637_v46 }
  0x8e   : > { %5890 = vmatpush3.bf16.msra.mxu1 %v7071_v50  ;;  %v1671_v50 = vld [vmem:[%s8088_s5 + $0x10] sm:$0xff] }
  0x8f   : > { %5892 = vmatprep.subr.bf16.mxu1 %v7082_v58  ;;  %v5899_v30 = vpack.c.bf16 %v1672_v29, %v1671_v50  ;;  %v5919_v58 = vpack.c.bf16 %v4640_v23, %v4639_v4 }
  0x90   : > { %5862 = vmatpush3.bf16.msra.mxu0 %v7091_v47  ;;  %v5903_v47 = vpack.c.bf16 %v1674_v57, %v1673_v59 }
  0x91   : > { %5896 = vmatprep.subr.bf16.mxu0 %v5895_v28 }
  0x92   : > { %5894 = vmatpush3.bf16.msra.mxu1 %v7095_v61  ;;  %v4641_v61 = vld [vmem:[%s8088_s5 + $0x70] sm:$0xff] }
  0x93   : > { %1560 = vmatmul.mubr.f32.vlgmr.msra.gmra.mrb[16].mxu0 %v1297_v35  ;;  %5912 = vmatprep.subr.bf16.mxu1 %v5911_v1  ;;  %v5923_v31 = vpack.c.bf16 %v4642_v2, %v4641_v61 }
  0x94   : > { %1564 = vmatprep.mubr.f32.mxu0 %v1306_v37  ;;  %5898 = vmatpush3.bf16.msra.mxu0 %v5895_v28 }
  0x95   : > { %1645 = vmatmul.mubr.f32.vlgmr.msra.gmra.mrb[16].mxu1 %v1299_v36  ;;  %5900 = vmatprep.subr.bf16.mxu0 %v5899_v30 }
  0x96   : > { %1649 = vmatprep.mubr.f32.mxu1 %v1308_v44  ;;  %5914 = vmatpush3.bf16.msra.mxu1 %v5911_v1 }
  0x97   : > { %1565 = vmatmul.mubr.f32.gmra.mrb[18].mxu0 %v1305_v53  ;;  %5916 = vmatprep.subr.bf16.mxu1 %v5915_v45 }
  0x98   : > { %1569 = vmatprep.mubr.f32.mxu0 %v1314_v55  ;;  %5902 = vmatpush3.bf16.msra.mxu0 %v5899_v30 }
  0x99   : > { %1650 = vmatmul.mubr.f32.gmra.mrb[18].mxu1 %v1307_v54  ;;  %5904 = vmatprep.subr.bf16.mxu0 %v5903_v47 }
  0x9a   : > { %1654 = vmatprep.mubr.f32.mxu1 %v1316_v60  ;;  %5918 = vmatpush3.bf16.msra.mxu1 %v5915_v45 }
  0x9b   : > { %1570 = vmatmul.mubr.f32.gmra.mrb[20].mxu0 %v1313_v10  ;;  %5920 = vmatprep.subr.bf16.mxu1 %v5919_v58 }
  0x9c   : > { %1574 = vmatprep.mubr.f32.mxu0 %v1322_v15  ;;  %5906 = vmatpush3.bf16.msra.mxu0 %v5903_v47 }
  0x9d   : > { %1655 = vmatmul.mubr.f32.gmra.mrb[20].mxu1 %v1315_v13  ;;  %5908 = vmatprep.subr.bf16.mxu0 %v5907_v18 }
  0x9e   : > { %1659 = vmatprep.mubr.f32.mxu1 %v1324_v24  ;;  %5922 = vmatpush3.bf16.msra.mxu1 %v5919_v58 }
  0x9f   : > { %1575 = vmatmul.mubr.f32.gmra.mrb[22].mxu0 %v1321_v40  ;;  %5924 = vmatprep.subr.bf16.mxu1 %v5923_v31 }
  0xa0   : > { %5910 = vmatpush3.bf16.msra.mxu0 %v5907_v18 }
  0xa1   : > { %1660 = vmatmul.mubr.f32.gmra.mrb[22].mxu1 %v1323_v41 }
  0xa2   : > { %5926 = vmatpush3.bf16.msra.mxu1 %v5923_v31 }
  0xa3   : > { %5944 = vmatprep.subr.bf16.mxu1 %v7269_v8 }
 0x106   : > { %v4839_v12 = vpop.f32.mrb[0].mxu0 }
 0x107   : > { %v4840_v17 = vpop.f32.mrb[1].mxu0 }
 0x108   : > { %v4877_v21 = vpop.f32.mrb[0].mxu1  ;;  %v4841_v25 = vadd.f32 %v4840_v17, %v4839_v12 }
 0x109   : > { %v4878_v26 = vpop.f32.mrb[1].mxu1 }
 0x10a   : > { %v4879_v33 = vadd.f32 %v4878_v26, %v4877_v21  ;;  %v1060_v34 = vadd.f32 %v4841_v25, %v4626_v16  ;;  %v4842_v39 = vpop.f32.mrb[2].mxu0 }
 0x10b   : > { %v4843_v43 = vpop.f32.mrb[3].mxu0 }
 0x10c   : > { %v1135_v38 = vadd.f32 %v4879_v33, %v1060_v34  ;;  %v4844_v48 = vadd.f32 %v4843_v43, %v4842_v39  ;;  %v4880_v51 = vpop.f32.mrb[2].mxu1 }
 0x10d   : > { %v4881_v56 = vpop.f32.mrb[3].mxu1 }
 0x10e   : > { %v1065_v52 = vadd.f32 %v4844_v48, %v4626_v16  ;;  %v4882_v62 = vadd.f32 %v4881_v56, %v4880_v51 }
 0x110   : > { %v1140_v63 = vadd.f32 %v4882_v62, %v1065_v52 }
 0x126   : > { %v4915_v0 = vpop.f32.mrb[4].mxu0 }
 0x127   : > { %v4916_v5 = vpop.f32.mrb[5].mxu0 }
 0x128   : > { %v4953_v14 = vpop.f32.mrb[4].mxu1  ;;  %v4917_v19 = vadd.f32 %v4916_v5, %v4915_v0  ;;  %v4662_v0 = vld [vmem:[%s8088_s5 + $0x98] sm:$0xff] }
 0x129   : > { %v4954_v20 = vpop.f32.mrb[5].mxu1 }
 0x12a   : > { %v4955_v27 = vadd.f32 %v4954_v20, %v4953_v14  ;;  %v1210_v35 = vadd.f32 %v4917_v19, %v1135_v38  ;;  %v4918_v36 = vpop.f32.mrb[6].mxu0 }
 0x12b   : > { %v4919_v37 = vpop.f32.mrb[7].mxu0 }
 0x12c   : > { %v4956_v44 = vpop.f32.mrb[6].mxu1  ;;  %v4920_v53 = vadd.f32 %v4919_v37, %v4918_v36  ;;  %v7275_v55 = vadd.f32 %v4955_v27, %v1210_v35 }
 0x12d   : > { %v4957_v54 = vpop.f32.mrb[7].mxu1 }
 0x12e   : > { %v4958_v60 = vadd.f32 %v4957_v54, %v4956_v44  ;;  %v1215_v10 = vadd.f32 %v4920_v53, %v1140_v63  ;;  %v4663_v53 = vld [vmem:[%s8088_s5 + $0xa0] sm:$0xff]  ;;  %v4664_v54 = vld [vmem:[%s8088_s5 + $0xa8] sm:$0xff] }
 0x130   : > { %v7277_v13 = vadd.f32 %v4958_v60, %v1215_v10 }
 0x146   : > { %v4991_v15 = vpop.f32.mrb[8].mxu0 }
 0x147   : > { %v4992_v24 = vpop.f32.mrb[9].mxu0 }
 0x148   : > { %v5035_v40 = vpop.f32.mrb[8].mxu1  ;;  %v4993_v41 = vadd.f32 %v4992_v24, %v4991_v15 }
 0x149   : > { %v5036_v42 = vpop.f32.mrb[9].mxu1 }
 0x14a   : > { %v5037_v49 = vadd.f32 %v5036_v42, %v5035_v40  ;;  %v1392_v1 = vadd.f32 %v4993_v41, %v4626_v16  ;;  %v4994_v9 = vpop.f32.mrb[10].mxu0 }
 0x14b   : > { %v4995_v11 = vpop.f32.mrb[11].mxu0 }
 0x14c   : > { %v5038_v28 = vpop.f32.mrb[10].mxu1  ;;  %v1477_v46 = vadd.f32 %v5037_v49, %v1392_v1  ;;  %v4996_v22 = vadd.f32 %v4995_v11, %v4994_v9  ;;  %v5951_v49 = vpack.c.bf16 %v4664_v54, %v4663_v53  ;;  %v4665_v9 = vld [vmem:[%s8088_s5 + $0xb0] sm:$0xff]  ;;  %v4666_v11 = vld [vmem:[%s8088_s5 + $0xb8] sm:$0xff] }
 0x14d   : > { %v5039_v45 = vpop.f32.mrb[11].mxu1  ;;  %v7426_v53 = vld [vmem:[%s8089_s6 + $0x58] sm:$0xff] }
 0x14e   : > { %v5040_v50 = vadd.f32 %v5039_v45, %v5038_v28  ;;  %v1397_v29 = vadd.f32 %v4996_v22, %v4626_v16  ;;  %v4997_v30 = vpop.f32.mrb[12].mxu0  ;;  %v7313_v22 = vld [vmem:[%s8089_s6 + $0x20] sm:$0xff] }
 0x14f   : > { %v4998_v4 = vpop.f32.mrb[13].mxu0  ;;  %v2279_v45 = vld [vmem:[%s8090_s7] sm:$0xff] }
 0x150   : > { %v5041_v23 = vpop.f32.mrb[12].mxu1  ;;  %v1482_v58 = vadd.f32 %v5040_v50, %v1397_v29  ;;  %v4999_v59 = vadd.f32 %v4998_v4, %v4997_v30  ;;  %v2280_v50 = vld [vmem:[%s8090_s7 + $0x8] sm:$0xff]  ;;  %v2281_v30 = vld [vmem:[%s8090_s7 + $0x10] sm:$0xff]  ;;  %v2282_v4 = vld [vmem:[%s8090_s7 + $0x18] sm:$0xff] }
 0x151   : > { %v5042_v57 = vpop.f32.mrb[13].mxu1  ;;  %v5967_v29 = vpack.c.bf16 %v2280_v50, %v2279_v45  ;;  %v4701_v45 = vld [vmem:[%s8090_s7 + $0x90] sm:$0xff]  ;;  %v4702_v50 = vld [vmem:[%s8090_s7 + $0x98] sm:$0xff] }
 0x152   : > { %v5043_v47 = vadd.f32 %v5042_v57, %v5041_v23  ;;  %v1402_v61 = vadd.f32 %v4999_v59, %v4626_v16  ;;  %v5000_v2 = vpop.f32.mrb[14].mxu0  ;;  %v5971_v23 = vpack.c.bf16 %v2282_v4, %v2281_v30  ;;  %v2284_v59 = vld [vmem:[%s8090_s7 + $0x28] sm:$0xff] }
 0x153   : > { %v5001_v31 = vpop.f32.mrb[15].mxu0 }
 0x154   : > { %v5044_v32 = vpop.f32.mrb[14].mxu1  ;;  %v1487_v6 = vadd.f32 %v5043_v47, %v1402_v61  ;;  %v5002_v18 = vadd.f32 %v5001_v31, %v5000_v2 }
 0x155   : > { %v5045_v3 = vpop.f32.mrb[15].mxu1 }
 0x156   : > { %v5046_v7 = vadd.f32 %v5045_v3, %v5044_v32  ;;  %v1407_v12 = vadd.f32 %v5002_v18, %v4626_v16  ;;  %v4661_v16 = vld [vmem:[%s8088_s5 + $0x90] sm:$0xff] }
 0x157   : > { %v5947_v37 = vpack.c.bf16 %v4662_v0, %v4661_v16  ;;  %v4680_v16 = vld [vmem:[%s8090_s7 + $0x48] sm:$0xff]  ;;  %v7386_v0 = vld [vmem:[%s8089_s6 + $0x18] sm:$0xff] }
 0x158   : > { %v1492_v17 = vadd.f32 %v5046_v7, %v1407_v12 }
 0x166   : > { %v5079_v21 = vpop.f32.mrb[16].mxu0 }
 0x167   : > { %v5080_v25 = vpop.f32.mrb[17].mxu0 }
 0x168   : > { %v5123_v26 = vpop.f32.mrb[16].mxu1  ;;  %v5081_v33 = vadd.f32 %v5080_v25, %v5079_v21  ;;  %v7338_v25 = vld [vmem:[%s8089_s6 + $0x28] sm:$0xff] }
 0x169   : > { %v5124_v34 = vpop.f32.mrb[17].mxu1 }
 0x16a   : > { %v5125_v38 = vadd.f32 %v5124_v34, %v5123_v26  ;;  %v1562_v39 = vadd.f32 %v5081_v33, %v1477_v46  ;;  %v5082_v43 = vpop.f32.mrb[18].mxu0  ;;  %v5955_v46 = vpack.c.bf16 %v4666_v11, %v4665_v9  ;;  %v7343_v26 = vld [vmem:[%s8089_s6 + $0x30] sm:$0xff]  ;;  %v2271_v11 = vstv %s839_s2 }
 0x16b   : > { %v5083_v48 = vpop.f32.mrb[19].mxu0 }
 0x16c   : > { %v5126_v51 = vpop.f32.mrb[18].mxu1  ;;  %v1647_v52 = vadd.f32 %v5125_v38, %v1562_v39  ;;  %v5084_v56 = vadd.f32 %v5083_v48, %v5082_v43  ;;  %v7352_v38 = vld [vmem:[%s8089_s6 + $0x38] sm:$0xff]  ;;  %v7357_v43 = vld [vmem:[%s8089_s6] sm:$0xff] }
 0x16d   : > { %v5127_v62 = vpop.f32.mrb[19].mxu1 }
 0x16e   : > { %v5128_v63 = vadd.f32 %v5127_v62, %v5126_v51  ;;  %v1567_v5 = vadd.f32 %v5084_v56, %v1482_v58  ;;  %v5085_v14 = vpop.f32.mrb[20].mxu0  ;;  %5331 = vmatprep.mubr.msk.f32.mxu0 %vm1677_vm0, %v1647_v52  ;;  %5353 = vmatprep.mubr.msk.f32.mxu1 %vm1677_vm0, %v1647_v52  ;;  %v2283_v58 = vld [vmem:[%s8090_s7 + $0x20] sm:$0xff]  ;;  %v7371_v62 = vld [vmem:[%s8089_s6 + $0x10] sm:$0xff] }
 0x16f   : > { %v5086_v19 = vpop.f32.mrb[21].mxu0  ;;  %v5975_v57 = vpack.c.bf16 %v2284_v59, %v2283_v58 }
 0x170   : > { %v5129_v20 = vpop.f32.mrb[20].mxu1  ;;  %v1652_v27 = vadd.f32 %v5128_v63, %v1567_v5  ;;  %v5087_v35 = vadd.f32 %v5086_v19, %v5085_v14  ;;  %v4679_v63 = vld [vmem:[%s8090_s7 + $0x40] sm:$0xff]  ;;  %v4681_v19 = vld [vmem:[%s8090_s7 + $0x50] sm:$0xff] }
 0x171   : > { %v5130_v36 = vpop.f32.mrb[21].mxu1  ;;  %v7391_v5 = vld [vmem:[%s8089_s6 + $0x40] sm:$0xff]  ;;  %v5983_v14 = vpack.c.bf16 %v4680_v16, %v4679_v63 }
 0x172   : > { %v5131_v44 = vadd.f32 %v5130_v36, %v5129_v20  ;;  %v1572_v60 = vadd.f32 %v5087_v35, %v1487_v6  ;;  %v5088_v10 = vpop.f32.mrb[22].mxu0  ;;  %5332 = vmatmul.mubr.msk.f32.vlgmr.msra.gmra.mrb[24].mxu0 %vm1677_vm0, %v1652_v27  ;;  %5354 = vmatmul.mubr.msk.f32.vlgmr.msra.gmra.mrb[24].mxu1 %vm1677_vm0, %v1652_v27  ;;  %v4682_v20 = vld [vmem:[%s8090_s7 + $0x58] sm:$0xff]  ;;  %v7411_v35 = vld [vmem:[%s8089_s6 + $0x50] sm:$0xff] }
 0x173   : > { %5946 = vmatpush3.bf16.msra.mxu1 %v7269_v8  ;;  %v5089_v15 = vpop.f32.mrb[23].mxu0  ;;  %v5987_v36 = vpack.c.bf16 %v4682_v20, %v4681_v19 }
 0x174   : > { %v5132_v24 = vpop.f32.mrb[22].mxu1  ;;  %v1657_v40 = vadd.f32 %v5131_v44, %v1572_v60  ;;  %v5090_v41 = vadd.f32 %v5089_v15, %v5088_v10  ;;  %5948 = vmatprep.subr.bf16.mxu1 %v5947_v37  ;;  %v4684_v44 = vld [vmem:[%s8090_s7 + $0x68] sm:$0xff]  ;;  %v4685_v60 = vld [vmem:[%s8090_s7 + $0x70] sm:$0xff]  ;;  %v4686_v10 = vld [vmem:[%s8090_s7 + $0x78] sm:$0xff] }
 0x175   : > { %v5133_v42 = vpop.f32.mrb[23].mxu1  ;;  %v5995_v15 = vpack.c.bf16 %v4686_v10, %v4685_v60 }
 0x176   : > { %v5134_v1 = vadd.f32 %v5133_v42, %v5132_v24  ;;  %v1577_v28 = vadd.f32 %v5090_v41, %v1492_v17  ;;  %5334 = vmatprep.mubr.msk.f32.mxu0 %vm1677_vm0, %v1657_v40  ;;  %5356 = vmatprep.mubr.msk.f32.mxu1 %vm1677_vm0, %v1657_v40  ;;  %v2285_v24 = vld [vmem:[%s8090_s7 + $0x30] sm:$0xff]  ;;  %v4699_v42 = vld [vmem:[%s8090_s7 + $0x80] sm:$0xff] }
 0x177   : > { %5950 = vmatpush3.bf16.msra.mxu1 %v5947_v37  ;;  %v4683_v37 = vld [vmem:[%s8090_s7 + $0x60] sm:$0xff] }
 0x178   : > { %v1662_v8 = vadd.f32 %v5134_v1, %v1577_v28  ;;  %5952 = vmatprep.subr.bf16.mxu1 %v5951_v49  ;;  %v5991_v54 = vpack.c.bf16 %v4684_v44, %v4683_v37 }
 0x17a   : > { %5335 = vmatmul.mubr.msk.f32.gmra.mrb[26].mxu0 %vm1677_vm0, %v1662_v8  ;;  %5357 = vmatmul.mubr.msk.f32.gmra.mrb[26].mxu1 %vm1677_vm0, %v1662_v8 }
 0x17b   : > { %5954 = vmatpush3.bf16.msra.mxu1 %v5951_v49  ;;  %5403 = vmatprep.mubr.msk.f32.mxu1 %vm1677_vm0, %v1647_v52  ;;  %v7366_v52 = vld [vmem:[%s8089_s6 + $0x8] sm:$0xff] }
 0x17c   : > { %5956 = vmatprep.subr.bf16.mxu1 %v5955_v46  ;;  %5367 = vmatprep.mubr.msk.f32.mxu0 %vm1874_vm1, %v7313_v22  ;;  %v4700_v49 = vld [vmem:[%s8090_s7 + $0x88] sm:$0xff] }
 0x17d   : > { %v6015_v1 = vpack.c.bf16 %v4700_v49, %v4699_v42  ;;  %v2927_v42 = vld [vmem:[%s8093_s10 + $0x10] sm:$0xff]  ;;  %v2928_v49 = vld [vmem:[%s8093_s10 + $0x18] sm:$0xff] }
 0x17f   : > { %5958 = vmatpush3.bf16.msra.mxu1 %v5955_v46 }
 0x180   : > { %5968 = vmatprep.subr.bf16.mxu1 %v5967_v29 }
 0x182   : > { %5404 = vmatmul.mubr.msk.f32.vlgmr.msra.gmra.mrb[28].mxu1 %vm1677_vm0, %v1652_v27  ;;  %v7406_v27 = vld [vmem:[%s8089_s6 + $0x48] sm:$0xff] }
 0x183   : > { %5406 = vmatprep.mubr.msk.f32.mxu1 %vm1677_vm0, %v1657_v40  ;;  %5970 = vmatpush3.bf16.msra.mxu1 %v5967_v29  ;;  %v2286_v40 = vld [vmem:[%s8090_s7 + $0x38] sm:$0xff] }
 0x184   : > { %5972 = vmatprep.subr.bf16.mxu1 %v5971_v23  ;;  %v5979_v41 = vpack.c.bf16 %v2286_v40, %v2285_v24  ;;  %v2925_v40 = vld [vmem:[%s8093_s10] sm:$0xff] }
 0x186   : > { %5407 = vmatmul.mubr.msk.f32.gmra.mrb[30].mxu1 %vm1677_vm0, %v1662_v8 }
 0x187   : > { %5974 = vmatpush3.bf16.msra.mxu1 %v5971_v23  ;;  %v2276_v23 = vstv %s841_s30 }
 0x188   : > { %5976 = vmatprep.subr.bf16.mxu1 %v5975_v57 }
 0x18b   : > { %5978 = vmatpush3.bf16.msra.mxu1 %v5975_v57  ;;  %v6019_v57 = vpack.c.bf16 %v4702_v50, %v4701_v45  ;;  %v4727_v45 = vld [vmem:[%s8094_s11 + $0x38] sm:$0xff] }
 0x18c   : > { %5980 = vmatprep.subr.bf16.mxu1 %v5979_v41 }
 0x18f   : > { %5982 = vmatpush3.bf16.msra.mxu1 %v5979_v41 }
 0x245   : > { %v5333_v47 = vpop.f32.mrb[24].mxu0  ;;  %v5355_v61 = vpop.f32.mrb[24].mxu1 }
 0x246   : > { %v1756_v2 = vpop.f32.mrb[25].mxu0  ;;  %v1855_v31 = vpop.f32.mrb[25].mxu1 }
 0x247   : > { %v5935_v32 = vpack.c.bf16 %v5333_v47, %v1756_v2  ;;  %v5927_v6 = vpack.c.bf16 %v5355_v61, %v1855_v31  ;;  %v4703_v61 = vld [vmem:[%s8090_s7 + $0xa0] sm:$0xff]  ;;  %v4704_v2 = vld [vmem:[%s8090_s7 + $0xa8] sm:$0xff] }
 0x249   : > { %5928 = vmatprep.subr.bf16.mxu0 %v5927_v6 }
 0x24a   : > { %5930 = vmatpush3.bf16.msra.mxu0 %v5927_v6  ;;  %v4705_v6 = vld [vmem:[%s8090_s7 + $0xb0] sm:$0xff] }
 0x24d   : > { %v5336_v18 = vpop.f32.mrb[26].mxu0  ;;  %v5358_v3 = vpop.f32.mrb[26].mxu1 }
 0x24e   : > { %v1766_v7 = vpop.f32.mrb[27].mxu0  ;;  %v1865_v12 = vpop.f32.mrb[27].mxu1 }
 0x24f   : > { %v5939_v17 = vpack.c.bf16 %v5336_v18, %v1766_v7  ;;  %v5931_v21 = vpack.c.bf16 %v5358_v3, %v1865_v12  ;;  %v4706_v18 = vld [vmem:[%s8090_s7 + $0xb8] sm:$0xff]  ;;  %v2842_v12 = vld [vmem:[%s8092_s9] sm:$0xff] }
 0x250   : > { %v6027_v7 = vpack.c.bf16 %v4706_v18, %v4705_v6 }
 0x251   : > { %5932 = vmatprep.subr.bf16.mxu0 %v5931_v21 }
 0x252   : > { %5934 = vmatpush3.bf16.msra.mxu0 %v5931_v21  ;;  %v3017_v21 = vld [vmem:[%s8094_s11 + $0x8] sm:$0xff] }
 0x253   : > { %5936 = vmatprep.subr.bf16.mxu0 %v5935_v32 }
 0x255   : > { %v5405_v33 = vpop.f32.mrb[28].mxu1  ;;  %5368 = vmatmul.mubr.msk.f32.vlgmr.msra.gmra.mrb[28].mxu0 %vm1874_vm1, %v7338_v25 }
 0x256   : > { %v2149_v34 = vpop.f32.mrb[29].mxu1  ;;  %5938 = vmatpush3.bf16.msra.mxu0 %v5935_v32  ;;  %5370 = vmatprep.mubr.msk.f32.mxu0 %vm1874_vm1, %v7343_v26  ;;  %v6023_v32 = vpack.c.bf16 %v4704_v2, %v4703_v61  ;;  %v4736_v61 = vld [vmem:[%s8094_s11 + $0x40] sm:$0xff]  ;;  %v4737_v2 = vld [vmem:[%s8094_s11 + $0x48] sm:$0xff] }
 0x257   : > { %v5959_v39 = vpack.c.bf16 %v5405_v33, %v2149_v34  ;;  %5940 = vmatprep.subr.bf16.mxu0 %v5939_v17  ;;  %v3018_v33 = vld [vmem:[%s8094_s11 + $0x10] sm:$0xff]  ;;  %v6087_v18 = vpack.c.bf16 %v4737_v2, %v4736_v61  ;;  %v3751_v61 = vld [vmem:[%s8099_s16 + $0x98] sm:$0xff] }
 0x258   : > { %v3759_v2 = vld [vmem:[%s8099_s16 + $0xd8] sm:$0xff] }
 0x259   : > { %v5408_v48 = vpop.f32.mrb[30].mxu1  ;;  %5371 = vmatmul.mubr.msk.f32.gmra.mrb[30].mxu0 %vm1874_vm1, %v7352_v38 }
 0x25a   : > { %v2159_v51 = vpop.f32.mrb[31].mxu1  ;;  %5942 = vmatpush3.bf16.msra.mxu0 %v5939_v17  ;;  %5381 = vmatprep.mubr.msk.f32.mxu0 %vm1874_vm1, %v7357_v43  ;;  %v3016_v17 = vld [vmem:[%s8094_s11] sm:$0xff] }
 0x25b   : > { %v5963_v56 = vpack.c.bf16 %v5408_v48, %v2159_v51  ;;  %5960 = vmatprep.subr.bf16.mxu0 %v5959_v39  ;;  %v6063_v34 = vpack.c.bf16 %v3017_v21, %v3016_v17  ;;  %v3014_v17 = vld [vmem:[%s8095_s12] sm:$0xff]  ;;  %v3015_v21 = vld [vmem:[%s8095_s12 + $0x8] sm:$0xff] }
 0x25d   : > { %5382 = vmatmul.mubr.msk.f32.vlgmr.msra.gmra.mrb[28].mxu0 %vm1874_vm1, %v7366_v52 }
 0x25e   : > { %5962 = vmatpush3.bf16.msra.mxu0 %v5959_v39  ;;  %5384 = vmatprep.mubr.msk.f32.mxu0 %vm1874_vm1, %v7371_v62  ;;  %v3019_v39 = vld [vmem:[%s8094_s11 + $0x18] sm:$0xff] }
 0x25f   : > { %5964 = vmatprep.subr.bf16.mxu0 %v5963_v56  ;;  %v6067_v48 = vpack.c.bf16 %v3019_v39, %v3018_v33  ;;  %v4734_v33 = vld [vmem:[%s8095_s12 + $0x20] sm:$0xff] }
 0x261   : > { %5385 = vmatmul.mubr.msk.f32.gmra.mrb[30].mxu0 %vm1874_vm1, %v7386_v0 }
 0x262   : > { %5966 = vmatpush3.bf16.msra.mxu0 %v5963_v56  ;;  %5417 = vmatprep.mubr.msk.f32.mxu0 %vm1874_vm1, %v7391_v5 }
 0x263   : > { %5984 = vmatprep.subr.bf16.mxu0 %v5983_v14 }
 0x265   : > { %5418 = vmatmul.mubr.msk.f32.vlgmr.msra.gmra.mrb[28].mxu0 %vm1874_vm1, %v7406_v27 }
 0x266   : > { %5420 = vmatprep.mubr.msk.f32.mxu0 %vm1874_vm1, %v7411_v35  ;;  %5986 = vmatpush3.bf16.msra.mxu0 %v5983_v14 }
 0x267   : > { %5988 = vmatprep.subr.bf16.mxu0 %v5987_v36 }
 0x269   : > { %5421 = vmatmul.mubr.msk.f32.gmra.mrb[30].mxu0 %vm1874_vm1, %v7426_v53 }
 0x26a   : > { %5990 = vmatpush3.bf16.msra.mxu0 %v5987_v36 }
 0x26b   : > { %5992 = vmatprep.subr.bf16.mxu0 %v5991_v54 }
 0x26e   : > { %5994 = vmatpush3.bf16.msra.mxu0 %v5991_v54 }
 0x26f   : > { %5996 = vmatprep.subr.bf16.mxu0 %v5995_v15 }
 0x272   : > { %5998 = vmatpush3.bf16.msra.mxu0 %v5995_v15 }
 0x273   : > { %6016 = vmatprep.subr.bf16.mxu0 %v6015_v1 }
 0x338   : > { %v5419_v9 = vpop.f32.mrb[28].mxu0 }
 0x339   : > { %v2270_v28 = vsub.f32 %v5419_v9, %v7277_v13  ;;  %v2246_v8 = vpop.f32.mrb[29].mxu0  ;;  %v2929_v9 = vld [vmem:[%s8093_s10 + $0x20] sm:$0xff] }
 0x33a   : > { %v2269_v46 = vsub.f32 %v2246_v8, %v7275_v55  ;;  %v4725_v8 = vld [vmem:[%s8094_s11 + $0x28] sm:$0xff] }
 0x33b   : > { %v7458_v29 = vmul.f32 %v2271_v11, %v2270_v28  ;;  %v2932_v28 = vld [vmem:[%s8093_s10 + $0x38] sm:$0xff] }
 0x33c   : > { %v7460_v30 = vmul.f32 %v2271_v11, %v2269_v46  ;;  %v5422_v4 = vpop.f32.mrb[30].mxu0  ;;  %v2930_v11 = vld [vmem:[%s8093_s10 + $0x28] sm:$0xff] }
 0x33d   : > { %v2275_v58 = vsub.f32 %v5422_v4, %v7277_v13  ;;  %v2256_v59 = vpop.f32.mrb[31].mxu0 }
 0x33e   : > { %v2274_v47 = vsub.f32 %v2256_v59, %v7275_v55  ;;  %5439 = vmatprep.mubr.msk.f32.mxu1 %vm1677_vm0, %v7460_v30  ;;  %5461 = vmatprep.mubr.msk.f32.mxu0 %vm1677_vm0, %v7460_v30  ;;  %v6039_v13 = vpack.c.bf16 %v7458_v29, %v7460_v30 }
 0x33f   : > { %v7476_v31 = vmul.f32 %v2276_v23, %v2275_v58  ;;  %5440 = vmatmul.mubr.msk.f32.vlgmr.msra.gmra.mrb[32].mxu1 %vm1677_vm0, %v7458_v29  ;;  %5462 = vmatmul.mubr.msk.f32.vlgmr.msra.gmra.mrb[32].mxu0 %vm1677_vm0, %v7458_v29  ;;  %v4722_v58 = vld [vmem:[%s8095_s12 + $0x10] sm:$0xff] }
 0x340   : > { %v7482_v55 = vmul.f32 %v2276_v23, %v2274_v47  ;;  %6018 = vmatpush3.bf16.msra.mxu0 %v6015_v1  ;;  %v6051_v1 = vpack.c.bf16 %v2928_v49, %v2927_v42  ;;  %v3733_v42 = vld [vmem:[%s8099_s16 + $0x8] sm:$0xff] }
 0x341   : > { %6020 = vmatprep.subr.bf16.mxu0 %v6019_v57  ;;  %v3741_v49 = vld [vmem:[%s8099_s16 + $0x48] sm:$0xff] }
 0x342   : > { %5442 = vmatprep.mubr.msk.f32.mxu1 %vm1677_vm0, %v7482_v55  ;;  %5464 = vmatprep.mubr.msk.f32.mxu0 %vm1677_vm0, %v7482_v55  ;;  %v6043_v3 = vpack.c.bf16 %v7476_v31, %v7482_v55 }
 0x343   : > { %5443 = vmatmul.mubr.msk.f32.gmra.mrb[34].mxu1 %vm1677_vm0, %v7476_v31  ;;  %5465 = vmatmul.mubr.msk.f32.gmra.mrb[34].mxu0 %vm1677_vm0, %v7476_v31 }
 0x344   : > { %6022 = vmatpush3.bf16.msra.mxu0 %v6019_v57  ;;  %5511 = vmatprep.mubr.msk.f32.mxu0 %vm1677_vm0, %v7460_v30 }
 0x345   : > { %6024 = vmatprep.subr.bf16.mxu0 %v6023_v32  ;;  %5475 = vmatprep.mubr.msk.f32.mxu1 %vm1874_vm1, %v7313_v22  ;;  %v2843_v22 = vld [vmem:[%s8092_s9 + $0x8] sm:$0xff] }
 0x348   : > { %6026 = vmatpush3.bf16.msra.mxu0 %v6023_v32 }
 0x349   : > { %6028 = vmatprep.subr.bf16.mxu0 %v6027_v7 }
 0x34c   : > { %6030 = vmatpush3.bf16.msra.mxu0 %v6027_v7  ;;  %v4739_v7 = vld [vmem:[%s8094_s11 + $0x58] sm:$0xff] }
 0x34d   : > { %6040 = vmatprep.subr.bf16.mxu0 %v6039_v13 }
 0x34f   : > { %5512 = vmatmul.mubr.msk.f32.vlgmr.msra.gmra.mrb[36].mxu0 %vm1677_vm0, %v7458_v29 }
 0x350   : > { %5514 = vmatprep.mubr.msk.f32.mxu0 %vm1677_vm0, %v7482_v55  ;;  %6042 = vmatpush3.bf16.msra.mxu0 %v6039_v13 }
 0x351   : > { %6044 = vmatprep.subr.bf16.mxu0 %v6043_v3 }
 0x353   : > { %5515 = vmatmul.mubr.msk.f32.gmra.mrb[38].mxu0 %vm1677_vm0, %v7476_v31 }
 0x354   : > { %6046 = vmatpush3.bf16.msra.mxu0 %v6043_v3  ;;  %5539 = vmatprep.mubr.msk.f32.mxu0 %vm1874_vm1, %v2842_v12  ;;  %v4738_v3 = vld [vmem:[%s8094_s11 + $0x50] sm:$0xff]  ;;  %v4723_v12 = vld [vmem:[%s8095_s12 + $0x18] sm:$0xff] }
 0x355   : > { %6064 = vmatprep.subr.bf16.mxu0 %v6063_v34 }
 0x357   : > { %5540 = vmatmul.mubr.msk.f32.vlgmr.msra.gmra.mrb[40].mxu0 %vm1874_vm1, %v2843_v22  ;;  %v6091_v22 = vpack.c.bf16 %v4739_v7, %v4738_v3  ;;  %v3750_v3 = vld [vmem:[%s8099_s16 + $0x90] sm:$0xff] }
 0x358   : > { %6066 = vmatpush3.bf16.msra.mxu0 %v6063_v34  ;;  %v3758_v7 = vld [vmem:[%s8099_s16 + $0xd0] sm:$0xff] }
 0x359   : > { %6068 = vmatprep.subr.bf16.mxu0 %v6067_v48 }
 0x35c   : > { %6070 = vmatpush3.bf16.msra.mxu0 %v6067_v48 }
 0x412   : > { %v5441_v51 = vpop.f32.mrb[32].mxu1  ;;  %v5463_v56 = vpop.f32.mrb[32].mxu0 }
 0x413   : > { %v2365_v63 = vpop.f32.mrb[33].mxu1  ;;  %v2459_v16 = vpop.f32.mrb[33].mxu0 }
 0x414   : > { %v6007_v14 = vpack.c.bf16 %v5441_v51, %v2365_v63  ;;  %v5999_v19 = vpack.c.bf16 %v5463_v56, %v2459_v16  ;;  %v4735_v63 = vld [vmem:[%s8095_s12 + $0x28] sm:$0xff]  ;;  %v3522_v16 = vld [vmem:[%s8097_s14] sm:$0xff] }
 0x416   : > { %v5444_v20 = vpop.f32.mrb[34].mxu1  ;;  %v5466_v36 = vpop.f32.mrb[34].mxu0  ;;  %6000 = vmatprep.subr.bf16.mxu1 %v5999_v19 }
 0x417   : > { %v2375_v37 = vpop.f32.mrb[35].mxu1  ;;  %v2469_v44 = vpop.f32.mrb[35].mxu0  ;;  %6002 = vmatpush3.bf16.msra.mxu1 %v5999_v19  ;;  %v4744_v19 = vld [vmem:[%s8096_s13] ss:$0 sm:$0xff] }
 0x418   : > { %v6011_v54 = vpack.c.bf16 %v5444_v20, %v2375_v37  ;;  %v6003_v60 = vpack.c.bf16 %v5466_v36, %v2469_v44 }
 0x41a   : > { %6004 = vmatprep.subr.bf16.mxu1 %v6003_v60 }
 0x41b   : > { %6006 = vmatpush3.bf16.msra.mxu1 %v6003_v60  ;;  %v3624_v60 = vld [vmem:[%s8098_s15 + $0x8] sm:$0xff] }
 0x41c   : > { %6008 = vmatprep.subr.bf16.mxu1 %v6007_v14 }
 0x41e   : > { %5476 = vmatmul.mubr.msk.f32.vlgmr.msra.gmra.mrb[36].mxu1 %vm1874_vm1, %v7338_v25  ;;  %v2926_v25 = vld [vmem:[%s8093_s10 + $0x8] sm:$0xff] }
 0x41f   : > { %6010 = vmatpush3.bf16.msra.mxu1 %v6007_v14  ;;  %5478 = vmatprep.mubr.msk.f32.mxu1 %vm1874_vm1, %v7343_v26  ;;  %v6047_v41 = vpack.c.bf16 %v2926_v25, %v2925_v40  ;;  %v3625_v40 = vld [vmem:[%s8098_s15 + $0x10] sm:$0xff]  ;;  %v3626_v25 = vld [vmem:[%s8098_s15 + $0x18] sm:$0xff] }
 0x420   : > { %6012 = vmatprep.subr.bf16.mxu1 %v6011_v54 }
 0x422   : > { %v5513_v10 = vpop.f32.mrb[36].mxu0  ;;  %5479 = vmatmul.mubr.msk.f32.gmra.mrb[38].mxu1 %vm1874_vm1, %v7352_v38 }
 0x423   : > { %v2723_v15 = vpop.f32.mrb[37].mxu0  ;;  %6014 = vmatpush3.bf16.msra.mxu1 %v6011_v54  ;;  %5489 = vmatprep.mubr.msk.f32.mxu1 %vm1874_vm1, %v7357_v43  ;;  %v3623_v54 = vld [vmem:[%s8098_s15] sm:$0xff] }
 0x424   : > { %v6031_v24 = vpack.c.bf16 %v5513_v10, %v2723_v15 }
 0x426   : > { %v5516_v26 = vpop.f32.mrb[38].mxu0  ;;  %6032 = vmatprep.subr.bf16.mxu1 %v6031_v24  ;;  %5490 = vmatmul.mubr.msk.f32.vlgmr.msra.gmra.mrb[36].mxu1 %vm1874_vm1, %v7366_v52 }
 0x427   : > { %v2733_v38 = vpop.f32.mrb[39].mxu0  ;;  %6034 = vmatpush3.bf16.msra.mxu1 %v6031_v24  ;;  %5492 = vmatprep.mubr.msk.f32.mxu1 %vm1874_vm1, %v7371_v62  ;;  %v6103_v24 = vpack.c.bf16 %v3624_v60, %v3623_v54  ;;  %v3782_v54 = vld [vmem:[%s8099_s16 + $0x190] sm:$0xff] }
 0x428   : > { %v6035_v43 = vpack.c.bf16 %v5516_v26, %v2733_v38  ;;  %v3523_v26 = vld [vmem:[%s8097_s14 + $0x8] sm:$0xff]  ;;  %v3524_v38 = vld [vmem:[%s8097_s14 + $0x10] sm:$0xff] }
 0x429   : > { %v3790_v60 = vld [vmem:[%s8099_s16 + $0x1d0] sm:$0xff] }
 0x42a   : > { %6036 = vmatprep.subr.bf16.mxu1 %v6035_v43  ;;  %5493 = vmatmul.mubr.msk.f32.gmra.mrb[38].mxu1 %vm1874_vm1, %v7386_v0  ;;  %v5541_v52 = vpop.f32.mrb[40].mxu0  ;;  %v6055_v0 = vpack.c.bf16 %v2930_v11, %v2929_v9  ;;  %v3732_v9 = vld [vmem:[%s8099_s16] sm:$0xff] }
 0x42b   : > { %6038 = vmatpush3.bf16.msra.mxu1 %v6035_v43  ;;  %5525 = vmatprep.mubr.msk.f32.mxu1 %vm1874_vm1, %v7391_v5  ;;  %v2916_v62 = vpop.f32.mrb[41].mxu0  ;;  %v2931_v5 = vld [vmem:[%s8093_s10 + $0x30] sm:$0xff]  ;;  %v6107_v43 = vpack.c.bf16 %v3626_v25, %v3625_v40  ;;  %v3740_v11 = vld [vmem:[%s8099_s16 + $0x40] sm:$0xff]  ;;  %v3739_v40 = vld [vmem:[%s8099_s16 + $0x38] sm:$0xff] }
 0x42c   : > { %6048 = vmatprep.subr.bf16.mxu1 %v6047_v41 }
 0x42e   : > { %5526 = vmatmul.mubr.msk.f32.vlgmr.msra.gmra.mrb[36].mxu1 %vm1874_vm1, %v7406_v27  ;;  %v6059_v27 = vpack.c.bf16 %v2932_v28, %v2931_v5  ;;  %v6113_v5 = vpack.c.bf16 %v3740_v11, %v3732_v9  ;;  %v3749_v28 = vld [vmem:[%s8099_s16 + $0x88] sm:$0xff] }
 0x42f   : > { %6050 = vmatpush3.bf16.msra.mxu1 %v6047_v41  ;;  %5528 = vmatprep.mubr.msk.f32.mxu1 %vm1874_vm1, %v7411_v35  ;;  %v4724_v35 = vld [vmem:[%s8094_s11 + $0x20] sm:$0xff]  ;;  %v3525_v41 = vld [vmem:[%s8097_s14 + $0x18] sm:$0xff]  ;;  %v3753_v9 = vld [vmem:[%s8099_s16 + $0xa8] sm:$0xff] }
 0x430   : > { %6052 = vmatprep.subr.bf16.mxu1 %v6051_v1  ;;  %v6071_v46 = vpack.c.bf16 %v4725_v8, %v4724_v35  ;;  %v3748_v8 = vld [vmem:[%s8099_s16 + $0x80] sm:$0xff] }
 0x432   : > { %5529 = vmatmul.mubr.msk.f32.gmra.mrb[38].mxu1 %vm1874_vm1, %v7426_v53  ;;  %6072 = vmatprep.subr.bf16.mxu0 %v6071_v46  ;;  %v4726_v53 = vld [vmem:[%s8094_s11 + $0x30] sm:$0xff] }
 0x433   : > { %6054 = vmatpush3.bf16.msra.mxu1 %v6051_v1  ;;  %5558 = vmatprep.mubr.msk.f32.mxu1 %vm1677_vm0, %v2916_v62  ;;  %v6075_v23 = vpack.c.bf16 %v4727_v45, %v4726_v53  ;;  %v6111_v62 = vpack.c.bf16 %v3741_v49, %v3733_v42  ;;  %v3743_v1 = vld [vmem:[%s8099_s16 + $0x58] sm:$0xff]  ;;  %v3765_v45 = vld [vmem:[%s8099_s16 + $0x108] sm:$0xff]  ;;  %v3736_v42 = vld [vmem:[%s8099_s16 + $0x20] sm:$0xff] }
 0x434   : > { %6056 = vmatprep.subr.bf16.mxu1 %v6055_v0  ;;  %v3744_v49 = vld [vmem:[%s8099_s16 + $0x60] sm:$0xff] }
 0x437   : > { %6058 = vmatpush3.bf16.msra.mxu1 %v6055_v0 }
 0x438   : > { %6060 = vmatprep.subr.bf16.mxu1 %v6059_v27 }
 0x43b   : > { %6062 = vmatpush3.bf16.msra.mxu1 %v6059_v27  ;;  %v3757_v27 = vld [vmem:[%s8099_s16 + $0xc8] sm:$0xff] }
 0x43c   : > { %v6115_v35 = vpack.c.bf16 %v3757_v27, %v3749_v28  ;;  %v3755_v28 = vld [vmem:[%s8099_s16 + $0xb8] sm:$0xff] }
 0x43d   : > { %v3763_v27 = vld [vmem:[%s8099_s16 + $0xf8] sm:$0xff] }
 0x43e   : > { %5559 = vmatmul.mubr.msk.f32.vlgmr.msra.gmra.mrb[40].mxu1 %vm1677_vm0, %v5541_v52  ;;  %v3735_v52 = vld [vmem:[%s8099_s16 + $0x18] sm:$0xff] }
 0x43f   : > { %5594 = vmatprep.mubr.msk.f32.mxu1 %vm3184_vm2, %v3014_v17  ;;  %v6127_v0 = vpack.c.bf16 %v3743_v1, %v3735_v52  ;;  %v3738_v52 = vld [vmem:[%s8099_s16 + $0x30] sm:$0xff] }
 0x511   : > { %v5560_v50 = vpop.f32.mrb[40].mxu1 }
 0x512   : > { %v3005_v4 = vpop.f32.mrb[41].mxu1 }
 0x513   : > { %5569 = vmatprep.mubr.msk.f32.mxu0 %vm1874_vm1, %v3005_v4 }
 0x514   : > { %5570 = vmatmul.mubr.msk.f32.vlgmr.msra.gmra.mrb[42].mxu0 %vm1874_vm1, %v5560_v50 }
 0x515   : > { %6074 = vmatpush3.bf16.msra.mxu0 %v6071_v46  ;;  %5580 = vmatprep.mubr.msk.f32.mxu0 %vm1874_vm1, %v3005_v4  ;;  %v3756_v46 = vld [vmem:[%s8099_s16 + $0xc0] sm:$0xff] }
 0x516   : > { %6076 = vmatprep.subr.bf16.mxu0 %v6075_v23  ;;  %v6117_v53 = vpack.c.bf16 %v3756_v46, %v3748_v8  ;;  %v6145_v8 = vpack.c.bf16 %v3744_v49, %v3736_v42 }
 0x519   : > { %6078 = vmatpush3.bf16.msra.mxu0 %v6075_v23  ;;  %v3764_v23 = vld [vmem:[%s8099_s16 + $0x100] sm:$0xff] }
 0x51c   : > { %5581 = vmatmul.mubr.msk.f32.vlgmr.msra.gmra.mrb[44].mxu0 %vm1874_vm1, %v5560_v50 }
 0x51d   : > { %5587 = vmatprep.mubr.msk.f32.mxu0 %vm3184_vm2, %v4722_v58  ;;  %v3772_v58 = vld [vmem:[%s8099_s16 + $0x140] sm:$0xff] }
 0x5e7   : > { %v5571_v59 = vpop.f32.mrb[42].mxu0 }
 0x5e8   : > { %v3092_v57 = vpop.f32.mrb[43].mxu0 }
 0x5e9   : > { %v6083_v47 = vpack.c.bf16 %v5571_v59, %v3092_v57  ;;  %v6121_v59 = vpack.c.bf16 %v3772_v58, %v3764_v23  ;;  %v3734_v57 = vld [vmem:[%s8099_s16 + $0x10] sm:$0xff] }
 0x5eb   : > { %6084 = vmatprep.subr.bf16.mxu1 %v6083_v47 }
 0x5ec   : > { %6086 = vmatpush3.bf16.msra.mxu1 %v6083_v47  ;;  %v3742_v47 = vld [vmem:[%s8099_s16 + $0x50] sm:$0xff] }
 0x5ef   : > { %v5582_v13 = vpop.f32.mrb[44].mxu0  ;;  %5595 = vmatmul.mubr.msk.f32.vlgmr.msra.gmra.mrb[42].mxu1 %vm3184_vm2, %v3015_v21  ;;  %v6133_v21 = vpack.c.bf16 %v3758_v7, %v3750_v3 }
 0x5f0   : > { %v3175_v32 = vpop.f32.mrb[45].mxu0  ;;  %5612 = vmatprep.mubr.msk.f32.mxu1 %vm3184_vm2, %v4734_v33 }
 0x5f1   : > { %v6079_v6 = vpack.c.bf16 %v5582_v13, %v3175_v32  ;;  %v6129_v32 = vpack.c.bf16 %v3742_v47, %v3734_v57  ;;  %v3769_v57 = vld [vmem:[%s8099_s16 + $0x128] sm:$0xff] }
 0x5f3   : > { %6080 = vmatprep.subr.bf16.mxu0 %v6079_v6 }
 0x5f4   : > { %6082 = vmatpush3.bf16.msra.mxu0 %v6079_v6 }
 0x5f5   : > { %6088 = vmatprep.subr.bf16.mxu0 %v6087_v18 }
 0x5f7   : > { %5588 = vmatmul.mubr.msk.f32.vlgmr.msra.gmra.mrb[46].mxu0 %vm3184_vm2, %v4723_v12  ;;  %v3767_v12 = vld [vmem:[%s8099_s16 + $0x118] sm:$0xff] }
 0x5f8   : > { %6090 = vmatpush3.bf16.msra.mxu0 %v6087_v18  ;;  %5605 = vmatprep.mubr.msk.f32.mxu0 %vm1874_vm1, %v3005_v4  ;;  %v6131_v18 = vpack.c.bf16 %v3759_v2, %v3751_v61  ;;  %v3777_v2 = vld [vmem:[%s8099_s16 + $0x168] sm:$0xff] }
 0x5f9   : > { %6092 = vmatprep.subr.bf16.mxu0 %v6091_v22 }
 0x5fc   : > { %6094 = vmatpush3.bf16.msra.mxu0 %v6091_v22  ;;  %v3775_v22 = vld [vmem:[%s8099_s16 + $0x158] sm:$0xff] }
 0x5fd   : > { %6112 = vmatprep.subr.bf16.mxu0 %v6111_v62  ;;  %v3746_v62 = vld [vmem:[%s8099_s16 + $0x70] sm:$0xff] }
 0x5fe   : > { %v6161_v46 = vpack.c.bf16 %v3746_v62, %v3738_v52 }
 0x5ff   : > { %5606 = vmatmul.mubr.msk.f32.vlgmr.msra.gmra.mrb[48].mxu0 %vm1874_vm1, %v5560_v50  ;;  %v3773_v50 = vld [vmem:[%s8099_s16 + $0x148] sm:$0xff] }
 0x600   : > { %6114 = vmatpush1.bf16.msra.mxu0 %v6113_v5  ;;  %v6119_v4 = vpack.c.bf16 %v3773_v50, %v3765_v45  ;;  %v3761_v5 = vld [vmem:[%s8099_s16 + $0xe8] sm:$0xff]  ;;  %v3760_v45 = vld [vmem:[%s8099_s16 + $0xe0] sm:$0xff]  ;;  %v3754_v50 = vld [vmem:[%s8099_s16 + $0xb0] sm:$0xff] }
 0x601   : > { %6116 = vmatprep.subr.bf16.mxu0 %v6115_v35  ;;  %v6147_v58 = vpack.c.bf16 %v3761_v5, %v3753_v9 }
 0x604   : > { %6118 = vmatpush1.bf16.msra.mxu0 %v6117_v53 }
 0x605   : > { %6120 = vmatprep.subr.bf16.mxu0 %v6119_v4  ;;  %v3762_v4 = vld [vmem:[%s8099_s16 + $0xf0] sm:$0xff] }
 0x606   : > { %v6165_v3 = vpack.c.bf16 %v3762_v4, %v3754_v50 }
 0x608   : > { %6122 = vmatpush1.bf16.msra.mxu0 %v6121_v59  ;;  %v6163_v59 = vpack.c.bf16 %v3763_v27, %v3755_v28 }
 0x6ca   : > { %v5589_v34 = vpop.f32.mrb[46].mxu0 }
 0x6cb   : > { %v3257_v39 = vpop.f32.mrb[47].mxu0 }
 0x6d2   : > { %v5607_v48 = vpop.f32.mrb[48].mxu0 }
 0x6d3   : > { %v3421_v51 = vpop.f32.mrb[49].mxu0 }
 0x6d4   : > { %v6095_v56 = vpack.c.bf16 %v5607_v48, %v3421_v51  ;;  %v3774_v48 = vld [vmem:[%s8099_s16 + $0x150] sm:$0xff] }
 0x6d6   : > { %6096 = vmatprep.subr.bf16.mxu1 %v6095_v56 }
 0x6d7   : > { %6098 = vmatpush3.bf16.msra.mxu1 %v6095_v56  ;;  %v3781_v56 = vld [vmem:[%s8099_s16 + $0x188] sm:$0xff] }
 0x6da   : > { %5613 = vmatmul.mubr.msk.f32.vlgmr.msra.gmra.mrb[42].mxu1 %vm3184_vm2, %v4735_v63  ;;  %v3789_v63 = vld [vmem:[%s8099_s16 + $0x1c8] sm:$0xff] }
 0x6db   : > { %5619 = vmatprep.mubr.msk.f32.mxu1 %vm3184_vm2, %v3522_v16  ;;  %v3783_v16 = vld [vmem:[%s8099_s16 + $0x198] sm:$0xff] }
 0x7ad   : > { %v5614_v14 = vpop.f32.mrb[42].mxu1 }
 0x7ae   : > { %v6183_v20 = vadd.f32 %v5614_v14, %v5589_v34  ;;  %v3502_v36 = vpop.f32.mrb[43].mxu1  ;;  %v6135_v34 = vpack.c.bf16 %v3775_v22, %v3767_v12  ;;  %v6123_v14 = vpack.c.bf16 %v3789_v63, %v3781_v56  ;;  %v3776_v12 = vld [vmem:[%s8099_s16 + $0x160] sm:$0xff]  ;;  %v3770_v22 = vld [vmem:[%s8099_s16 + $0x130] sm:$0xff] }
 0x7af   : > { %v6184_v37 = vadd.f32 %v3502_v36, %v3257_v39  ;;  %v3766_v39 = vld [vmem:[%s8099_s16 + $0x110] sm:$0xff]  ;;  %v3788_v36 = vld [vmem:[%s8099_s16 + $0x1c0] sm:$0xff] }
 0x7b0   : > { %v3521_v44 = vadd.f32 %v6183_v20, %v4744_v19  ;;  %v6137_v51 = vpack.c.bf16 %v3774_v48, %v3766_v39  ;;  %v3780_v20 = vld [vmem:[%s8099_s16 + $0x180] sm:$0xff]  ;;  %6124 = vmatprep.subr.bf16.mxu0 %v6123_v14  ;;  %v3793_v39 = vld [vmem:[%s8099_s16 + $0x1e8] sm:$0xff]  ;;  %v3787_v48 = vld [vmem:[%s8099_s16 + $0x1b8] sm:$0xff] }
 0x7b1   : > { %v3520_v10 = vadd.f32 %v6184_v37, %v4744_v19  ;;  %v3791_v19 = vld [vmem:[%s8099_s16 + $0x1d8] sm:$0xff]  ;;  %v3792_v14 = vld [vmem:[%s8099_s16 + $0x1e0] sm:$0xff] }
 0x7b2   : > { %v6139_v37 = vpack.c.bf16 %v3791_v19, %v3783_v16  ;;  %v3784_v16 = vld [vmem:[%s8099_s16 + $0x1a0] sm:$0xff]  ;;  %v3786_v19 = vld [vmem:[%s8099_s16 + $0x1b0] sm:$0xff] }
 0x7b3   : > { %v6099_v15 = vpack.c.bf16 %v3521_v44, %v3520_v10  ;;  %v6125_v44 = vpack.c.bf16 %v3788_v36, %v3780_v20  ;;  %v6141_v10 = vpack.c.bf16 %v3790_v60, %v3782_v54  ;;  %v3794_v20 = vld [vmem:[%s8099_s16 + $0x1f0] sm:$0xff]  ;;  %v3798_v60 = vlaneseq }
 0x7b4   : > { %v6173_v54 = vpack.c.bf16 %v3794_v20, %v3786_v19 }
 0x7b5   : > { %6100 = vmatprep.subr.bf16.mxu1 %v6099_v15  ;;  %6126 = vmatpush1.bf16.msra.mxu0 %v6125_v44  ;;  %v6157_v44 = vpack.c.bf16 %v3792_v14, %v3784_v16 }
 0x7b6   : > { %6102 = vmatpush3.bf16.msra.mxu1 %v6099_v15  ;;  %v3737_v15 = vld [vmem:[%s8099_s16 + $0x28] sm:$0xff] }
 0x7b7   : > { %6104 = vmatprep.subr.bf16.mxu1 %v6103_v24 }
 0x7b9   : > { %5620 = vmatmul.mubr.msk.f32.vlgmr.msra.gmra.mrb[44].mxu1 %vm3184_vm2, %v3523_v26  ;;  %v3747_v26 = vld [vmem:[%s8099_s16 + $0x78] sm:$0xff] }
 0x7ba   : > { %5622 = vmatprep.mubr.msk.f32.mxu1 %vm3184_vm2, %v3524_v38  ;;  %6106 = vmatpush3.bf16.msra.mxu1 %v6103_v24  ;;  %v3745_v24 = vld [vmem:[%s8099_s16 + $0x68] sm:$0xff]  ;;  %v6368_v38 = vmov 0.0  }
 0x7bb   : > { %6108 = vmatprep.subr.bf16.mxu1 %v6107_v43  ;;  %v6143_v25 = vpack.c.bf16 %v3745_v24, %v3737_v15  ;;  %3914 = vmatprep.mubr.f32.mxu0 %v6368_v38 }
 0x7bd   : > { %5623 = vmatmul.mubr.msk.f32.gmra.mrb[46].mxu1 %vm3184_vm2, %v3525_v41  ;;  %6144 = vmatprep.subr.bf16.mxu0 %v6143_v25  ;;  %v4715_v41 = vld [vmem:[%s8091_s8] ss:$0 sm:$0xff] }
 0x7be   : > { %6110 = vmatpush3.bf16.msra.mxu1 %v6107_v43  ;;  %v6159_v43 = vpack.c.bf16 %v3747_v26, %v3739_v40  ;;  %v6175_v1 = vadd.f32 %v4715_v41, %v7458_v29  ;;  %v6179_v23 = vadd.f32 %v4715_v41, %v7476_v31  ;;  %v6181_v61 = vadd.f32 %v4715_v41, %v7482_v55  ;;  %v3771_v31 = vld [vmem:[%s8099_s16 + $0x138] sm:$0xff]  ;;  %v3768_v55 = vld [vmem:[%s8099_s16 + $0x120] sm:$0xff] }
 0x7bf   : > { %6128 = vmatprep.subr.bf16.mxu1 %v6127_v0  ;;  %v6177_v0 = vadd.f32 %v4715_v41, %v7460_v30  ;;  %v3752_v30 = vld [vmem:[%s8099_s16 + $0xa0] sm:$0xff]  ;;  %v6153_v56 = vpack.c.bf16 %v3776_v12, %v3768_v55 }
 0x7c0   : > { %v7923_v40 = vld [vmem:[%s8100_s17] sm:$0xff] }
 0x88c   : > { %v5621_v13 = vpop.f32.mrb[44].mxu1 }
 0x88d   : > { %v3604_v6 = vpop.f32.mrb[45].mxu1 }
 0x88e   : > { %5633 = vmatprep.mubr.msk.f32.mxu1 %vm1874_vm1, %v3604_v6 }
 0x88f   : > { %5634 = vmatmul.mubr.msk.f32.vlgmr.msra.gmra.mrb[36].mxu1 %vm1874_vm1, %v5621_v13  ;;  %v3779_v13 = vld [vmem:[%s8099_s16 + $0x178] sm:$0xff] }
 0x890   : > { %v5624_v17 = vpop.f32.mrb[46].mxu1  ;;  %6130 = vmatpush1.bf16.msra.mxu1 %v6129_v32 }
 0x891   : > { %v3614_v33 = vpop.f32.mrb[47].mxu1  ;;  %6132 = vmatprep.subr.bf16.mxu1 %v6131_v18  ;;  %v6149_v18 = vpack.c.bf16 %v3760_v45, %v3752_v30 }
 0x892   : > { %5636 = vmatprep.mubr.msk.f32.mxu1 %vm1874_vm1, %v3614_v33  ;;  %v6167_v33 = vpack.c.bf16 %v3779_v13, %v3771_v31 }
 0x893   : > { %5637 = vmatmul.mubr.msk.f32.gmra.mrb[38].mxu1 %vm1874_vm1, %v5624_v17  ;;  %v3778_v17 = vld [vmem:[%s8099_s16 + $0x170] sm:$0xff] }
 0x894   : > { %6134 = vmatpush1.bf16.msra.mxu1 %v6133_v21  ;;  %4003 = vmatprep.mubr.f32.mxu1 %v6368_v38  ;;  %v6151_v21 = vpack.c.bf16 %v3777_v2, %v3769_v57  ;;  %v6169_v63 = vpack.c.bf16 %v3778_v17, %v3770_v22 }
 0x895   : > { %6136 = vmatprep.subr.bf16.mxu1 %v6135_v34  ;;  %v3785_v34 = vld [vmem:[%s8099_s16 + $0x1a8] sm:$0xff] }
 0x896   : > { %v6155_v36 = vpack.c.bf16 %v3793_v39, %v3785_v34 }
 0x898   : > { %6138 = vmatpush1.bf16.msra.mxu1 %v6137_v51  ;;  %v3795_v51 = vld [vmem:[%s8099_s16 + $0x1f8] sm:$0xff] }
 0x899   : > { %6140 = vmatprep.subr.bf16.mxu1 %v6139_v37  ;;  %v6171_v37 = vpack.c.bf16 %v3795_v51, %v3787_v48 }
 0x89c   : > { %6142 = vmatpush1.bf16.msra.mxu1 %v6141_v10  ;;  %v7916_v10 = vshrl.u32 %v3798_v60, 7 }
 0x89d   : > { %6160 = vmatprep.subr.bf16.mxu1 %v6159_v43 }
 0x89e   : > { %v3800_v15 = vsub.s32 0, %v7916_v10  ;;  %v3808_v24 = vsub.s32 2, %v7916_v10  ;;  %v3804_v25 = vsub.s32 1, %v7916_v10  ;;  %v3812_v26 = vsub.s32 3, %v7916_v10 }
 0x8a0   : > { %v7931_v43 = vrot.slane %v7923_v40, %v3808_v24  ;;  %v7934_v41 = vrot.slane %v7923_v40, %v3804_v25  ;;  %v7937_v42 = vrot.slane %v7923_v40, %v3812_v26  ;;  %v3816_v24 = vsub.s32 4, %v7916_v10 }
 0x962   : > { %v5635_v11 = vpop.f32.mrb[36].mxu1 }
 0x963   : > { %v7806_v29 = vadd.f32 %v6175_v1, %v5635_v11  ;;  %v3705_v35 = vpop.f32.mrb[37].mxu1 }
 0x964   : > { %v7811_v53 = vadd.f32 %v6177_v0, %v3705_v35 }
 0x966   : > { %v5638_v47 = vpop.f32.mrb[38].mxu1  ;;  %4753 = vmatmul.mubr.msk.f32.vlgmr.msra.gmra.mrb[50].mxu0 %vm1677_vm0, %v7811_v53  ;;  %4757 = vmatmul.mubr.msk.f32.vlgmr.msra.gmra.mrb[48].mxu1 %vm1677_vm0, %v7811_v53 }
 0x967   : > { %v7840_v32 = vadd.f32 %v6179_v23, %v5638_v47  ;;  %v3715_v6 = vpop.f32.mrb[39].mxu1  ;;  %6146 = vmatpush1.bf16.msra.mxu0 %v6145_v8  ;;  %6162 = vmatpush1.bf16.msra.mxu1 %v6161_v46 }
 0x968   : > { %v6182_v7 = vadd.f32 %v6181_v61, %v3715_v6  ;;  %3920 = vmatprep.mubr.f32.mxu0 %v6368_v38  ;;  %4009 = vmatprep.mubr.f32.mxu1 %v6368_v38 }
 0x969   : > { %6148 = vmatprep.subr.bf16.mxu0 %v6147_v58  ;;  %6164 = vmatprep.subr.bf16.mxu1 %v6163_v59 }
 0x96a   : > { %4754 = vmatmul.mubr.msk.f32.gmra.mrb[52].mxu0 %vm1677_vm0, %v7806_v29  ;;  %4758 = vmatmul.mubr.msk.f32.gmra.mrb[50].mxu1 %vm1677_vm0, %v7806_v29 }
 0x96b   : > { %6150 = vmatpush1.bf16.msra.mxu0 %v6149_v18  ;;  %6166 = vmatpush1.bf16.msra.mxu1 %v6165_v3 }
 0x96c   : > { %3926 = vmatprep.mubr.f32.mxu0 %v6368_v38  ;;  %4015 = vmatprep.mubr.f32.mxu1 %v6368_v38 }
 0x96d   : > { %6152 = vmatprep.subr.bf16.mxu0 %v6151_v21  ;;  %6168 = vmatprep.subr.bf16.mxu1 %v6167_v33 }
 0x96e   : > { %4755 = vmatmul.mubr.msk.f32.gmra.mrb[54].mxu0 %vm1677_vm0, %v6182_v7  ;;  %4759 = vmatmul.mubr.msk.f32.gmra.mrb[52].mxu1 %vm1677_vm0, %v6182_v7 }
 0x96f   : > { %6154 = vmatpush1.bf16.msra.mxu0 %v6153_v56  ;;  %6170 = vmatpush1.bf16.msra.mxu1 %v6169_v63 }
 0x970   : > { %3932 = vmatprep.mubr.f32.mxu0 %v6368_v38  ;;  %4021 = vmatprep.mubr.f32.mxu1 %v6368_v38 }
 0x971   : > { %6156 = vmatprep.subr.bf16.mxu0 %v6155_v36  ;;  %6172 = vmatprep.subr.bf16.mxu1 %v6171_v37 }
 0x972   : > { %4756 = vmatmul.mubr.msk.f32.gmra.mrb[56].mxu0 %vm1677_vm0, %v7840_v32  ;;  %4760 = vmatmul.mubr.msk.f32.gmra.mrb[54].mxu1 %vm1677_vm0, %v7840_v32 }
 0x973   : > { %6158 = vmatpush1.bf16.msra.mxu0 %v6157_v44  ;;  %6174 = vmatpush1.bf16.msra.mxu1 %v6173_v54 }
 0x974   : > { %4092 = vmatprep.mubr.f32.mxu0 %v6368_v38  ;;  %4181 = vmatprep.mubr.f32.mxu1 %v6368_v38 }
 0x976   : > { %4761 = vmatmul.mubr.msk.f32.vlgmr.msra.gmra.mrb[58].mxu0 %vm1677_vm0, %v7811_v53  ;;  %4765 = vmatmul.mubr.msk.f32.vlgmr.msra.gmra.mrb[56].mxu1 %vm1677_vm0, %v7811_v53 }
 0x977   : > { %4098 = vmatprep.mubr.f32.mxu0 %v6368_v38  ;;  %4187 = vmatprep.mubr.f32.mxu1 %v6368_v38 }
 0x97a   : > { %4762 = vmatmul.mubr.msk.f32.gmra.mrb[60].mxu0 %vm1677_vm0, %v7806_v29  ;;  %4766 = vmatmul.mubr.msk.f32.gmra.mrb[58].mxu1 %vm1677_vm0, %v7806_v29 }
 0x97b   : > { %4104 = vmatprep.mubr.f32.mxu0 %v6368_v38  ;;  %4193 = vmatprep.mubr.f32.mxu1 %v6368_v38 }
 0x97e   : > { %4763 = vmatmul.mubr.msk.f32.gmra.mrb[62].mxu0 %vm1677_vm0, %v6182_v7  ;;  %4767 = vmatmul.mubr.msk.f32.gmra.mrb[60].mxu1 %vm1677_vm0, %v6182_v7 }
 0x97f   : > { %4110 = vmatprep.mubr.f32.mxu0 %v6368_v38  ;;  %4199 = vmatprep.mubr.f32.mxu1 %v6368_v38  ;;  %v7928_v38 = vrot.slane %v7923_v40, %v3800_v15 }
 0x982   : > { %4764 = vmatmul.mubr.msk.f32.gmra.mrb[64].mxu0 %vm1677_vm0, %v7840_v32  ;;  %4768 = vmatmul.mubr.msk.f32.gmra.mrb[62].mxu1 %vm1677_vm0, %v7840_v32 }
 0xa39   : > { %v3916_v49 = vpop.f32.mrb[50].mxu0  ;;  %v4005_v52 = vpop.f32.mrb[48].mxu1 }
 0xa3a   : > { %v3917_v62 = vadd.f32 %v3916_v49, %v7928_v38  ;;  %v4006_v1 = vadd.f32 %v4005_v52, %v7931_v43  ;;  %v3918_v9 = vpop.f32.mrb[51].mxu0  ;;  %v4007_v11 = vpop.f32.mrb[49].mxu1 }
 0xa3b   : > { %v3919_v0 = vadd.f32 %v3918_v9, %v7934_v41  ;;  %v4008_v5 = vadd.f32 %v4007_v11, %v7937_v42 }
 0xa3c   : > { %v4206_v28 = vsub.f32 0.0, %v3917_v62  ;;  %v4208_v27 = vsub.f32 0.0, %v4006_v1  ;;  %v3824_v1 = vsub.s32 6, %v7916_v10 }
 0xa3d   : > { %v4207_v29 = vsub.f32 0.0, %v3919_v0  ;;  %v4209_v35 = vsub.f32 0.0, %v4008_v5  ;;  %v3922_v8 = vpop.f32.mrb[52].mxu0  ;;  %v4011_v46 = vpop.f32.mrb[50].mxu1 }
 0xa3e   : > { %v4238_v30 = vmul.f32 1.442695, %v4206_v28  ;;  %v4242_v53 = vmul.f32 1.442695, %v4208_v27  ;;  %v3923_v45 = vadd.f32 %v3922_v8, %v7928_v38  ;;  %v4012_v50 = vadd.f32 %v4011_v46, %v7931_v43  ;;  %v3924_v4 = vpop.f32.mrb[53].mxu0  ;;  %v4013_v23 = vpop.f32.mrb[51].mxu1 }
 0xa3f   : > { %v4240_v58 = vmul.f32 1.442695, %v4207_v29  ;;  %v4244_v59 = vmul.f32 1.442695, %v4209_v35  ;;  %v3925_v57 = vadd.f32 %v3924_v4, %v7934_v41  ;;  %v4014_v2 = vadd.f32 %v4013_v23, %v7937_v42 }
 0xa40   : > { %6216 = vpow2.f32 %v4238_v30  ;;  %v4214_v47 = vsub.f32 0.0, %v3923_v45  ;;  %v4216_v61 = vsub.f32 0.0, %v4012_v50  ;;  %v7961_v30 = vrot.slane %v7923_v40, %v3816_v24 }
 0xa41   : > { %6218 = vpow2.f32 %v4242_v53  ;;  %v3928_v31 = vpop.f32.mrb[54].mxu0  ;;  %v4017_v13 = vpop.f32.mrb[52].mxu1  ;;  %v4215_v7 = vsub.f32 0.0, %v3925_v57  ;;  %v4217_v33 = vsub.f32 0.0, %v4014_v2  ;;  %v3828_v53 = vsub.s32 7, %v7916_v10 }
 0xa42   : > { %6220 = vpow2.f32 %v4240_v58  ;;  %v4254_v32 = vmul.f32 1.442695, %v4214_v47  ;;  %v4258_v6 = vmul.f32 1.442695, %v4216_v61  ;;  %v3929_v18 = vadd.f32 %v3928_v31, %v7928_v38  ;;  %v3930_v3 = vpop.f32.mrb[55].mxu0  ;;  %v4019_v55 = vpop.f32.mrb[53].mxu1 }
 0xa43   : > { %6222 = vpow2.f32 %v4244_v59  ;;  %v4018_v12 = vadd.f32 %v4017_v13, %v7931_v43  ;;  %v3931_v17 = vadd.f32 %v3930_v3, %v7934_v41  ;;  %v4020_v21 = vadd.f32 %v4019_v55, %v7937_v42 }
 0xa44   : > { %6224 = vpow2.f32 %v4254_v32  ;;  %v4222_v22 = vsub.f32 0.0, %v3929_v18  ;;  %v4256_v20 = vmul.f32 1.442695, %v4215_v7  ;;  %v4260_v44 = vmul.f32 1.442695, %v4217_v33 }
 0xa45   : > { %6226 = vpow2.f32 %v4258_v6  ;;  %v4224_v34 = vsub.f32 0.0, %v4018_v12  ;;  %v3934_v39 = vpop.f32.mrb[56].mxu0  ;;  %v4023_v48 = vpop.f32.mrb[54].mxu1  ;;  %v4223_v56 = vsub.f32 0.0, %v3931_v17  ;;  %v4225_v63 = vsub.f32 0.0, %v4020_v21 }
 0xa46   : > { %v4270_v51 = vmul.f32 1.442695, %v4222_v22  ;;  %v3936_v16 = vpop.f32.mrb[57].mxu0  ;;  %v4025_v14 = vpop.f32.mrb[55].mxu1  ;;  %v3935_v62 = vadd.f32 %v3934_v39, %v7928_v38  ;;  %v4024_v0 = vadd.f32 %v4023_v48, %v7931_v43  ;;  %v3820_v38 = vsub.s32 5, %v7916_v10 }
 0xa47   : > { %v4274_v19 = vmul.f32 1.442695, %v4224_v34  ;;  %v4272_v36 = vmul.f32 1.442695, %v4223_v56  ;;  %v4276_v37 = vmul.f32 1.442695, %v4225_v63  ;;  %v3937_v27 = vadd.f32 %v3936_v16, %v7934_v41 }
 0xa48   : > { %6228 = vpow2.f32 %v4270_v51  ;;  %v4230_v4 = vsub.f32 0.0, %v3935_v62  ;;  %v7966_v23 = vrot.slane %v7923_v40, %v3824_v1  ;;  %v4232_v59 = vsub.f32 0.0, %v4024_v0 }
 0xa49   : > { %6230 = vpow2.f32 %v4274_v19  ;;  %v4094_v54 = vpop.f32.mrb[58].mxu0  ;;  %v4183_v60 = vpop.f32.mrb[56].mxu1  ;;  %v4026_v57 = vadd.f32 %v4025_v14, %v7937_v42  ;;  %v4231_v47 = vsub.f32 0.0, %v3937_v27  ;;  %v7975_v13 = vrot.slane %v7923_v40, %v3820_v38 }
 0xa4a   : > { %v6217_v15 = vpop.eup %6216  ;;  %6232 = vpow2.f32 %v4272_v36  ;;  %v7952_v25 = vpop.f32.mrb[59].mxu0  ;;  %v4095_v31 = vadd.f32 %v4094_v54, %v7961_v30  ;;  %v7978_v32 = vrot.slane %v7923_v40, %v3828_v53  ;;  %v4286_v55 = vmul.f32 1.442695, %v4230_v4 }
 0xa4b   : > { %v7954_v26 = vpop.f32.mrb[57].mxu1  ;;  %v6219_v49 = vpop.eup %6218  ;;  %v4302_v52 = vadd.f32 1.0, %v6217_v15  ;;  %6234 = vpow2.f32 %v4276_v37  ;;  %v4184_v7 = vadd.f32 %v4183_v60, %v7966_v23  ;;  %v4290_v17 = vmul.f32 1.442695, %v4232_v59 }
 0xa4c   : > { %v6221_v9 = vpop.eup %6220  ;;  %v4304_v11 = vadd.f32 1.0, %v6219_v49  ;;  %6236 = vpow2.f32 %v4256_v20  ;;  %v4233_v21 = vsub.f32 0.0, %v4026_v57  ;;  %v4288_v40 = vmul.f32 1.442695, %v4231_v47 }
 0xa4d   : > { %v6223_v5 = vpop.eup %6222  ;;  %v4303_v28 = vadd.f32 1.0, %v6221_v9  ;;  %6238 = vpow2.f32 %v4260_v44  ;;  %v4100_v29 = vpop.f32.mrb[60].mxu0  ;;  %v4097_v63 = vadd.f32 %v7952_v25, %v7975_v13  ;;  %v4186_v16 = vadd.f32 %v7954_v26, %v7978_v32 }
 0xa4e   : > { %v4189_v35 = vpop.f32.mrb[58].mxu1  ;;  %v6225_v8 = vpop.eup %6224  ;;  %v4305_v46 = vadd.f32 1.0, %v6223_v5  ;;  %6240 = vrcp.f32 %v4302_v52  ;;  %v4210_v36 = vsub.f32 0.0, %v4095_v31  ;;  %v4101_v37 = vadd.f32 %v4100_v29, %v7961_v30 }
 0xa4f   : > { %v4102_v45 = vpop.f32.mrb[61].mxu0  ;;  %v6227_v50 = vpop.eup %6226  ;;  %v4310_v43 = vadd.f32 1.0, %v6225_v8  ;;  %6242 = vrcp.f32 %v4304_v11  ;;  %v4190_v44 = vadd.f32 %v4189_v35, %v7966_v23  ;;  %v4292_v54 = vmul.f32 1.442695, %v4233_v21 }
 0xa50   : > { %v7968_v41 = vpop.f32.mrb[59].mxu1  ;;  %v4312_v58 = vadd.f32 1.0, %v6227_v50  ;;  %6244 = vrcp.f32 %v4303_v28  ;;  %v4212_v60 = vsub.f32 0.0, %v4184_v7  ;;  %v4103_v15 = vadd.f32 %v4102_v45, %v7975_v13 }
 0xa51   : > { %v4106_v61 = vpop.f32.mrb[62].mxu0  ;;  %v7971_v2 = vpop.f32.mrb[60].mxu1  ;;  %6246 = vrcp.f32 %v4305_v46  ;;  %v4211_v62 = vsub.f32 0.0, %v4097_v63  ;;  %v4213_v1 = vsub.f32 0.0, %v4186_v16  ;;  %v4246_v11 = vmul.f32 1.442695, %v4210_v36 }
 0xa52   : > { %v6229_v10 = vpop.eup %6228  ;;  %v7980_v6 = vpop.f32.mrb[63].mxu0  ;;  %6248 = vrcp.f32 %v4310_v43  ;;  %v4107_v26 = vadd.f32 %v4106_v61, %v7961_v30  ;;  %v4218_v0 = vsub.f32 0.0, %v4101_v37  ;;  %v4220_v5 = vsub.f32 0.0, %v4190_v44 }
 0xa53   : > { %v7982_v18 = vpop.f32.mrb[61].mxu1  ;;  %v6231_v42 = vpop.eup %6230  ;;  %v4318_v3 = vadd.f32 1.0, %v6229_v10  ;;  %6250 = vrcp.f32 %v4312_v58  ;;  %v4250_v27 = vmul.f32 1.442695, %v4212_v60  ;;  %v4219_v29 = vsub.f32 0.0, %v4103_v15 }
 0xa54   : > { %v6233_v12 = vpop.eup %6232  ;;  %v4320_v22 = vadd.f32 1.0, %v6231_v42  ;;  %v4226_v8 = vsub.f32 0.0, %v4107_v26  ;;  %v4248_v38 = vmul.f32 1.442695, %v4211_v62  ;;  %v8005_v53 = vmul.f32 1.442695, %v4213_v1 }
 0xa55   : > { %v6235_v33 = vpop.eup %6234  ;;  %6252 = vrcp.f32 %v4318_v3  ;;  %v4319_v34 = vadd.f32 1.0, %v6233_v12  ;;  %v7985_v39 = vpop.f32.mrb[64].mxu0  ;;  %v8007_v50 = vmul.f32 1.442695, %v4218_v0  ;;  %v8009_v43 = vmul.f32 1.442695, %v4220_v5 }
 0xa56   : > { %v7987_v48 = vpop.f32.mrb[62].mxu1  ;;  %v6237_v51 = vpop.eup %6236  ;;  %6254 = vrcp.f32 %v4320_v22  ;;  %v4321_v56 = vadd.f32 1.0, %v6235_v33  ;;  %v4192_v4 = vadd.f32 %v7968_v41, %v7978_v32  ;;  %v8013_v47 = vmul.f32 1.442695, %v4219_v29  ;;  %v6345_v0 = vld [vmem:[%s6698_s20 + $0x10] sm:$0xff] }
 0xa57   : > { %v7993_v14 = vpop.f32.mrb[65].mxu0  ;;  %v7995_v19 = vpop.f32.mrb[63].mxu1  ;;  %6256 = vrcp.f32 %v4319_v34  ;;  %v4311_v25 = vadd.f32 1.0, %v6237_v51  ;;  %v4278_v42 = vmul.f32 1.442695, %v4226_v8  ;;  %v8017_v3 = vadd.f32 %v7971_v2, %v7966_v23  ;;  %v6346_v8 = vld [vmem:[%s6698_s20 + $0x8] sm:$0xff] }
 0xa58   : > { %v6239_v20 = vpop.eup %6238  ;;  %6258 = vrcp.f32 %v4321_v56  ;;  %v8021_v41 = vadd.f32 %v7980_v6, %v7975_v13 }
 0xa59   : > { %v6241_v24 = vpop.eup %6240  ;;  %6260 = vpow2.f32 %v4286_v55  ;;  %v4313_v52 = vadd.f32 1.0, %v6239_v20 }
 0xa5a   : > { %v6243_v49 = vpop.eup %6242  ;;  %6262 = vpow2.f32 %v4290_v17  ;;  %v4769_v59 = vadd.f32 -0.5, %v6241_v24 }
 0xa5b   : > { %v6245_v9 = vpop.eup %6244  ;;  %6264 = vpow2.f32 %v4288_v40  ;;  %v4771_v10 = vadd.f32 -0.5, %v6243_v49  ;;  %v4221_v40 = vsub.f32 0.0, %v4192_v4  ;;  %v4113_v4 = vadd.f32 %v7985_v39, %v7961_v30 }
 0xa5c   : > { %v6247_v28 = vpop.eup %6246  ;;  %6266 = vpow2.f32 %v4292_v54  ;;  %v4770_v7 = vadd.f32 -0.5, %v6245_v9  ;;  %v4228_v9 = vsub.f32 0.0, %v8017_v3  ;;  %v4204_v39 = vadd.f32 %v7995_v19, %v7978_v32 }
 0xa5d   : > { %v8001_v35 = vpop.eup %6248  ;;  %6268 = vrcp.f32 %v4311_v25  ;;  %v4772_v21 = vadd.f32 -0.5, %v6247_v28 }
 0xa5e   : > { %v8003_v46 = vpop.eup %6250  ;;  %6270 = vrcp.f32 %v4313_v52  ;;  %v6344_v52 = vld [vmem:[%s6698_s20] sm:$0xff]  ;;  %v4237_v19 = vsub.f32 0.0, %v4204_v39 }
 0xa5f   : > { %v6253_v45 = vpop.eup %6252  ;;  %6272 = vpow2.f32 %v4246_v11 }
 0xa60   : > { %v6255_v58 = vpop.eup %6254  ;;  %v4785_v57 = vadd.f32 -0.5, %v6253_v45  ;;  %6274 = vpow2.f32 %v4250_v27  ;;  %v4198_v27 = vadd.f32 %v7982_v18, %v7978_v32  ;;  %v4268_v45 = vmul.f32 1.442695, %v4221_v40 }
 0xa61   : > { %v6257_v61 = vpop.eup %6256  ;;  %v4787_v31 = vadd.f32 -0.5, %v6255_v58  ;;  %6276 = vpow2.f32 %v4248_v38  ;;  %v6347_v58 = vld [vmem:[%s6698_s20 + $0x18] sm:$0xff]  ;;  %v4202_v18 = vadd.f32 %v7987_v48, %v7966_v23  ;;  %v4777_v48 = vadd.f32 -0.5, %v8001_v35 }
 0xa62   : > { %v6259_v55 = vpop.eup %6258  ;;  %v4430_v12 = vadd.f32 %v4785_v57, %v4769_v59  ;;  %v4786_v22 = vadd.f32 -0.5, %v6257_v61  ;;  %6278 = vpow2.f32 %v4278_v42  ;;  %v4227_v57 = vsub.f32 0.0, %v8021_v41 }
 0xa63   : > { %v6261_v17 = vpop.eup %6260  ;;  %v4432_v33 = vadd.f32 %v4787_v31, %v4771_v10  ;;  %v4788_v34 = vadd.f32 -0.5, %v6259_v55  ;;  %v4229_v30 = vsub.f32 0.0, %v4198_v27  ;;  %v4282_v31 = vmul.f32 1.442695, %v4228_v9  ;;  %v6348_v9 = vld [vmem:[%s6698_s20 + $0x40] sm:$0xff]  ;;  %v6349_v27 = vld [vmem:[%s6698_s20 + $0x50] sm:$0xff] }
 0xa64   : > { %v6263_v51 = vpop.eup %6262  ;;  %v4446_v56 = vmul.f32 0.5, %v4430_v12  ;;  %v4431_v63 = vadd.f32 %v4786_v22, %v4770_v7  ;;  %v4326_v16 = vadd.f32 1.0, %v6261_v17  ;;  %v4234_v42 = vsub.f32 0.0, %v4113_v4  ;;  %v6350_v4 = vld [vmem:[%s6698_s20 + $0x48] sm:$0xff] }
 0xa65   : > { %v6265_v2 = vpop.eup %6264  ;;  %v4448_v20 = vmul.f32 0.5, %v4432_v33  ;;  %v4433_v36 = vadd.f32 %v4788_v34, %v4772_v21  ;;  %v4328_v37 = vadd.f32 1.0, %v6263_v51  ;;  %v4280_v3 = vmul.f32 1.442695, %v4227_v57 }
 0xa66   : > { %v6267_v44 = vpop.eup %6266  ;;  %v4462_v6 = vadd.f32 1.0, %v4446_v56  ;;  %v4447_v54 = vmul.f32 0.5, %v4431_v63  ;;  %6280 = vrcp.f32 %v4326_v16  ;;  %v4327_v60 = vadd.f32 1.0, %v6265_v2 }
 0xa67   : > { %v6269_v15 = vpop.eup %6268  ;;  %v4464_v24 = vadd.f32 1.0, %v4448_v20  ;;  %v4449_v25 = vmul.f32 0.5, %v4433_v36  ;;  %6282 = vrcp.f32 %v4328_v37  ;;  %v4329_v26 = vadd.f32 1.0, %v6267_v44 }
 0xa68   : > { %v6271_v49 = vpop.eup %6270  ;;  %v4478_v62 = vmul.f32 %v6344_v52, %v4462_v6  ;;  %v4463_v1 = vadd.f32 1.0, %v4447_v54  ;;  %6284 = vrcp.f32 %v4327_v60  ;;  %v4236_v55 = vsub.f32 0.0, %v4202_v18  ;;  %v6351_v18 = vld [vmem:[%s6698_s20 + $0x58] sm:$0xff] }
 0xa69   : > { %v6273_v11 = vpop.eup %6272  ;;  %v4480_v5 = vmul.f32 %v6345_v0, %v4464_v24  ;;  %v4465_v28 = vadd.f32 1.0, %v4449_v25  ;;  %6286 = vrcp.f32 %v4329_v26  ;;  %v4284_v32 = vmul.f32 1.442695, %v4229_v30 }
 0xa6a   : > { %v6275_v29 = vpop.eup %6274  ;;  %4494 = vst [vmem:[%s8028_s23] sm:$0xff] %v4478_v62  ;;  %v4479_v38 = vmul.f32 %v6346_v8, %v4463_v1  ;;  %6288 = vpow2.f32 %v8005_v53  ;;  %v4306_v61 = vadd.f32 1.0, %v6273_v11  ;;  %v4115_v53 = vadd.f32 %v7993_v14, %v7975_v13 }
 0xa6b   : > { %4496 = vst [vmem:[%s8028_s23 + $0x10] sm:$0xff] %v4480_v5  ;;  %v4481_v59 = vmul.f32 %v6347_v58, %v4465_v28  ;;  %6290 = vpow2.f32 %v8007_v50  ;;  %v4308_v10 = vadd.f32 1.0, %v6275_v29  ;;  %v6277_v50 = vpop.eup %6276  ;;  %v4778_v14 = vadd.f32 -0.5, %v6269_v15 }
 0xa6c   : > { %4495 = vst [vmem:[%s8028_s23 + $0x8] sm:$0xff] %v4479_v38  ;;  %6292 = vpow2.f32 %v8009_v43  ;;  %v6279_v23 = vpop.eup %6278  ;;  %v4779_v43 = vadd.f32 -0.5, %v8003_v46  ;;  %v4780_v17 = vadd.f32 -0.5, %v6271_v49  ;;  %v4294_v33 = vmul.f32 1.442695, %v4234_v42 }
 0xa6d   : > { %4497 = vst [vmem:[%s8028_s23 + $0x18] sm:$0xff] %v4481_v59  ;;  %6294 = vpow2.f32 %v8013_v47  ;;  %v4322_v7 = vadd.f32 1.0, %v6279_v23  ;;  %v4235_v47 = vsub.f32 0.0, %v4115_v53  ;;  %v4298_v40 = vmul.f32 1.442695, %v4236_v55 }
 0xa6e   : > { %6296 = vpow2.f32 %v4268_v45  ;;  %v4300_v37 = vmul.f32 1.442695, %v4237_v19  ;;  %v4307_v60 = vadd.f32 1.0, %v6277_v50 }
 0xa6f   : > { %6298 = vrcp.f32 %v4306_v61  ;;  %v4296_v16 = vmul.f32 1.442695, %v4235_v47 }
 0xa70   : > { %v6281_v13 = vpop.eup %6280  ;;  %6300 = vrcp.f32 %v4308_v10 }
 0xa71   : > { %v6283_v12 = vpop.eup %6282  ;;  %v4793_v22 = vadd.f32 -0.5, %v6281_v13  ;;  %6302 = vrcp.f32 %v4322_v7 }
 0xa72   : > { %v6285_v41 = vpop.eup %6284  ;;  %v4795_v21 = vadd.f32 -0.5, %v6283_v12  ;;  %6304 = vpow2.f32 %v4282_v31 }
 0xa73   : > { %v6287_v35 = vpop.eup %6286  ;;  %v4438_v34 = vadd.f32 %v4793_v22, %v4777_v48  ;;  %v4794_v46 = vadd.f32 -0.5, %v6285_v41  ;;  %6306 = vpow2.f32 %v4280_v3 }
 0xa74   : > { %v6289_v51 = vpop.eup %6288  ;;  %v4440_v56 = vadd.f32 %v4795_v21, %v4779_v43  ;;  %v4796_v63 = vadd.f32 -0.5, %v6287_v35  ;;  %6308 = vpow2.f32 %v4284_v32 }
 0xa75   : > { %v6291_v2 = vpop.eup %6290  ;;  %v4454_v20 = vmul.f32 0.5, %v4438_v34  ;;  %v4439_v36 = vadd.f32 %v4794_v46, %v4778_v14  ;;  %6310 = vpow2.f32 %v4294_v33  ;;  %v4309_v26 = vadd.f32 1.0, %v6289_v51 }
 0xa76   : > { %v6293_v44 = vpop.eup %6292  ;;  %v4456_v6 = vmul.f32 0.5, %v4440_v56  ;;  %v4441_v54 = vadd.f32 %v4796_v63, %v4780_v17  ;;  %6312 = vpow2.f32 %v4298_v40  ;;  %v4314_v1 = vadd.f32 1.0, %v6291_v2  ;;  %v6352_v17 = vld [vmem:[%s6698_s20 + $0x20] sm:$0xff] }
 0xa77   : > { %v6295_v15 = vpop.eup %6294  ;;  %v4470_v24 = vadd.f32 1.0, %v4454_v20  ;;  %v4455_v25 = vmul.f32 0.5, %v4439_v36  ;;  %6314 = vpow2.f32 %v4296_v16  ;;  %v4316_v5 = vadd.f32 1.0, %v6293_v44 }
 0xa78   : > { %v6297_v49 = vpop.eup %6296  ;;  %v4472_v52 = vadd.f32 1.0, %v4456_v6  ;;  %v4457_v62 = vmul.f32 0.5, %v4441_v54  ;;  %6316 = vpow2.f32 %v4300_v37  ;;  %v4315_v38 = vadd.f32 1.0, %v6295_v15 }
 0xa79   : > { %v4486_v11 = vmul.f32 %v6348_v9, %v4470_v24  ;;  %v4471_v0 = vadd.f32 1.0, %v4455_v25  ;;  %v6299_v28 = vpop.eup %6298  ;;  %6318 = vrcp.f32 %v4307_v60  ;;  %v4317_v59 = vadd.f32 1.0, %v6297_v49 }
 0xa7a   : > { %v4488_v29 = vmul.f32 %v6349_v27, %v4472_v52  ;;  %v4473_v8 = vadd.f32 1.0, %v4457_v62  ;;  %v6301_v45 = vpop.eup %6300  ;;  %6320 = vrcp.f32 %v4309_v26  ;;  %v4773_v10 = vadd.f32 -0.5, %v6299_v28 }
 0xa7b   : > { %4502 = vst [vmem:[%s8028_s23 + $0x40] sm:$0xff] %v4486_v11  ;;  %v4487_v58 = vmul.f32 %v6350_v4, %v4471_v0  ;;  %v6303_v57 = vpop.eup %6302  ;;  %6322 = vrcp.f32 %v4314_v1  ;;  %v4775_v56 = vadd.f32 -0.5, %v6301_v45 }
 0xa7c   : > { %4504 = vst [vmem:[%s8028_s23 + $0x50] sm:$0xff] %v4488_v29  ;;  %v4489_v61 = vmul.f32 %v6351_v18, %v4473_v8  ;;  %v6305_v53 = vpop.eup %6304  ;;  %6324 = vrcp.f32 %v4316_v5  ;;  %v4789_v30 = vadd.f32 -0.5, %v6303_v57 }
 0xa7d   : > { %4503 = vst [vmem:[%s8028_s23 + $0x48] sm:$0xff] %v4487_v58  ;;  %v6307_v39 = vpop.eup %6306  ;;  %6326 = vrcp.f32 %v4315_v38  ;;  %v4324_v50 = vadd.f32 1.0, %v6305_v53 }
 0xa7e   : > { %4505 = vst [vmem:[%s8028_s23 + $0x58] sm:$0xff] %v4489_v61  ;;  %v6309_v31 = vpop.eup %6308  ;;  %6328 = vrcp.f32 %v4317_v59  ;;  %v4434_v42 = vadd.f32 %v4789_v30, %v4773_v10  ;;  %v4323_v23 = vadd.f32 1.0, %v6307_v39  ;;  %v6353_v59 = vld [vmem:[%s6698_s20 + $0x30] sm:$0xff]  ;;  %v6354_v10 = vld [vmem:[%s6698_s20 + $0x28] sm:$0xff] }
 0xa7f   : > { %v6311_v48 = vpop.eup %6310  ;;  %6330 = vrcp.f32 %v4324_v50  ;;  %v4325_v43 = vadd.f32 1.0, %v6309_v31  ;;  %v6355_v31 = vld [vmem:[%s6698_s20 + $0x38] sm:$0xff] }
 0xa80   : > { %v6313_v3 = vpop.eup %6312  ;;  %v4450_v55 = vmul.f32 0.5, %v4434_v42  ;;  %6332 = vrcp.f32 %v4323_v23  ;;  %v4330_v13 = vadd.f32 1.0, %v6311_v48 }
 0xa81   : > { %v6315_v14 = vpop.eup %6314  ;;  %6334 = vrcp.f32 %v4325_v43  ;;  %v4332_v7 = vadd.f32 1.0, %v6313_v3  ;;  %v6356_v43 = vld [vmem:[%s6698_s20 + $0x60] sm:$0xff] }
 0xa82   : > { %v6317_v47 = vpop.eup %6316  ;;  %v4466_v12 = vadd.f32 1.0, %v4450_v55  ;;  %6336 = vrcp.f32 %v4330_v13  ;;  %v4331_v22 = vadd.f32 1.0, %v6315_v14  ;;  %v6357_v13 = vld [vmem:[%s6698_s20 + $0x70] sm:$0xff] }
 0xa83   : > { %v6319_v32 = vpop.eup %6318  ;;  %6338 = vrcp.f32 %v4332_v7  ;;  %v4333_v19 = vadd.f32 1.0, %v6317_v47  ;;  %v6358_v47 = vld [vmem:[%s6698_s20 + $0x68] sm:$0xff] }
 0xa84   : > { %v6321_v41 = vpop.eup %6320  ;;  %v4482_v21 = vmul.f32 %v6352_v17, %v4466_v12  ;;  %6340 = vrcp.f32 %v4331_v22  ;;  %v4774_v2 = vadd.f32 -0.5, %v6319_v32  ;;  %v6359_v22 = vld [vmem:[%s6698_s20 + $0x78] sm:$0xff] }
 0xa85   : > { %v6323_v33 = vpop.eup %6322  ;;  %6342 = vrcp.f32 %v4333_v19  ;;  %v4776_v37 = vadd.f32 -0.5, %v6321_v41 }
 0xa86   : > { %v6325_v35 = vpop.eup %6324  ;;  %4498 = vst [vmem:[%s8028_s23 + $0x20] sm:$0xff] %v4482_v21  ;;  %v4781_v60 = vadd.f32 -0.5, %v6323_v33 }
 0xa87   : > { %v6327_v34 = vpop.eup %6326  ;;  %v4783_v15 = vadd.f32 -0.5, %v6325_v35 }
 0xa88   : > { %v6329_v46 = vpop.eup %6328  ;;  %v4782_v49 = vadd.f32 -0.5, %v6327_v34 }
 0xa89   : > { %v6331_v40 = vpop.eup %6330  ;;  %v4784_v11 = vadd.f32 -0.5, %v6329_v46 }
 0xa8a   : > { %v6333_v51 = vpop.eup %6332  ;;  %v4791_v63 = vadd.f32 -0.5, %v6331_v40 }
 0xa8b   : > { %v6335_v16 = vpop.eup %6334  ;;  %v4790_v20 = vadd.f32 -0.5, %v6333_v51 }
 0xa8c   : > { %v6337_v36 = vpop.eup %6336  ;;  %v4436_v44 = vadd.f32 %v4791_v63, %v4775_v56  ;;  %v4792_v6 = vadd.f32 -0.5, %v6335_v16 }
 0xa8d   : > { %v6339_v54 = vpop.eup %6338  ;;  %v4435_v24 = vadd.f32 %v4790_v20, %v4774_v2  ;;  %v4797_v25 = vadd.f32 -0.5, %v6337_v36 }
 0xa8e   : > { %v6341_v26 = vpop.eup %6340  ;;  %v4452_v52 = vmul.f32 0.5, %v4436_v44  ;;  %v4437_v62 = vadd.f32 %v4792_v6, %v4776_v37  ;;  %v4799_v1 = vadd.f32 -0.5, %v6339_v54 }
 0xa8f   : > { %v6343_v9 = vpop.eup %6342  ;;  %v4451_v0 = vmul.f32 0.5, %v4435_v24  ;;  %v4442_v5 = vadd.f32 %v4797_v25, %v4781_v60  ;;  %v4798_v28 = vadd.f32 -0.5, %v6341_v26 }
 0xa90   : > { %v4468_v27 = vadd.f32 1.0, %v4452_v52  ;;  %v4453_v29 = vmul.f32 0.5, %v4437_v62  ;;  %v4444_v8 = vadd.f32 %v4799_v1, %v4783_v15  ;;  %v4800_v38 = vadd.f32 -0.5, %v6343_v9 }
 0xa91   : > { %v4467_v45 = vadd.f32 1.0, %v4451_v0  ;;  %v4458_v4 = vmul.f32 0.5, %v4442_v5  ;;  %v4443_v58 = vadd.f32 %v4798_v28, %v4782_v49 }
 0xa92   : > { %v4484_v57 = vmul.f32 %v6353_v59, %v4468_v27  ;;  %v4469_v18 = vadd.f32 1.0, %v4453_v29  ;;  %v4460_v61 = vmul.f32 0.5, %v4444_v8  ;;  %v4445_v53 = vadd.f32 %v4800_v38, %v4784_v11 }
 0xa93   : > { %v4483_v30 = vmul.f32 %v6354_v10, %v4467_v45  ;;  %v4474_v39 = vadd.f32 1.0, %v4458_v4  ;;  %v4459_v50 = vmul.f32 0.5, %v4443_v58 }
 0xa94   : > { %4500 = vst [vmem:[%s8028_s23 + $0x30] sm:$0xff] %v4484_v57  ;;  %v4485_v42 = vmul.f32 %v6355_v31, %v4469_v18  ;;  %v4476_v23 = vadd.f32 1.0, %v4460_v61  ;;  %v4461_v48 = vmul.f32 0.5, %v4445_v53 }
 0xa95   : > { %4499 = vst [vmem:[%s8028_s23 + $0x28] sm:$0xff] %v4483_v30  ;;  %v4490_v3 = vmul.f32 %v6356_v43, %v4474_v39  ;;  %v4475_v55 = vadd.f32 1.0, %v4459_v50 }
 0xa96   : > { %4501 = vst [vmem:[%s8028_s23 + $0x38] sm:$0xff] %v4485_v42  ;;  %v4492_v14 = vmul.f32 %v6357_v13, %v4476_v23  ;;  %v4477_v7 = vadd.f32 1.0, %v4461_v48 }
 0xa97   : > { %4506 = vst [vmem:[%s8028_s23 + $0x60] sm:$0xff] %v4490_v3  ;;  %v4491_v12 = vmul.f32 %v6358_v47, %v4475_v55 }
 0xa98   : > { %4508 = vst [vmem:[%s8028_s23 + $0x70] sm:$0xff] %v4492_v14  ;;  %v4493_v32 = vmul.f32 %v6359_v22, %v4477_v7 }
 0xa99   : > { %4507 = vst [vmem:[%s8028_s23 + $0x68] sm:$0xff] %v4491_v12 }
 0xa9a   : > { %4509 = vst [vmem:[%s8028_s23 + $0x78] sm:$0xff] %v4493_v32 }
 0xa9b PF: > { %s8133_s19 = sld [smem:[#allocation2_spill]] }
 0xaa1   : > { %s28_s27 = sadd.s32 1, %s8133_s19  }
 0xaa2   : > { %p25_p12 = scmp.ge.s32.totalorder %s28_s27, 10  }
 0xaa4   :  { %27 = sbr.rel (!%p25_p12) target bundleno = 4 (0x4), region = 138 }

</bundles_post_ra>
